<compile_context>
chip_gen: v6e
topology: v6e:2x2x1
jax: 0.10.0
libtpu: 0.0.40
codegen_flags: <defaults>
</compile_context>

<pallas_src>
import math

import jax
import jax.numpy as jnp
from jax.experimental import pallas as pl
from jax.experimental.pallas import tpu as pltpu

# ----------------------------- model dimensions -----------------------------
B, S, SC, D, H, FF = 2, 8, 8, 32, 4, 64   # batch, seq, cond-seq, d_model, heads, d_ff
HD = D // H
N_LAYERS = 2
EPS = 1e-5

PARAM_ORDER = [
    "ln_g", "ln_b",
    "wqkv", "bqkv", "wo_sa", "bo_sa",
    "wq_ca", "bq_ca", "wkv_ca", "bkv_ca", "wo_ca", "bo_ca",
    "w1", "b1", "w2", "b2",
    "film_w", "film_b",
]


# ------------------------------ in-kernel math ------------------------------
def _layer_norm(h, g, b):
    mu = jnp.mean(h, axis=-1, keepdims=True)
    xc = h - mu
    var = jnp.mean(xc * xc, axis=-1, keepdims=True)
    return xc * jax.lax.rsqrt(var + EPS) * g + b


def _softmax_lastdim(s):
    m = jnp.max(s, axis=-1, keepdims=True)
    p = jnp.exp(s - m)
    # divide on the (otherwise idle) EUP slot instead of the VALU
    return p * pl.reciprocal(jnp.sum(p, axis=-1, keepdims=True), approx=True)


def _attend(q, k, v):
    """Head-batched multi-head attention.  q: (Sq, D), k/v: (Sk, D) -> (Sq, D).

    Head split = 2-D transpose + sublane-split reshape (lane dim untouched), then
    both matmuls are single batched dot_generals over all H heads.
    """
    sq = q.shape[0]
    scale = 1.0 / math.sqrt(HD)
    qh = jnp.swapaxes(q.T.reshape(H, HD, sq), 1, 2)        # (H, Sq, HD)
    kh = k.T.reshape(H, HD, -1)                            # (H, HD, Sk)
    vh = v.T.reshape(H, HD, -1)                            # (H, HD, Sk)
    s = jnp.einsum("hqd,hdk->hqk", qh, kh,
                   preferred_element_type=jnp.float32) * scale   # (H, Sq, Sk)
    p = _softmax_lastdim(s)
    oT = jnp.einsum("hdk,hqk->hdq", vh, p,
                    preferred_element_type=jnp.float32)    # (H, HD, Sq)
    return oT.reshape(D, sq).T                             # (Sq, D)


# ------------------------------- Pallas kernel -------------------------------
def stack_kernel(x_ref, cond_ref, t_ref,
                 ln_g, ln_b, wqkv, bqkv, wo_sa, bo_sa,
                 wq_ca, bq_ca, wkv_ca, bkv_ca, wo_ca, bo_ca,
                 w1, b1, w2, b2, film_w, film_b,
                 o_ref):
    x = x_ref[0]        # (S, D)
    cond = cond_ref[0]  # (SC, D)
    t = t_ref[0]        # (1, D)

    # Mish(t) is identical for every FiLM of every layer -> compute once.
    # Stable softplus: max(t,0) + log(1 + exp(-|t|))  (no overflow for large t).
    softplus_t = jnp.maximum(t, 0.0) + jnp.log(1.0 + jnp.exp(-jnp.abs(t)))
    mish_t = t * jnp.tanh(softplus_t)                      # (1, D)

    for l in range(N_LAYERS):                              # static unroll, x stays in vregs/VMEM
        g = ln_g[l]        # (3, D) : LN gammas for [self-attn, cross-attn, ffn]
        be = ln_b[l]       # (3, D)

        # All three FiLM (scale, shift) pairs in ONE 1-row matmul, sliced afterwards.
        film = jnp.dot(mish_t, film_w[l],
                       preferred_element_type=jnp.float32) + film_b[l]   # (1, 6D)

        # ---- self-attention sub-block (pre-norm) + FiLM residual ----
        h = _layer_norm(x, g[0:1], be[0:1])
        qkv = jnp.dot(h, wqkv[l], preferred_element_type=jnp.float32) + bqkv[l]
        sa = _attend(qkv[:, :D], qkv[:, D:2 * D], qkv[:, 2 * D:])
        sa = jnp.dot(sa, wo_sa[l], preferred_element_type=jnp.float32) + bo_sa[l]
        x = x + (film[:, 0:D] + 1.0) * sa + film[:, D:2 * D]      # featurewise_affine

        # ---- cross-attention on cond + FiLM residual ----
        h = _layer_norm(x, g[1:2], be[1:2])
        q = jnp.dot(h, wq_ca[l], preferred_element_type=jnp.float32) + bq_ca[l]
        kv = jnp.dot(cond, wkv_ca[l], preferred_element_type=jnp.float32) + bkv_ca[l]
        ca = _attend(q, kv[:, :D], kv[:, D:])
        ca = jnp.dot(ca, wo_ca[l], preferred_element_type=jnp.float32) + bo_ca[l]
        x = x + (film[:, 2 * D:3 * D] + 1.0) * ca + film[:, 3 * D:4 * D]

        # ---- feed-forward + FiLM residual ----
        h = _layer_norm(x, g[2:3], be[2:3])
        h = jnp.dot(h, w1[l], preferred_element_type=jnp.float32) + b1[l]
        h = jax.nn.gelu(h, approximate=True)   # TODO(synk): PyTorch F.gelu is erf-exact; tanh approx kept for Mosaic lowering safety
        h = jnp.dot(h, w2[l], preferred_element_type=jnp.float32) + b2[l]
        x = x + (film[:, 4 * D:5 * D] + 1.0) * h + film[:, 5 * D:6 * D]

    o_ref[0] = x.astype(o_ref.dtype)


# ------------------------------- JAX glue / wrapper --------------------------
def decoder_layer_stack(x, cond, t, params):
    """Exact DecoderLayerStack.forward semantics, fused into one pallas_call."""
    plist = [params[k] for k in PARAM_ORDER]

    def whole(a):
        # Grid-invariant whole-array block (constant index_map): fetched once,
        # resident in VMEM across all grid steps / layers.
        return pl.BlockSpec(a.shape, lambda b, _n=a.ndim: (0,) * _n)

    in_specs = (
        [pl.BlockSpec((1, S, D), lambda b: (b, 0, 0)),
         pl.BlockSpec((1, SC, D), lambda b: (b, 0, 0)),
         pl.BlockSpec((1, 1, D), lambda b: (b, 0, 0))]
        + [whole(a) for a in plist]
    )
    return pl.pallas_call(
        stack_kernel,
        out_shape=jax.ShapeDtypeStruct((B, S, D), x.dtype),
        grid=(B,),
        in_specs=in_specs,
        out_specs=pl.BlockSpec((1, S, D), lambda b: (b, 0, 0)),
        compiler_params=pltpu.CompilerParams(
            dimension_semantics=("parallel",),   # v7x: one batch element per TensorCore
        ),
    )(x, cond, t, *plist)


# ----------------------------- deterministic params --------------------------
def make_layer_params(key):
    ks = jax.random.split(key, 8)

    def lin(k, fan_in, shape):
        return jax.random.normal(k, shape, jnp.float32) / math.sqrt(fan_in)

    return {
        "ln_g": jnp.ones((3, D), jnp.float32),
        "ln_b": jnp.zeros((3, D), jnp.float32),
        "wqkv": lin(ks[0], D, (D, 3 * D)), "bqkv": jnp.zeros((1, 3 * D), jnp.float32),
        "wo_sa": lin(ks[1], D, (D, D)), "bo_sa": jnp.zeros((1, D), jnp.float32),
        "wq_ca": lin(ks[2], D, (D, D)), "bq_ca": jnp.zeros((1, D), jnp.float32),
        "wkv_ca": lin(ks[3], D, (D, 2 * D)), "bkv_ca": jnp.zeros((1, 2 * D), jnp.float32),
        "wo_ca": lin(ks[4], D, (D, D)), "bo_ca": jnp.zeros((1, D), jnp.float32),
        "w1": lin(ks[5], D, (D, FF)), "b1": jnp.zeros((1, FF), jnp.float32),
        "w2": lin(ks[6], FF, (FF, D)), "b2": jnp.zeros((1, D), jnp.float32),
        # fused DenseFiLM weights: [FiLM(sa) | FiLM(ca) | FiLM(ff)], each (scale|shift)
        "film_w": lin(ks[7], D, (D, 6 * D)),
        "film_b": jnp.zeros((1, 6 * D), jnp.float32),
    }


def make_stacked_params(key, n_layers):
    per_layer = [make_layer_params(k) for k in jax.random.split(key, n_layers)]
    return {k: jnp.stack([p[k] for p in per_layer], axis=0) for k in PARAM_ORDER}


if __name__ == "__main__":
    key = jax.random.PRNGKey(0)
    kx, kc, kt, kp = jax.random.split(key, 4)
    x = jax.random.normal(kx, (B, S, D), jnp.float32)
    cond = jax.random.normal(kc, (B, SC, D), jnp.float32)
    t = jax.random.normal(kt, (B, D), jnp.float32).reshape(B, 1, D)

    params = make_stacked_params(kp, N_LAYERS)

    out = jax.jit(decoder_layer_stack)(x, cond, t, params)
    out = jax.block_until_ready(out)
    assert out.shape == (B, S, D) and bool(jnp.all(jnp.isfinite(out)))
    print("KERNEL_OK")
</pallas_src>

<mosaic_0001>
module attributes {stable_mosaic.version = 11 : i64} {
  func.func @stack_kernel(%arg0: i32, %arg1: memref<1x8x32xf32, #tpu.memory_space<vmem>>, %arg2: memref<1x8x32xf32, #tpu.memory_space<vmem>>, %arg3: memref<1x1x32xf32, #tpu.memory_space<vmem>>, %arg4: memref<2x3x32xf32, #tpu.memory_space<vmem>>, %arg5: memref<2x3x32xf32, #tpu.memory_space<vmem>>, %arg6: memref<2x32x96xf32, #tpu.memory_space<vmem>>, %arg7: memref<2x1x96xf32, #tpu.memory_space<vmem>>, %arg8: memref<2x32x32xf32, #tpu.memory_space<vmem>>, %arg9: memref<2x1x32xf32, #tpu.memory_space<vmem>>, %arg10: memref<2x32x32xf32, #tpu.memory_space<vmem>>, %arg11: memref<2x1x32xf32, #tpu.memory_space<vmem>>, %arg12: memref<2x32x64xf32, #tpu.memory_space<vmem>>, %arg13: memref<2x1x64xf32, #tpu.memory_space<vmem>>, %arg14: memref<2x32x32xf32, #tpu.memory_space<vmem>>, %arg15: memref<2x1x32xf32, #tpu.memory_space<vmem>>, %arg16: memref<2x32x64xf32, #tpu.memory_space<vmem>>, %arg17: memref<2x1x64xf32, #tpu.memory_space<vmem>>, %arg18: memref<2x64x32xf32, #tpu.memory_space<vmem>>, %arg19: memref<2x1x32xf32, #tpu.memory_space<vmem>>, %arg20: memref<2x32x192xf32, #tpu.memory_space<vmem>>, %arg21: memref<2x1x192xf32, #tpu.memory_space<vmem>>, %arg22: memref<1x8x32xf32, #tpu.memory_space<vmem>>) attributes {dimension_semantics = [#tpu.dimension_semantics<parallel>], iteration_bounds = array<i64: 2>, scalar_prefetch = 0 : i64, scratch_operands = 0 : i64, tpu.core_type = #tpu.core_type<tc>, window_params = [{transform_indices = @transform_0, window_bounds = array<i64: 1, 8, 32>}, {transform_indices = @transform_1, window_bounds = array<i64: 1, 8, 32>}, {transform_indices = @transform_2, window_bounds = array<i64: 1, 1, 32>}, {pipeline_mode = #tpu.pipeline_mode<synchronous>, transform_indices = @transform_3, window_bounds = array<i64: 2, 3, 32>}, {pipeline_mode = #tpu.pipeline_mode<synchronous>, transform_indices = @transform_4, window_bounds = array<i64: 2, 3, 32>}, {pipeline_mode = #tpu.pipeline_mode<synchronous>, transform_indices = @transform_5, window_bounds = array<i64: 2, 32, 96>}, {pipeline_mode = #tpu.pipeline_mode<synchronous>, transform_indices = @transform_6, window_bounds = array<i64: 2, 1, 96>}, {pipeline_mode = #tpu.pipeline_mode<synchronous>, transform_indices = @transform_7, window_bounds = array<i64: 2, 32, 32>}, {pipeline_mode = #tpu.pipeline_mode<synchronous>, transform_indices = @transform_8, window_bounds = array<i64: 2, 1, 32>}, {pipeline_mode = #tpu.pipeline_mode<synchronous>, transform_indices = @transform_9, window_bounds = array<i64: 2, 32, 32>}, {pipeline_mode = #tpu.pipeline_mode<synchronous>, transform_indices = @transform_10, window_bounds = array<i64: 2, 1, 32>}, {pipeline_mode = #tpu.pipeline_mode<synchronous>, transform_indices = @transform_11, window_bounds = array<i64: 2, 32, 64>}, {pipeline_mode = #tpu.pipeline_mode<synchronous>, transform_indices = @transform_12, window_bounds = array<i64: 2, 1, 64>}, {pipeline_mode = #tpu.pipeline_mode<synchronous>, transform_indices = @transform_13, window_bounds = array<i64: 2, 32, 32>}, {pipeline_mode = #tpu.pipeline_mode<synchronous>, transform_indices = @transform_14, window_bounds = array<i64: 2, 1, 32>}, {pipeline_mode = #tpu.pipeline_mode<synchronous>, transform_indices = @transform_15, window_bounds = array<i64: 2, 32, 64>}, {pipeline_mode = #tpu.pipeline_mode<synchronous>, transform_indices = @transform_16, window_bounds = array<i64: 2, 1, 64>}, {pipeline_mode = #tpu.pipeline_mode<synchronous>, transform_indices = @transform_17, window_bounds = array<i64: 2, 64, 32>}, {pipeline_mode = #tpu.pipeline_mode<synchronous>, transform_indices = @transform_18, window_bounds = array<i64: 2, 1, 32>}, {pipeline_mode = #tpu.pipeline_mode<synchronous>, transform_indices = @transform_19, window_bounds = array<i64: 2, 32, 192>}, {pipeline_mode = #tpu.pipeline_mode<synchronous>, transform_indices = @transform_20, window_bounds = array<i64: 2, 1, 192>}, {transform_indices = @transform_21, window_bounds = array<i64: 1, 8, 32>}]} {
    %c0 = arith.constant 0 : index
    %c0_0 = arith.constant 0 : index
    %c0_1 = arith.constant 0 : index
    %0 = vector.load %arg1[%c0, %c0_0, %c0_1] : memref<1x8x32xf32, #tpu.memory_space<vmem>>, vector<1x8x32xf32>
    %1 = vector.shape_cast %0 : vector<1x8x32xf32> to vector<8x32xf32>
    %c0_2 = arith.constant 0 : index
    %c0_3 = arith.constant 0 : index
    %c0_4 = arith.constant 0 : index
    %2 = vector.load %arg2[%c0_2, %c0_3, %c0_4] : memref<1x8x32xf32, #tpu.memory_space<vmem>>, vector<1x8x32xf32>
    %3 = vector.shape_cast %2 : vector<1x8x32xf32> to vector<8x32xf32>
    %c0_5 = arith.constant 0 : index
    %c0_6 = arith.constant 0 : index
    %c0_7 = arith.constant 0 : index
    %4 = vector.load %arg3[%c0_5, %c0_6, %c0_7] : memref<1x1x32xf32, #tpu.memory_space<vmem>>, vector<1x1x32xf32>
    %5 = vector.shape_cast %4 : vector<1x1x32xf32> to vector<1x32xf32>
    %cst = arith.constant 0.000000e+00 : f32
    %6 = vector.broadcast %cst : f32 to vector<1x32xf32>
    %7 = arith.maximumf %5, %6 : vector<1x32xf32>
    %8 = math.absf %5 : vector<1x32xf32>
    %cst_8 = arith.constant 0.000000e+00 : f32
    %9 = vector.broadcast %cst_8 : f32 to vector<1x32xf32>
    %10 = arith.subf %9, %8 : vector<1x32xf32>
    %11 = math.exp %10 : vector<1x32xf32>
    %cst_9 = arith.constant 1.000000e+00 : f32
    %12 = vector.broadcast %cst_9 : f32 to vector<1x32xf32>
    %13 = arith.addf %12, %11 : vector<1x32xf32>
    %14 = math.log %13 : vector<1x32xf32>
    %15 = arith.addf %7, %14 : vector<1x32xf32>
    %16 = math.tanh %15 : vector<1x32xf32>
    %17 = arith.mulf %5, %16 : vector<1x32xf32>
    %c0_10 = arith.constant 0 : index
    %c0_11 = arith.constant 0 : index
    %c0_12 = arith.constant 0 : index
    %18 = vector.load %arg4[%c0_10, %c0_11, %c0_12] : memref<2x3x32xf32, #tpu.memory_space<vmem>>, vector<1x3x32xf32>
    %19 = vector.shape_cast %18 : vector<1x3x32xf32> to vector<3x32xf32>
    %c0_13 = arith.constant 0 : index
    %c0_14 = arith.constant 0 : index
    %c0_15 = arith.constant 0 : index
    %20 = vector.load %arg5[%c0_13, %c0_14, %c0_15] : memref<2x3x32xf32, #tpu.memory_space<vmem>>, vector<1x3x32xf32>
    %21 = vector.shape_cast %20 : vector<1x3x32xf32> to vector<3x32xf32>
    %c0_16 = arith.constant 0 : index
    %c0_17 = arith.constant 0 : index
    %c0_18 = arith.constant 0 : index
    %22 = vector.load %arg20[%c0_16, %c0_17, %c0_18] : memref<2x32x192xf32, #tpu.memory_space<vmem>>, vector<1x32x192xf32>
    %23 = vector.shape_cast %22 : vector<1x32x192xf32> to vector<32x192xf32>
    %cst_19 = arith.constant dense<0.000000e+00> : vector<1x192xf32>
    %24 = tpu.matmul %17, %23, %cst_19 {dimension_numbers = #tpu.dot_dimension_numbers<[1], [0], [0], [1], [0, 0, 1, 1], [], []>} : vector<1x32xf32>, vector<32x192xf32>, vector<1x192xf32> -> vector<1x192xf32>
    %c0_20 = arith.constant 0 : index
    %c0_21 = arith.constant 0 : index
    %c0_22 = arith.constant 0 : index
    %25 = vector.load %arg21[%c0_20, %c0_21, %c0_22] : memref<2x1x192xf32, #tpu.memory_space<vmem>>, vector<1x1x192xf32>
    %26 = vector.shape_cast %25 : vector<1x1x192xf32> to vector<1x192xf32>
    %27 = arith.addf %24, %26 : vector<1x192xf32>
    %28 = vector.extract_strided_slice %19 {offsets = [0, 0], sizes = [1, 32], strides = [1, 1]} : vector<3x32xf32> to vector<1x32xf32>
    %29 = vector.extract_strided_slice %21 {offsets = [0, 0], sizes = [1, 32], strides = [1, 1]} : vector<3x32xf32> to vector<1x32xf32>
    %cst_23 = arith.constant dense<0.000000e+00> : vector<8xf32>
    %30 = vector.multi_reduction <add>, %1, %cst_23 [1] : vector<8x32xf32> to vector<8xf32>
    %31 = vector.shape_cast %30 : vector<8xf32> to vector<8x1xf32>
    %cst_24 = arith.constant 3.200000e+01 : f32
    %32 = vector.broadcast %cst_24 : f32 to vector<8x1xf32>
    %33 = arith.divf %31, %32 : vector<8x1xf32>
    %34 = vector.broadcast %33 : vector<8x1xf32> to vector<8x32xf32>
    %35 = arith.subf %1, %34 : vector<8x32xf32>
    %36 = arith.mulf %35, %35 : vector<8x32xf32>
    %cst_25 = arith.constant dense<0.000000e+00> : vector<8xf32>
    %37 = vector.multi_reduction <add>, %36, %cst_25 [1] : vector<8x32xf32> to vector<8xf32>
    %38 = vector.shape_cast %37 : vector<8xf32> to vector<8x1xf32>
    %cst_26 = arith.constant 3.200000e+01 : f32
    %39 = vector.broadcast %cst_26 : f32 to vector<8x1xf32>
    %40 = arith.divf %38, %39 : vector<8x1xf32>
    %cst_27 = arith.constant 9.99999974E-6 : f32
    %41 = vector.broadcast %cst_27 : f32 to vector<8x1xf32>
    %42 = arith.addf %40, %41 : vector<8x1xf32>
    %43 = math.rsqrt %42 : vector<8x1xf32>
    %44 = vector.broadcast %43 : vector<8x1xf32> to vector<8x32xf32>
    %45 = arith.mulf %35, %44 : vector<8x32xf32>
    %46 = vector.broadcast %28 : vector<1x32xf32> to vector<8x32xf32>
    %47 = arith.mulf %45, %46 : vector<8x32xf32>
    %48 = vector.broadcast %29 : vector<1x32xf32> to vector<8x32xf32>
    %49 = arith.addf %47, %48 : vector<8x32xf32>
    %c0_28 = arith.constant 0 : index
    %c0_29 = arith.constant 0 : index
    %c0_30 = arith.constant 0 : index
    %50 = vector.load %arg6[%c0_28, %c0_29, %c0_30] : memref<2x32x96xf32, #tpu.memory_space<vmem>>, vector<1x32x96xf32>
    %51 = vector.shape_cast %50 : vector<1x32x96xf32> to vector<32x96xf32>
    %cst_31 = arith.constant dense<0.000000e+00> : vector<8x96xf32>
    %52 = tpu.matmul %49, %51, %cst_31 {dimension_numbers = #tpu.dot_dimension_numbers<[1], [0], [0], [1], [0, 0, 1, 1], [], []>} : vector<8x32xf32>, vector<32x96xf32>, vector<8x96xf32> -> vector<8x96xf32>
    %c0_32 = arith.constant 0 : index
    %c0_33 = arith.constant 0 : index
    %c0_34 = arith.constant 0 : index
    %53 = vector.load %arg7[%c0_32, %c0_33, %c0_34] : memref<2x1x96xf32, #tpu.memory_space<vmem>>, vector<1x1x96xf32>
    %54 = vector.shape_cast %53 : vector<1x1x96xf32> to vector<1x96xf32>
    %55 = vector.broadcast %54 : vector<1x96xf32> to vector<8x96xf32>
    %56 = arith.addf %52, %55 : vector<8x96xf32>
    %57 = vector.extract_strided_slice %56 {offsets = [0, 0], sizes = [8, 32], strides = [1, 1]} : vector<8x96xf32> to vector<8x32xf32>
    %58 = vector.extract_strided_slice %56 {offsets = [0, 32], sizes = [8, 32], strides = [1, 1]} : vector<8x96xf32> to vector<8x32xf32>
    %59 = vector.extract_strided_slice %56 {offsets = [0, 64], sizes = [8, 32], strides = [1, 1]} : vector<8x96xf32> to vector<8x32xf32>
    %60 = tpu.transpose %57, [1, 0] : vector<8x32xf32> -> vector<32x8xf32>
    %61 = vector.shape_cast %60 : vector<32x8xf32> to vector<4x8x8xf32>
    %62 = tpu.transpose %61, [0, 2, 1] : vector<4x8x8xf32> -> vector<4x8x8xf32>
    %63 = tpu.transpose %58, [1, 0] : vector<8x32xf32> -> vector<32x8xf32>
    %64 = vector.shape_cast %63 : vector<32x8xf32> to vector<4x8x8xf32>
    %65 = tpu.transpose %59, [1, 0] : vector<8x32xf32> -> vector<32x8xf32>
    %66 = vector.shape_cast %65 : vector<32x8xf32> to vector<4x8x8xf32>
    "tpu.trace_start"() <{level = 10 : i32, message = "hqd,hdk->hqk"}> : () -> ()
    %cst_35 = arith.constant dense<0.000000e+00> : vector<4x8x8xf32>
    %67 = tpu.matmul %62, %64, %cst_35 {dimension_numbers = #tpu.dot_dimension_numbers<[2], [1], [1], [2], [0, 0, 0, 1, 1, 2], [0], [0]>} : vector<4x8x8xf32>, vector<4x8x8xf32>, vector<4x8x8xf32> -> vector<4x8x8xf32>
    "tpu.trace_stop"() : () -> ()
    %cst_36 = arith.constant 0.353553385 : f32
    %68 = vector.broadcast %cst_36 : f32 to vector<4x8x8xf32>
    %69 = arith.mulf %67, %68 : vector<4x8x8xf32>
    %cst_37 = arith.constant dense<0xFF800000> : vector<4x8xf32>
    %70 = vector.multi_reduction <maximumf>, %69, %cst_37 [2] : vector<4x8x8xf32> to vector<4x8xf32>
    %71 = vector.shape_cast %70 : vector<4x8xf32> to vector<4x8x1xf32>
    %72 = vector.broadcast %71 : vector<4x8x1xf32> to vector<4x8x8xf32>
    %73 = arith.subf %69, %72 : vector<4x8x8xf32>
    %74 = math.exp %73 : vector<4x8x8xf32>
    %cst_38 = arith.constant dense<0.000000e+00> : vector<4x8xf32>
    %75 = vector.multi_reduction <add>, %74, %cst_38 [2] : vector<4x8x8xf32> to vector<4x8xf32>
    %76 = vector.shape_cast %75 : vector<4x8xf32> to vector<4x8x1xf32>
    %77 = tpu.reciprocal %76 {approx = true} : vector<4x8x1xf32> -> vector<4x8x1xf32>
    %78 = vector.broadcast %77 : vector<4x8x1xf32> to vector<4x8x8xf32>
    %79 = arith.mulf %74, %78 : vector<4x8x8xf32>
    "tpu.trace_start"() <{level = 10 : i32, message = "hdk,hqk->hdq"}> : () -> ()
    %cst_39 = arith.constant dense<0.000000e+00> : vector<4x8x8xf32>
    %80 = tpu.matmul %66, %79, %cst_39 {dimension_numbers = #tpu.dot_dimension_numbers<[2], [2], [1], [1], [0, 0, 0, 1, 1, 1], [0], [0]>} : vector<4x8x8xf32>, vector<4x8x8xf32>, vector<4x8x8xf32> -> vector<4x8x8xf32>
    "tpu.trace_stop"() : () -> ()
    %81 = vector.shape_cast %80 : vector<4x8x8xf32> to vector<32x8xf32>
    %82 = tpu.transpose %81, [1, 0] : vector<32x8xf32> -> vector<8x32xf32>
    %c0_40 = arith.constant 0 : index
    %c0_41 = arith.constant 0 : index
    %c0_42 = arith.constant 0 : index
    %83 = vector.load %arg8[%c0_40, %c0_41, %c0_42] : memref<2x32x32xf32, #tpu.memory_space<vmem>>, vector<1x32x32xf32>
    %84 = vector.shape_cast %83 : vector<1x32x32xf32> to vector<32x32xf32>
    %cst_43 = arith.constant dense<0.000000e+00> : vector<8x32xf32>
    %85 = tpu.matmul %82, %84, %cst_43 {dimension_numbers = #tpu.dot_dimension_numbers<[1], [0], [0], [1], [0, 0, 1, 1], [], []>} : vector<8x32xf32>, vector<32x32xf32>, vector<8x32xf32> -> vector<8x32xf32>
    %c0_44 = arith.constant 0 : index
    %c0_45 = arith.constant 0 : index
    %c0_46 = arith.constant 0 : index
    %86 = vector.load %arg9[%c0_44, %c0_45, %c0_46] : memref<2x1x32xf32, #tpu.memory_space<vmem>>, vector<1x1x32xf32>
    %87 = vector.shape_cast %86 : vector<1x1x32xf32> to vector<1x32xf32>
    %88 = vector.broadcast %87 : vector<1x32xf32> to vector<8x32xf32>
    %89 = arith.addf %85, %88 : vector<8x32xf32>
    %90 = vector.extract_strided_slice %27 {offsets = [0, 0], sizes = [1, 32], strides = [1, 1]} : vector<1x192xf32> to vector<1x32xf32>
    %cst_47 = arith.constant 1.000000e+00 : f32
    %91 = vector.broadcast %cst_47 : f32 to vector<1x32xf32>
    %92 = arith.addf %90, %91 : vector<1x32xf32>
    %93 = vector.broadcast %92 : vector<1x32xf32> to vector<8x32xf32>
    %94 = arith.mulf %93, %89 : vector<8x32xf32>
    %95 = arith.addf %1, %94 : vector<8x32xf32>
    %96 = vector.extract_strided_slice %27 {offsets = [0, 32], sizes = [1, 32], strides = [1, 1]} : vector<1x192xf32> to vector<1x32xf32>
    %97 = vector.broadcast %96 : vector<1x32xf32> to vector<8x32xf32>
    %98 = arith.addf %95, %97 : vector<8x32xf32>
    %99 = vector.extract_strided_slice %19 {offsets = [1, 0], sizes = [1, 32], strides = [1, 1]} : vector<3x32xf32> to vector<1x32xf32>
    %100 = vector.extract_strided_slice %21 {offsets = [1, 0], sizes = [1, 32], strides = [1, 1]} : vector<3x32xf32> to vector<1x32xf32>
    %cst_48 = arith.constant dense<0.000000e+00> : vector<8xf32>
    %101 = vector.multi_reduction <add>, %98, %cst_48 [1] : vector<8x32xf32> to vector<8xf32>
    %102 = vector.shape_cast %101 : vector<8xf32> to vector<8x1xf32>
    %cst_49 = arith.constant 3.200000e+01 : f32
    %103 = vector.broadcast %cst_49 : f32 to vector<8x1xf32>
    %104 = arith.divf %102, %103 : vector<8x1xf32>
    %105 = vector.broadcast %104 : vector<8x1xf32> to vector<8x32xf32>
    %106 = arith.subf %98, %105 : vector<8x32xf32>
    %107 = arith.mulf %106, %106 : vector<8x32xf32>
    %cst_50 = arith.constant dense<0.000000e+00> : vector<8xf32>
    %108 = vector.multi_reduction <add>, %107, %cst_50 [1] : vector<8x32xf32> to vector<8xf32>
    %109 = vector.shape_cast %108 : vector<8xf32> to vector<8x1xf32>
    %cst_51 = arith.constant 3.200000e+01 : f32
    %110 = vector.broadcast %cst_51 : f32 to vector<8x1xf32>
    %111 = arith.divf %109, %110 : vector<8x1xf32>
    %cst_52 = arith.constant 9.99999974E-6 : f32
    %112 = vector.broadcast %cst_52 : f32 to vector<8x1xf32>
    %113 = arith.addf %111, %112 : vector<8x1xf32>
    %114 = math.rsqrt %113 : vector<8x1xf32>
    %115 = vector.broadcast %114 : vector<8x1xf32> to vector<8x32xf32>
    %116 = arith.mulf %106, %115 : vector<8x32xf32>
    %117 = vector.broadcast %99 : vector<1x32xf32> to vector<8x32xf32>
    %118 = arith.mulf %116, %117 : vector<8x32xf32>
    %119 = vector.broadcast %100 : vector<1x32xf32> to vector<8x32xf32>
    %120 = arith.addf %118, %119 : vector<8x32xf32>
    %c0_53 = arith.constant 0 : index
    %c0_54 = arith.constant 0 : index
    %c0_55 = arith.constant 0 : index
    %121 = vector.load %arg10[%c0_53, %c0_54, %c0_55] : memref<2x32x32xf32, #tpu.memory_space<vmem>>, vector<1x32x32xf32>
    %122 = vector.shape_cast %121 : vector<1x32x32xf32> to vector<32x32xf32>
    %cst_56 = arith.constant dense<0.000000e+00> : vector<8x32xf32>
    %123 = tpu.matmul %120, %122, %cst_56 {dimension_numbers = #tpu.dot_dimension_numbers<[1], [0], [0], [1], [0, 0, 1, 1], [], []>} : vector<8x32xf32>, vector<32x32xf32>, vector<8x32xf32> -> vector<8x32xf32>
    %c0_57 = arith.constant 0 : index
    %c0_58 = arith.constant 0 : index
    %c0_59 = arith.constant 0 : index
    %124 = vector.load %arg11[%c0_57, %c0_58, %c0_59] : memref<2x1x32xf32, #tpu.memory_space<vmem>>, vector<1x1x32xf32>
    %125 = vector.shape_cast %124 : vector<1x1x32xf32> to vector<1x32xf32>
    %126 = vector.broadcast %125 : vector<1x32xf32> to vector<8x32xf32>
    %127 = arith.addf %123, %126 : vector<8x32xf32>
    %c0_60 = arith.constant 0 : index
    %c0_61 = arith.constant 0 : index
    %c0_62 = arith.constant 0 : index
    %128 = vector.load %arg12[%c0_60, %c0_61, %c0_62] : memref<2x32x64xf32, #tpu.memory_space<vmem>>, vector<1x32x64xf32>
    %129 = vector.shape_cast %128 : vector<1x32x64xf32> to vector<32x64xf32>
    %cst_63 = arith.constant dense<0.000000e+00> : vector<8x64xf32>
    %130 = tpu.matmul %3, %129, %cst_63 {dimension_numbers = #tpu.dot_dimension_numbers<[1], [0], [0], [1], [0, 0, 1, 1], [], []>} : vector<8x32xf32>, vector<32x64xf32>, vector<8x64xf32> -> vector<8x64xf32>
    %c0_64 = arith.constant 0 : index
    %c0_65 = arith.constant 0 : index
    %c0_66 = arith.constant 0 : index
    %131 = vector.load %arg13[%c0_64, %c0_65, %c0_66] : memref<2x1x64xf32, #tpu.memory_space<vmem>>, vector<1x1x64xf32>
    %132 = vector.shape_cast %131 : vector<1x1x64xf32> to vector<1x64xf32>
    %133 = vector.broadcast %132 : vector<1x64xf32> to vector<8x64xf32>
    %134 = arith.addf %130, %133 : vector<8x64xf32>
    %135 = vector.extract_strided_slice %134 {offsets = [0, 0], sizes = [8, 32], strides = [1, 1]} : vector<8x64xf32> to vector<8x32xf32>
    %136 = vector.extract_strided_slice %134 {offsets = [0, 32], sizes = [8, 32], strides = [1, 1]} : vector<8x64xf32> to vector<8x32xf32>
    %137 = tpu.transpose %127, [1, 0] : vector<8x32xf32> -> vector<32x8xf32>
    %138 = vector.shape_cast %137 : vector<32x8xf32> to vector<4x8x8xf32>
    %139 = tpu.transpose %138, [0, 2, 1] : vector<4x8x8xf32> -> vector<4x8x8xf32>
    %140 = tpu.transpose %135, [1, 0] : vector<8x32xf32> -> vector<32x8xf32>
    %141 = vector.shape_cast %140 : vector<32x8xf32> to vector<4x8x8xf32>
    %142 = tpu.transpose %136, [1, 0] : vector<8x32xf32> -> vector<32x8xf32>
    %143 = vector.shape_cast %142 : vector<32x8xf32> to vector<4x8x8xf32>
    "tpu.trace_start"() <{level = 10 : i32, message = "hqd,hdk->hqk"}> : () -> ()
    %cst_67 = arith.constant dense<0.000000e+00> : vector<4x8x8xf32>
    %144 = tpu.matmul %139, %141, %cst_67 {dimension_numbers = #tpu.dot_dimension_numbers<[2], [1], [1], [2], [0, 0, 0, 1, 1, 2], [0], [0]>} : vector<4x8x8xf32>, vector<4x8x8xf32>, vector<4x8x8xf32> -> vector<4x8x8xf32>
    "tpu.trace_stop"() : () -> ()
    %cst_68 = arith.constant 0.353553385 : f32
    %145 = vector.broadcast %cst_68 : f32 to vector<4x8x8xf32>
    %146 = arith.mulf %144, %145 : vector<4x8x8xf32>
    %cst_69 = arith.constant dense<0xFF800000> : vector<4x8xf32>
    %147 = vector.multi_reduction <maximumf>, %146, %cst_69 [2] : vector<4x8x8xf32> to vector<4x8xf32>
    %148 = vector.shape_cast %147 : vector<4x8xf32> to vector<4x8x1xf32>
    %149 = vector.broadcast %148 : vector<4x8x1xf32> to vector<4x8x8xf32>
    %150 = arith.subf %146, %149 : vector<4x8x8xf32>
    %151 = math.exp %150 : vector<4x8x8xf32>
    %cst_70 = arith.constant dense<0.000000e+00> : vector<4x8xf32>
    %152 = vector.multi_reduction <add>, %151, %cst_70 [2] : vector<4x8x8xf32> to vector<4x8xf32>
    %153 = vector.shape_cast %152 : vector<4x8xf32> to vector<4x8x1xf32>
    %154 = tpu.reciprocal %153 {approx = true} : vector<4x8x1xf32> -> vector<4x8x1xf32>
    %155 = vector.broadcast %154 : vector<4x8x1xf32> to vector<4x8x8xf32>
    %156 = arith.mulf %151, %155 : vector<4x8x8xf32>
    "tpu.trace_start"() <{level = 10 : i32, message = "hdk,hqk->hdq"}> : () -> ()
    %cst_71 = arith.constant dense<0.000000e+00> : vector<4x8x8xf32>
    %157 = tpu.matmul %143, %156, %cst_71 {dimension_numbers = #tpu.dot_dimension_numbers<[2], [2], [1], [1], [0, 0, 0, 1, 1, 1], [0], [0]>} : vector<4x8x8xf32>, vector<4x8x8xf32>, vector<4x8x8xf32> -> vector<4x8x8xf32>
    "tpu.trace_stop"() : () -> ()
    %158 = vector.shape_cast %157 : vector<4x8x8xf32> to vector<32x8xf32>
    %159 = tpu.transpose %158, [1, 0] : vector<32x8xf32> -> vector<8x32xf32>
    %c0_72 = arith.constant 0 : index
    %c0_73 = arith.constant 0 : index
    %c0_74 = arith.constant 0 : index
    %160 = vector.load %arg14[%c0_72, %c0_73, %c0_74] : memref<2x32x32xf32, #tpu.memory_space<vmem>>, vector<1x32x32xf32>
    %161 = vector.shape_cast %160 : vector<1x32x32xf32> to vector<32x32xf32>
    %cst_75 = arith.constant dense<0.000000e+00> : vector<8x32xf32>
    %162 = tpu.matmul %159, %161, %cst_75 {dimension_numbers = #tpu.dot_dimension_numbers<[1], [0], [0], [1], [0, 0, 1, 1], [], []>} : vector<8x32xf32>, vector<32x32xf32>, vector<8x32xf32> -> vector<8x32xf32>
    %c0_76 = arith.constant 0 : index
    %c0_77 = arith.constant 0 : index
    %c0_78 = arith.constant 0 : index
    %163 = vector.load %arg15[%c0_76, %c0_77, %c0_78] : memref<2x1x32xf32, #tpu.memory_space<vmem>>, vector<1x1x32xf32>
    %164 = vector.shape_cast %163 : vector<1x1x32xf32> to vector<1x32xf32>
    %165 = vector.broadcast %164 : vector<1x32xf32> to vector<8x32xf32>
    %166 = arith.addf %162, %165 : vector<8x32xf32>
    %167 = vector.extract_strided_slice %27 {offsets = [0, 64], sizes = [1, 32], strides = [1, 1]} : vector<1x192xf32> to vector<1x32xf32>
    %cst_79 = arith.constant 1.000000e+00 : f32
    %168 = vector.broadcast %cst_79 : f32 to vector<1x32xf32>
    %169 = arith.addf %167, %168 : vector<1x32xf32>
    %170 = vector.broadcast %169 : vector<1x32xf32> to vector<8x32xf32>
    %171 = arith.mulf %170, %166 : vector<8x32xf32>
    %172 = arith.addf %98, %171 : vector<8x32xf32>
    %173 = vector.extract_strided_slice %27 {offsets = [0, 96], sizes = [1, 32], strides = [1, 1]} : vector<1x192xf32> to vector<1x32xf32>
    %174 = vector.broadcast %173 : vector<1x32xf32> to vector<8x32xf32>
    %175 = arith.addf %172, %174 : vector<8x32xf32>
    %176 = vector.extract_strided_slice %19 {offsets = [2, 0], sizes = [1, 32], strides = [1, 1]} : vector<3x32xf32> to vector<1x32xf32>
    %177 = vector.extract_strided_slice %21 {offsets = [2, 0], sizes = [1, 32], strides = [1, 1]} : vector<3x32xf32> to vector<1x32xf32>
    %cst_80 = arith.constant dense<0.000000e+00> : vector<8xf32>
    %178 = vector.multi_reduction <add>, %175, %cst_80 [1] : vector<8x32xf32> to vector<8xf32>
    %179 = vector.shape_cast %178 : vector<8xf32> to vector<8x1xf32>
    %cst_81 = arith.constant 3.200000e+01 : f32
    %180 = vector.broadcast %cst_81 : f32 to vector<8x1xf32>
    %181 = arith.divf %179, %180 : vector<8x1xf32>
    %182 = vector.broadcast %181 : vector<8x1xf32> to vector<8x32xf32>
    %183 = arith.subf %175, %182 : vector<8x32xf32>
    %184 = arith.mulf %183, %183 : vector<8x32xf32>
    %cst_82 = arith.constant dense<0.000000e+00> : vector<8xf32>
    %185 = vector.multi_reduction <add>, %184, %cst_82 [1] : vector<8x32xf32> to vector<8xf32>
    %186 = vector.shape_cast %185 : vector<8xf32> to vector<8x1xf32>
    %cst_83 = arith.constant 3.200000e+01 : f32
    %187 = vector.broadcast %cst_83 : f32 to vector<8x1xf32>
    %188 = arith.divf %186, %187 : vector<8x1xf32>
    %cst_84 = arith.constant 9.99999974E-6 : f32
    %189 = vector.broadcast %cst_84 : f32 to vector<8x1xf32>
    %190 = arith.addf %188, %189 : vector<8x1xf32>
    %191 = math.rsqrt %190 : vector<8x1xf32>
    %192 = vector.broadcast %191 : vector<8x1xf32> to vector<8x32xf32>
    %193 = arith.mulf %183, %192 : vector<8x32xf32>
    %194 = vector.broadcast %176 : vector<1x32xf32> to vector<8x32xf32>
    %195 = arith.mulf %193, %194 : vector<8x32xf32>
    %196 = vector.broadcast %177 : vector<1x32xf32> to vector<8x32xf32>
    %197 = arith.addf %195, %196 : vector<8x32xf32>
    %c0_85 = arith.constant 0 : index
    %c0_86 = arith.constant 0 : index
    %c0_87 = arith.constant 0 : index
    %198 = vector.load %arg16[%c0_85, %c0_86, %c0_87] : memref<2x32x64xf32, #tpu.memory_space<vmem>>, vector<1x32x64xf32>
    %199 = vector.shape_cast %198 : vector<1x32x64xf32> to vector<32x64xf32>
    %cst_88 = arith.constant dense<0.000000e+00> : vector<8x64xf32>
    %200 = tpu.matmul %197, %199, %cst_88 {dimension_numbers = #tpu.dot_dimension_numbers<[1], [0], [0], [1], [0, 0, 1, 1], [], []>} : vector<8x32xf32>, vector<32x64xf32>, vector<8x64xf32> -> vector<8x64xf32>
    %c0_89 = arith.constant 0 : index
    %c0_90 = arith.constant 0 : index
    %c0_91 = arith.constant 0 : index
    %201 = vector.load %arg17[%c0_89, %c0_90, %c0_91] : memref<2x1x64xf32, #tpu.memory_space<vmem>>, vector<1x1x64xf32>
    %202 = vector.shape_cast %201 : vector<1x1x64xf32> to vector<1x64xf32>
    %203 = vector.broadcast %202 : vector<1x64xf32> to vector<8x64xf32>
    %204 = arith.addf %200, %203 : vector<8x64xf32>
    %205 = arith.mulf %204, %204 : vector<8x64xf32>
    %206 = arith.mulf %204, %205 : vector<8x64xf32>
    %cst_92 = arith.constant 4.471500e-02 : f32
    %207 = vector.broadcast %cst_92 : f32 to vector<8x64xf32>
    %208 = arith.mulf %207, %206 : vector<8x64xf32>
    %209 = arith.addf %204, %208 : vector<8x64xf32>
    %cst_93 = arith.constant 0.797884583 : f32
    %210 = vector.broadcast %cst_93 : f32 to vector<8x64xf32>
    %211 = arith.mulf %210, %209 : vector<8x64xf32>
    %212 = math.tanh %211 : vector<8x64xf32>
    %cst_94 = arith.constant 1.000000e+00 : f32
    %213 = vector.broadcast %cst_94 : f32 to vector<8x64xf32>
    %214 = arith.addf %213, %212 : vector<8x64xf32>
    %cst_95 = arith.constant 5.000000e-01 : f32
    %215 = vector.broadcast %cst_95 : f32 to vector<8x64xf32>
    %216 = arith.mulf %215, %214 : vector<8x64xf32>
    %217 = arith.mulf %204, %216 : vector<8x64xf32>
    %c0_96 = arith.constant 0 : index
    %c0_97 = arith.constant 0 : index
    %c0_98 = arith.constant 0 : index
    %218 = vector.load %arg18[%c0_96, %c0_97, %c0_98] : memref<2x64x32xf32, #tpu.memory_space<vmem>>, vector<1x64x32xf32>
    %219 = vector.shape_cast %218 : vector<1x64x32xf32> to vector<64x32xf32>
    %cst_99 = arith.constant dense<0.000000e+00> : vector<8x32xf32>
    %220 = tpu.matmul %217, %219, %cst_99 {dimension_numbers = #tpu.dot_dimension_numbers<[1], [0], [0], [1], [0, 0, 1, 1], [], []>} : vector<8x64xf32>, vector<64x32xf32>, vector<8x32xf32> -> vector<8x32xf32>
    %c0_100 = arith.constant 0 : index
    %c0_101 = arith.constant 0 : index
    %c0_102 = arith.constant 0 : index
    %221 = vector.load %arg19[%c0_100, %c0_101, %c0_102] : memref<2x1x32xf32, #tpu.memory_space<vmem>>, vector<1x1x32xf32>
    %222 = vector.shape_cast %221 : vector<1x1x32xf32> to vector<1x32xf32>
    %223 = vector.broadcast %222 : vector<1x32xf32> to vector<8x32xf32>
    %224 = arith.addf %220, %223 : vector<8x32xf32>
    %225 = vector.extract_strided_slice %27 {offsets = [0, 128], sizes = [1, 32], strides = [1, 1]} : vector<1x192xf32> to vector<1x32xf32>
    %cst_103 = arith.constant 1.000000e+00 : f32
    %226 = vector.broadcast %cst_103 : f32 to vector<1x32xf32>
    %227 = arith.addf %225, %226 : vector<1x32xf32>
    %228 = vector.broadcast %227 : vector<1x32xf32> to vector<8x32xf32>
    %229 = arith.mulf %228, %224 : vector<8x32xf32>
    %230 = arith.addf %175, %229 : vector<8x32xf32>
    %231 = vector.extract_strided_slice %27 {offsets = [0, 160], sizes = [1, 32], strides = [1, 1]} : vector<1x192xf32> to vector<1x32xf32>
    %232 = vector.broadcast %231 : vector<1x32xf32> to vector<8x32xf32>
    %233 = arith.addf %230, %232 : vector<8x32xf32>
    %c1 = arith.constant 1 : index
    %c0_104 = arith.constant 0 : index
    %c0_105 = arith.constant 0 : index
    %234 = vector.load %arg4[%c1, %c0_104, %c0_105] : memref<2x3x32xf32, #tpu.memory_space<vmem>>, vector<1x3x32xf32>
    %235 = vector.shape_cast %234 : vector<1x3x32xf32> to vector<3x32xf32>
    %c1_106 = arith.constant 1 : index
    %c0_107 = arith.constant 0 : index
    %c0_108 = arith.constant 0 : index
    %236 = vector.load %arg5[%c1_106, %c0_107, %c0_108] : memref<2x3x32xf32, #tpu.memory_space<vmem>>, vector<1x3x32xf32>
    %237 = vector.shape_cast %236 : vector<1x3x32xf32> to vector<3x32xf32>
    %c1_109 = arith.constant 1 : index
    %c0_110 = arith.constant 0 : index
    %c0_111 = arith.constant 0 : index
    %238 = vector.load %arg20[%c1_109, %c0_110, %c0_111] : memref<2x32x192xf32, #tpu.memory_space<vmem>>, vector<1x32x192xf32>
    %239 = vector.shape_cast %238 : vector<1x32x192xf32> to vector<32x192xf32>
    %cst_112 = arith.constant dense<0.000000e+00> : vector<1x192xf32>
    %240 = tpu.matmul %17, %239, %cst_112 {dimension_numbers = #tpu.dot_dimension_numbers<[1], [0], [0], [1], [0, 0, 1, 1], [], []>} : vector<1x32xf32>, vector<32x192xf32>, vector<1x192xf32> -> vector<1x192xf32>
    %c1_113 = arith.constant 1 : index
    %c0_114 = arith.constant 0 : index
    %c0_115 = arith.constant 0 : index
    %241 = vector.load %arg21[%c1_113, %c0_114, %c0_115] : memref<2x1x192xf32, #tpu.memory_space<vmem>>, vector<1x1x192xf32>
    %242 = vector.shape_cast %241 : vector<1x1x192xf32> to vector<1x192xf32>
    %243 = arith.addf %240, %242 : vector<1x192xf32>
    %244 = vector.extract_strided_slice %235 {offsets = [0, 0], sizes = [1, 32], strides = [1, 1]} : vector<3x32xf32> to vector<1x32xf32>
    %245 = vector.extract_strided_slice %237 {offsets = [0, 0], sizes = [1, 32], strides = [1, 1]} : vector<3x32xf32> to vector<1x32xf32>
    %cst_116 = arith.constant dense<0.000000e+00> : vector<8xf32>
    %246 = vector.multi_reduction <add>, %233, %cst_116 [1] : vector<8x32xf32> to vector<8xf32>
    %247 = vector.shape_cast %246 : vector<8xf32> to vector<8x1xf32>
    %cst_117 = arith.constant 3.200000e+01 : f32
    %248 = vector.broadcast %cst_117 : f32 to vector<8x1xf32>
    %249 = arith.divf %247, %248 : vector<8x1xf32>
    %250 = vector.broadcast %249 : vector<8x1xf32> to vector<8x32xf32>
    %251 = arith.subf %233, %250 : vector<8x32xf32>
    %252 = arith.mulf %251, %251 : vector<8x32xf32>
    %cst_118 = arith.constant dense<0.000000e+00> : vector<8xf32>
    %253 = vector.multi_reduction <add>, %252, %cst_118 [1] : vector<8x32xf32> to vector<8xf32>
    %254 = vector.shape_cast %253 : vector<8xf32> to vector<8x1xf32>
    %cst_119 = arith.constant 3.200000e+01 : f32
    %255 = vector.broadcast %cst_119 : f32 to vector<8x1xf32>
    %256 = arith.divf %254, %255 : vector<8x1xf32>
    %cst_120 = arith.constant 9.99999974E-6 : f32
    %257 = vector.broadcast %cst_120 : f32 to vector<8x1xf32>
    %258 = arith.addf %256, %257 : vector<8x1xf32>
    %259 = math.rsqrt %258 : vector<8x1xf32>
    %260 = vector.broadcast %259 : vector<8x1xf32> to vector<8x32xf32>
    %261 = arith.mulf %251, %260 : vector<8x32xf32>
    %262 = vector.broadcast %244 : vector<1x32xf32> to vector<8x32xf32>
    %263 = arith.mulf %261, %262 : vector<8x32xf32>
    %264 = vector.broadcast %245 : vector<1x32xf32> to vector<8x32xf32>
    %265 = arith.addf %263, %264 : vector<8x32xf32>
    %c1_121 = arith.constant 1 : index
    %c0_122 = arith.constant 0 : index
    %c0_123 = arith.constant 0 : index
    %266 = vector.load %arg6[%c1_121, %c0_122, %c0_123] : memref<2x32x96xf32, #tpu.memory_space<vmem>>, vector<1x32x96xf32>
    %267 = vector.shape_cast %266 : vector<1x32x96xf32> to vector<32x96xf32>
    %cst_124 = arith.constant dense<0.000000e+00> : vector<8x96xf32>
    %268 = tpu.matmul %265, %267, %cst_124 {dimension_numbers = #tpu.dot_dimension_numbers<[1], [0], [0], [1], [0, 0, 1, 1], [], []>} : vector<8x32xf32>, vector<32x96xf32>, vector<8x96xf32> -> vector<8x96xf32>
    %c1_125 = arith.constant 1 : index
    %c0_126 = arith.constant 0 : index
    %c0_127 = arith.constant 0 : index
    %269 = vector.load %arg7[%c1_125, %c0_126, %c0_127] : memref<2x1x96xf32, #tpu.memory_space<vmem>>, vector<1x1x96xf32>
    %270 = vector.shape_cast %269 : vector<1x1x96xf32> to vector<1x96xf32>
    %271 = vector.broadcast %270 : vector<1x96xf32> to vector<8x96xf32>
    %272 = arith.addf %268, %271 : vector<8x96xf32>
    %273 = vector.extract_strided_slice %272 {offsets = [0, 0], sizes = [8, 32], strides = [1, 1]} : vector<8x96xf32> to vector<8x32xf32>
    %274 = vector.extract_strided_slice %272 {offsets = [0, 32], sizes = [8, 32], strides = [1, 1]} : vector<8x96xf32> to vector<8x32xf32>
    %275 = vector.extract_strided_slice %272 {offsets = [0, 64], sizes = [8, 32], strides = [1, 1]} : vector<8x96xf32> to vector<8x32xf32>
    %276 = tpu.transpose %273, [1, 0] : vector<8x32xf32> -> vector<32x8xf32>
    %277 = vector.shape_cast %276 : vector<32x8xf32> to vector<4x8x8xf32>
    %278 = tpu.transpose %277, [0, 2, 1] : vector<4x8x8xf32> -> vector<4x8x8xf32>
    %279 = tpu.transpose %274, [1, 0] : vector<8x32xf32> -> vector<32x8xf32>
    %280 = vector.shape_cast %279 : vector<32x8xf32> to vector<4x8x8xf32>
    %281 = tpu.transpose %275, [1, 0] : vector<8x32xf32> -> vector<32x8xf32>
    %282 = vector.shape_cast %281 : vector<32x8xf32> to vector<4x8x8xf32>
    "tpu.trace_start"() <{level = 10 : i32, message = "hqd,hdk->hqk"}> : () -> ()
    %cst_128 = arith.constant dense<0.000000e+00> : vector<4x8x8xf32>
    %283 = tpu.matmul %278, %280, %cst_128 {dimension_numbers = #tpu.dot_dimension_numbers<[2], [1], [1], [2], [0, 0, 0, 1, 1, 2], [0], [0]>} : vector<4x8x8xf32>, vector<4x8x8xf32>, vector<4x8x8xf32> -> vector<4x8x8xf32>
    "tpu.trace_stop"() : () -> ()
    %cst_129 = arith.constant 0.353553385 : f32
    %284 = vector.broadcast %cst_129 : f32 to vector<4x8x8xf32>
    %285 = arith.mulf %283, %284 : vector<4x8x8xf32>
    %cst_130 = arith.constant dense<0xFF800000> : vector<4x8xf32>
    %286 = vector.multi_reduction <maximumf>, %285, %cst_130 [2] : vector<4x8x8xf32> to vector<4x8xf32>
    %287 = vector.shape_cast %286 : vector<4x8xf32> to vector<4x8x1xf32>
    %288 = vector.broadcast %287 : vector<4x8x1xf32> to vector<4x8x8xf32>
    %289 = arith.subf %285, %288 : vector<4x8x8xf32>
    %290 = math.exp %289 : vector<4x8x8xf32>
    %cst_131 = arith.constant dense<0.000000e+00> : vector<4x8xf32>
    %291 = vector.multi_reduction <add>, %290, %cst_131 [2] : vector<4x8x8xf32> to vector<4x8xf32>
    %292 = vector.shape_cast %291 : vector<4x8xf32> to vector<4x8x1xf32>
    %293 = tpu.reciprocal %292 {approx = true} : vector<4x8x1xf32> -> vector<4x8x1xf32>
    %294 = vector.broadcast %293 : vector<4x8x1xf32> to vector<4x8x8xf32>
    %295 = arith.mulf %290, %294 : vector<4x8x8xf32>
    "tpu.trace_start"() <{level = 10 : i32, message = "hdk,hqk->hdq"}> : () -> ()
    %cst_132 = arith.constant dense<0.000000e+00> : vector<4x8x8xf32>
    %296 = tpu.matmul %282, %295, %cst_132 {dimension_numbers = #tpu.dot_dimension_numbers<[2], [2], [1], [1], [0, 0, 0, 1, 1, 1], [0], [0]>} : vector<4x8x8xf32>, vector<4x8x8xf32>, vector<4x8x8xf32> -> vector<4x8x8xf32>
    "tpu.trace_stop"() : () -> ()
    %297 = vector.shape_cast %296 : vector<4x8x8xf32> to vector<32x8xf32>
    %298 = tpu.transpose %297, [1, 0] : vector<32x8xf32> -> vector<8x32xf32>
    %c1_133 = arith.constant 1 : index
    %c0_134 = arith.constant 0 : index
    %c0_135 = arith.constant 0 : index
    %299 = vector.load %arg8[%c1_133, %c0_134, %c0_135] : memref<2x32x32xf32, #tpu.memory_space<vmem>>, vector<1x32x32xf32>
    %300 = vector.shape_cast %299 : vector<1x32x32xf32> to vector<32x32xf32>
    %cst_136 = arith.constant dense<0.000000e+00> : vector<8x32xf32>
    %301 = tpu.matmul %298, %300, %cst_136 {dimension_numbers = #tpu.dot_dimension_numbers<[1], [0], [0], [1], [0, 0, 1, 1], [], []>} : vector<8x32xf32>, vector<32x32xf32>, vector<8x32xf32> -> vector<8x32xf32>
    %c1_137 = arith.constant 1 : index
    %c0_138 = arith.constant 0 : index
    %c0_139 = arith.constant 0 : index
    %302 = vector.load %arg9[%c1_137, %c0_138, %c0_139] : memref<2x1x32xf32, #tpu.memory_space<vmem>>, vector<1x1x32xf32>
    %303 = vector.shape_cast %302 : vector<1x1x32xf32> to vector<1x32xf32>
    %304 = vector.broadcast %303 : vector<1x32xf32> to vector<8x32xf32>
    %305 = arith.addf %301, %304 : vector<8x32xf32>
    %306 = vector.extract_strided_slice %243 {offsets = [0, 0], sizes = [1, 32], strides = [1, 1]} : vector<1x192xf32> to vector<1x32xf32>
    %cst_140 = arith.constant 1.000000e+00 : f32
    %307 = vector.broadcast %cst_140 : f32 to vector<1x32xf32>
    %308 = arith.addf %306, %307 : vector<1x32xf32>
    %309 = vector.broadcast %308 : vector<1x32xf32> to vector<8x32xf32>
    %310 = arith.mulf %309, %305 : vector<8x32xf32>
    %311 = arith.addf %233, %310 : vector<8x32xf32>
    %312 = vector.extract_strided_slice %243 {offsets = [0, 32], sizes = [1, 32], strides = [1, 1]} : vector<1x192xf32> to vector<1x32xf32>
    %313 = vector.broadcast %312 : vector<1x32xf32> to vector<8x32xf32>
    %314 = arith.addf %311, %313 : vector<8x32xf32>
    %315 = vector.extract_strided_slice %235 {offsets = [1, 0], sizes = [1, 32], strides = [1, 1]} : vector<3x32xf32> to vector<1x32xf32>
    %316 = vector.extract_strided_slice %237 {offsets = [1, 0], sizes = [1, 32], strides = [1, 1]} : vector<3x32xf32> to vector<1x32xf32>
    %cst_141 = arith.constant dense<0.000000e+00> : vector<8xf32>
    %317 = vector.multi_reduction <add>, %314, %cst_141 [1] : vector<8x32xf32> to vector<8xf32>
    %318 = vector.shape_cast %317 : vector<8xf32> to vector<8x1xf32>
    %cst_142 = arith.constant 3.200000e+01 : f32
    %319 = vector.broadcast %cst_142 : f32 to vector<8x1xf32>
    %320 = arith.divf %318, %319 : vector<8x1xf32>
    %321 = vector.broadcast %320 : vector<8x1xf32> to vector<8x32xf32>
    %322 = arith.subf %314, %321 : vector<8x32xf32>
    %323 = arith.mulf %322, %322 : vector<8x32xf32>
    %cst_143 = arith.constant dense<0.000000e+00> : vector<8xf32>
    %324 = vector.multi_reduction <add>, %323, %cst_143 [1] : vector<8x32xf32> to vector<8xf32>
    %325 = vector.shape_cast %324 : vector<8xf32> to vector<8x1xf32>
    %cst_144 = arith.constant 3.200000e+01 : f32
    %326 = vector.broadcast %cst_144 : f32 to vector<8x1xf32>
    %327 = arith.divf %325, %326 : vector<8x1xf32>
    %cst_145 = arith.constant 9.99999974E-6 : f32
    %328 = vector.broadcast %cst_145 : f32 to vector<8x1xf32>
    %329 = arith.addf %327, %328 : vector<8x1xf32>
    %330 = math.rsqrt %329 : vector<8x1xf32>
    %331 = vector.broadcast %330 : vector<8x1xf32> to vector<8x32xf32>
    %332 = arith.mulf %322, %331 : vector<8x32xf32>
    %333 = vector.broadcast %315 : vector<1x32xf32> to vector<8x32xf32>
    %334 = arith.mulf %332, %333 : vector<8x32xf32>
    %335 = vector.broadcast %316 : vector<1x32xf32> to vector<8x32xf32>
    %336 = arith.addf %334, %335 : vector<8x32xf32>
    %c1_146 = arith.constant 1 : index
    %c0_147 = arith.constant 0 : index
    %c0_148 = arith.constant 0 : index
    %337 = vector.load %arg10[%c1_146, %c0_147, %c0_148] : memref<2x32x32xf32, #tpu.memory_space<vmem>>, vector<1x32x32xf32>
    %338 = vector.shape_cast %337 : vector<1x32x32xf32> to vector<32x32xf32>
    %cst_149 = arith.constant dense<0.000000e+00> : vector<8x32xf32>
    %339 = tpu.matmul %336, %338, %cst_149 {dimension_numbers = #tpu.dot_dimension_numbers<[1], [0], [0], [1], [0, 0, 1, 1], [], []>} : vector<8x32xf32>, vector<32x32xf32>, vector<8x32xf32> -> vector<8x32xf32>
    %c1_150 = arith.constant 1 : index
    %c0_151 = arith.constant 0 : index
    %c0_152 = arith.constant 0 : index
    %340 = vector.load %arg11[%c1_150, %c0_151, %c0_152] : memref<2x1x32xf32, #tpu.memory_space<vmem>>, vector<1x1x32xf32>
    %341 = vector.shape_cast %340 : vector<1x1x32xf32> to vector<1x32xf32>
    %342 = vector.broadcast %341 : vector<1x32xf32> to vector<8x32xf32>
    %343 = arith.addf %339, %342 : vector<8x32xf32>
    %c1_153 = arith.constant 1 : index
    %c0_154 = arith.constant 0 : index
    %c0_155 = arith.constant 0 : index
    %344 = vector.load %arg12[%c1_153, %c0_154, %c0_155] : memref<2x32x64xf32, #tpu.memory_space<vmem>>, vector<1x32x64xf32>
    %345 = vector.shape_cast %344 : vector<1x32x64xf32> to vector<32x64xf32>
    %cst_156 = arith.constant dense<0.000000e+00> : vector<8x64xf32>
    %346 = tpu.matmul %3, %345, %cst_156 {dimension_numbers = #tpu.dot_dimension_numbers<[1], [0], [0], [1], [0, 0, 1, 1], [], []>} : vector<8x32xf32>, vector<32x64xf32>, vector<8x64xf32> -> vector<8x64xf32>
    %c1_157 = arith.constant 1 : index
    %c0_158 = arith.constant 0 : index
    %c0_159 = arith.constant 0 : index
    %347 = vector.load %arg13[%c1_157, %c0_158, %c0_159] : memref<2x1x64xf32, #tpu.memory_space<vmem>>, vector<1x1x64xf32>
    %348 = vector.shape_cast %347 : vector<1x1x64xf32> to vector<1x64xf32>
    %349 = vector.broadcast %348 : vector<1x64xf32> to vector<8x64xf32>
    %350 = arith.addf %346, %349 : vector<8x64xf32>
    %351 = vector.extract_strided_slice %350 {offsets = [0, 0], sizes = [8, 32], strides = [1, 1]} : vector<8x64xf32> to vector<8x32xf32>
    %352 = vector.extract_strided_slice %350 {offsets = [0, 32], sizes = [8, 32], strides = [1, 1]} : vector<8x64xf32> to vector<8x32xf32>
    %353 = tpu.transpose %343, [1, 0] : vector<8x32xf32> -> vector<32x8xf32>
    %354 = vector.shape_cast %353 : vector<32x8xf32> to vector<4x8x8xf32>
    %355 = tpu.transpose %354, [0, 2, 1] : vector<4x8x8xf32> -> vector<4x8x8xf32>
    %356 = tpu.transpose %351, [1, 0] : vector<8x32xf32> -> vector<32x8xf32>
    %357 = vector.shape_cast %356 : vector<32x8xf32> to vector<4x8x8xf32>
    %358 = tpu.transpose %352, [1, 0] : vector<8x32xf32> -> vector<32x8xf32>
    %359 = vector.shape_cast %358 : vector<32x8xf32> to vector<4x8x8xf32>
    "tpu.trace_start"() <{level = 10 : i32, message = "hqd,hdk->hqk"}> : () -> ()
    %cst_160 = arith.constant dense<0.000000e+00> : vector<4x8x8xf32>
    %360 = tpu.matmul %355, %357, %cst_160 {dimension_numbers = #tpu.dot_dimension_numbers<[2], [1], [1], [2], [0, 0, 0, 1, 1, 2], [0], [0]>} : vector<4x8x8xf32>, vector<4x8x8xf32>, vector<4x8x8xf32> -> vector<4x8x8xf32>
    "tpu.trace_stop"() : () -> ()
    %cst_161 = arith.constant 0.353553385 : f32
    %361 = vector.broadcast %cst_161 : f32 to vector<4x8x8xf32>
    %362 = arith.mulf %360, %361 : vector<4x8x8xf32>
    %cst_162 = arith.constant dense<0xFF800000> : vector<4x8xf32>
    %363 = vector.multi_reduction <maximumf>, %362, %cst_162 [2] : vector<4x8x8xf32> to vector<4x8xf32>
    %364 = vector.shape_cast %363 : vector<4x8xf32> to vector<4x8x1xf32>
    %365 = vector.broadcast %364 : vector<4x8x1xf32> to vector<4x8x8xf32>
    %366 = arith.subf %362, %365 : vector<4x8x8xf32>
    %367 = math.exp %366 : vector<4x8x8xf32>
    %cst_163 = arith.constant dense<0.000000e+00> : vector<4x8xf32>
    %368 = vector.multi_reduction <add>, %367, %cst_163 [2] : vector<4x8x8xf32> to vector<4x8xf32>
    %369 = vector.shape_cast %368 : vector<4x8xf32> to vector<4x8x1xf32>
    %370 = tpu.reciprocal %369 {approx = true} : vector<4x8x1xf32> -> vector<4x8x1xf32>
    %371 = vector.broadcast %370 : vector<4x8x1xf32> to vector<4x8x8xf32>
    %372 = arith.mulf %367, %371 : vector<4x8x8xf32>
    "tpu.trace_start"() <{level = 10 : i32, message = "hdk,hqk->hdq"}> : () -> ()
    %cst_164 = arith.constant dense<0.000000e+00> : vector<4x8x8xf32>
    %373 = tpu.matmul %359, %372, %cst_164 {dimension_numbers = #tpu.dot_dimension_numbers<[2], [2], [1], [1], [0, 0, 0, 1, 1, 1], [0], [0]>} : vector<4x8x8xf32>, vector<4x8x8xf32>, vector<4x8x8xf32> -> vector<4x8x8xf32>
    "tpu.trace_stop"() : () -> ()
    %374 = vector.shape_cast %373 : vector<4x8x8xf32> to vector<32x8xf32>
    %375 = tpu.transpose %374, [1, 0] : vector<32x8xf32> -> vector<8x32xf32>
    %c1_165 = arith.constant 1 : index
    %c0_166 = arith.constant 0 : index
    %c0_167 = arith.constant 0 : index
    %376 = vector.load %arg14[%c1_165, %c0_166, %c0_167] : memref<2x32x32xf32, #tpu.memory_space<vmem>>, vector<1x32x32xf32>
    %377 = vector.shape_cast %376 : vector<1x32x32xf32> to vector<32x32xf32>
    %cst_168 = arith.constant dense<0.000000e+00> : vector<8x32xf32>
    %378 = tpu.matmul %375, %377, %cst_168 {dimension_numbers = #tpu.dot_dimension_numbers<[1], [0], [0], [1], [0, 0, 1, 1], [], []>} : vector<8x32xf32>, vector<32x32xf32>, vector<8x32xf32> -> vector<8x32xf32>
    %c1_169 = arith.constant 1 : index
    %c0_170 = arith.constant 0 : index
    %c0_171 = arith.constant 0 : index
    %379 = vector.load %arg15[%c1_169, %c0_170, %c0_171] : memref<2x1x32xf32, #tpu.memory_space<vmem>>, vector<1x1x32xf32>
    %380 = vector.shape_cast %379 : vector<1x1x32xf32> to vector<1x32xf32>
    %381 = vector.broadcast %380 : vector<1x32xf32> to vector<8x32xf32>
    %382 = arith.addf %378, %381 : vector<8x32xf32>
    %383 = vector.extract_strided_slice %243 {offsets = [0, 64], sizes = [1, 32], strides = [1, 1]} : vector<1x192xf32> to vector<1x32xf32>
    %cst_172 = arith.constant 1.000000e+00 : f32
    %384 = vector.broadcast %cst_172 : f32 to vector<1x32xf32>
    %385 = arith.addf %383, %384 : vector<1x32xf32>
    %386 = vector.broadcast %385 : vector<1x32xf32> to vector<8x32xf32>
    %387 = arith.mulf %386, %382 : vector<8x32xf32>
    %388 = arith.addf %314, %387 : vector<8x32xf32>
    %389 = vector.extract_strided_slice %243 {offsets = [0, 96], sizes = [1, 32], strides = [1, 1]} : vector<1x192xf32> to vector<1x32xf32>
    %390 = vector.broadcast %389 : vector<1x32xf32> to vector<8x32xf32>
    %391 = arith.addf %388, %390 : vector<8x32xf32>
    %392 = vector.extract_strided_slice %235 {offsets = [2, 0], sizes = [1, 32], strides = [1, 1]} : vector<3x32xf32> to vector<1x32xf32>
    %393 = vector.extract_strided_slice %237 {offsets = [2, 0], sizes = [1, 32], strides = [1, 1]} : vector<3x32xf32> to vector<1x32xf32>
    %cst_173 = arith.constant dense<0.000000e+00> : vector<8xf32>
    %394 = vector.multi_reduction <add>, %391, %cst_173 [1] : vector<8x32xf32> to vector<8xf32>
    %395 = vector.shape_cast %394 : vector<8xf32> to vector<8x1xf32>
    %cst_174 = arith.constant 3.200000e+01 : f32
    %396 = vector.broadcast %cst_174 : f32 to vector<8x1xf32>
    %397 = arith.divf %395, %396 : vector<8x1xf32>
    %398 = vector.broadcast %397 : vector<8x1xf32> to vector<8x32xf32>
    %399 = arith.subf %391, %398 : vector<8x32xf32>
    %400 = arith.mulf %399, %399 : vector<8x32xf32>
    %cst_175 = arith.constant dense<0.000000e+00> : vector<8xf32>
    %401 = vector.multi_reduction <add>, %400, %cst_175 [1] : vector<8x32xf32> to vector<8xf32>
    %402 = vector.shape_cast %401 : vector<8xf32> to vector<8x1xf32>
    %cst_176 = arith.constant 3.200000e+01 : f32
    %403 = vector.broadcast %cst_176 : f32 to vector<8x1xf32>
    %404 = arith.divf %402, %403 : vector<8x1xf32>
    %cst_177 = arith.constant 9.99999974E-6 : f32
    %405 = vector.broadcast %cst_177 : f32 to vector<8x1xf32>
    %406 = arith.addf %404, %405 : vector<8x1xf32>
    %407 = math.rsqrt %406 : vector<8x1xf32>
    %408 = vector.broadcast %407 : vector<8x1xf32> to vector<8x32xf32>
    %409 = arith.mulf %399, %408 : vector<8x32xf32>
    %410 = vector.broadcast %392 : vector<1x32xf32> to vector<8x32xf32>
    %411 = arith.mulf %409, %410 : vector<8x32xf32>
    %412 = vector.broadcast %393 : vector<1x32xf32> to vector<8x32xf32>
    %413 = arith.addf %411, %412 : vector<8x32xf32>
    %c1_178 = arith.constant 1 : index
    %c0_179 = arith.constant 0 : index
    %c0_180 = arith.constant 0 : index
    %414 = vector.load %arg16[%c1_178, %c0_179, %c0_180] : memref<2x32x64xf32, #tpu.memory_space<vmem>>, vector<1x32x64xf32>
    %415 = vector.shape_cast %414 : vector<1x32x64xf32> to vector<32x64xf32>
    %cst_181 = arith.constant dense<0.000000e+00> : vector<8x64xf32>
    %416 = tpu.matmul %413, %415, %cst_181 {dimension_numbers = #tpu.dot_dimension_numbers<[1], [0], [0], [1], [0, 0, 1, 1], [], []>} : vector<8x32xf32>, vector<32x64xf32>, vector<8x64xf32> -> vector<8x64xf32>
    %c1_182 = arith.constant 1 : index
    %c0_183 = arith.constant 0 : index
    %c0_184 = arith.constant 0 : index
    %417 = vector.load %arg17[%c1_182, %c0_183, %c0_184] : memref<2x1x64xf32, #tpu.memory_space<vmem>>, vector<1x1x64xf32>
    %418 = vector.shape_cast %417 : vector<1x1x64xf32> to vector<1x64xf32>
    %419 = vector.broadcast %418 : vector<1x64xf32> to vector<8x64xf32>
    %420 = arith.addf %416, %419 : vector<8x64xf32>
    %421 = arith.mulf %420, %420 : vector<8x64xf32>
    %422 = arith.mulf %420, %421 : vector<8x64xf32>
    %cst_185 = arith.constant 4.471500e-02 : f32
    %423 = vector.broadcast %cst_185 : f32 to vector<8x64xf32>
    %424 = arith.mulf %423, %422 : vector<8x64xf32>
    %425 = arith.addf %420, %424 : vector<8x64xf32>
    %cst_186 = arith.constant 0.797884583 : f32
    %426 = vector.broadcast %cst_186 : f32 to vector<8x64xf32>
    %427 = arith.mulf %426, %425 : vector<8x64xf32>
    %428 = math.tanh %427 : vector<8x64xf32>
    %cst_187 = arith.constant 1.000000e+00 : f32
    %429 = vector.broadcast %cst_187 : f32 to vector<8x64xf32>
    %430 = arith.addf %429, %428 : vector<8x64xf32>
    %cst_188 = arith.constant 5.000000e-01 : f32
    %431 = vector.broadcast %cst_188 : f32 to vector<8x64xf32>
    %432 = arith.mulf %431, %430 : vector<8x64xf32>
    %433 = arith.mulf %420, %432 : vector<8x64xf32>
    %c1_189 = arith.constant 1 : index
    %c0_190 = arith.constant 0 : index
    %c0_191 = arith.constant 0 : index
    %434 = vector.load %arg18[%c1_189, %c0_190, %c0_191] : memref<2x64x32xf32, #tpu.memory_space<vmem>>, vector<1x64x32xf32>
    %435 = vector.shape_cast %434 : vector<1x64x32xf32> to vector<64x32xf32>
    %cst_192 = arith.constant dense<0.000000e+00> : vector<8x32xf32>
    %436 = tpu.matmul %433, %435, %cst_192 {dimension_numbers = #tpu.dot_dimension_numbers<[1], [0], [0], [1], [0, 0, 1, 1], [], []>} : vector<8x64xf32>, vector<64x32xf32>, vector<8x32xf32> -> vector<8x32xf32>
    %c1_193 = arith.constant 1 : index
    %c0_194 = arith.constant 0 : index
    %c0_195 = arith.constant 0 : index
    %437 = vector.load %arg19[%c1_193, %c0_194, %c0_195] : memref<2x1x32xf32, #tpu.memory_space<vmem>>, vector<1x1x32xf32>
    %438 = vector.shape_cast %437 : vector<1x1x32xf32> to vector<1x32xf32>
    %439 = vector.broadcast %438 : vector<1x32xf32> to vector<8x32xf32>
    %440 = arith.addf %436, %439 : vector<8x32xf32>
    %441 = vector.extract_strided_slice %243 {offsets = [0, 128], sizes = [1, 32], strides = [1, 1]} : vector<1x192xf32> to vector<1x32xf32>
    %cst_196 = arith.constant 1.000000e+00 : f32
    %442 = vector.broadcast %cst_196 : f32 to vector<1x32xf32>
    %443 = arith.addf %441, %442 : vector<1x32xf32>
    %444 = vector.broadcast %443 : vector<1x32xf32> to vector<8x32xf32>
    %445 = arith.mulf %444, %440 : vector<8x32xf32>
    %446 = arith.addf %391, %445 : vector<8x32xf32>
    %447 = vector.extract_strided_slice %243 {offsets = [0, 160], sizes = [1, 32], strides = [1, 1]} : vector<1x192xf32> to vector<1x32xf32>
    %448 = vector.broadcast %447 : vector<1x32xf32> to vector<8x32xf32>
    %449 = arith.addf %446, %448 : vector<8x32xf32>
    %c0_197 = arith.constant 0 : index
    %c0_198 = arith.constant 0 : index
    %c0_199 = arith.constant 0 : index
    %450 = vector.load %arg22[%c0_197, %c0_198, %c0_199] : memref<1x8x32xf32, #tpu.memory_space<vmem>>, vector<1x8x32xf32>
    %451 = vector.shape_cast %450 : vector<1x8x32xf32> to vector<8x32xf32>
    %452 = vector.shape_cast %449 : vector<8x32xf32> to vector<1x8x32xf32>
    tpu.vector_store %arg22[%c0_197, %c0_198, %c0_199], %452 {strides = array<i32>} : memref<1x8x32xf32, #tpu.memory_space<vmem>>, vector<1x8x32xf32>,
    return
  }
  func.func @transform_0(%arg0: i32) -> (i32, i32, i32) {
    %c0_i32 = arith.constant 0 : i32
    %c0_i32_0 = arith.constant 0 : i32
    %c0_i32_1 = arith.constant 0 : i32
    return %arg0, %c0_i32, %c0_i32_0 : i32, i32, i32
  }
  func.func @transform_1(%arg0: i32) -> (i32, i32, i32) {
    %c0_i32 = arith.constant 0 : i32
    %c0_i32_0 = arith.constant 0 : i32
    %c0_i32_1 = arith.constant 0 : i32
    return %arg0, %c0_i32, %c0_i32_0 : i32, i32, i32
  }
  func.func @transform_2(%arg0: i32) -> (i32, i32, i32) {
    %c0_i32 = arith.constant 0 : i32
    %c0_i32_0 = arith.constant 0 : i32
    %c0_i32_1 = arith.constant 0 : i32
    return %arg0, %c0_i32, %c0_i32_0 : i32, i32, i32
  }
  func.func @transform_3(%arg0: i32) -> (i32, i32, i32) {
    %c0_i32 = arith.constant 0 : i32
    %c0_i32_0 = arith.constant 0 : i32
    %c0_i32_1 = arith.constant 0 : i32
    %c0_i32_2 = arith.constant 0 : i32
    return %c0_i32, %c0_i32_0, %c0_i32_1 : i32, i32, i32
  }
  func.func @transform_4(%arg0: i32) -> (i32, i32, i32) {
    %c0_i32 = arith.constant 0 : i32
    %c0_i32_0 = arith.constant 0 : i32
    %c0_i32_1 = arith.constant 0 : i32
    %c0_i32_2 = arith.constant 0 : i32
    return %c0_i32, %c0_i32_0, %c0_i32_1 : i32, i32, i32
  }
  func.func @transform_5(%arg0: i32) -> (i32, i32, i32) {
    %c0_i32 = arith.constant 0 : i32
    %c0_i32_0 = arith.constant 0 : i32
    %c0_i32_1 = arith.constant 0 : i32
    %c0_i32_2 = arith.constant 0 : i32
    return %c0_i32, %c0_i32_0, %c0_i32_1 : i32, i32, i32
  }
  func.func @transform_6(%arg0: i32) -> (i32, i32, i32) {
    %c0_i32 = arith.constant 0 : i32
    %c0_i32_0 = arith.constant 0 : i32
    %c0_i32_1 = arith.constant 0 : i32
    %c0_i32_2 = arith.constant 0 : i32
    return %c0_i32, %c0_i32_0, %c0_i32_1 : i32, i32, i32
  }
  func.func @transform_7(%arg0: i32) -> (i32, i32, i32) {
    %c0_i32 = arith.constant 0 : i32
    %c0_i32_0 = arith.constant 0 : i32
    %c0_i32_1 = arith.constant 0 : i32
    %c0_i32_2 = arith.constant 0 : i32
    return %c0_i32, %c0_i32_0, %c0_i32_1 : i32, i32, i32
  }
  func.func @transform_8(%arg0: i32) -> (i32, i32, i32) {
    %c0_i32 = arith.constant 0 : i32
    %c0_i32_0 = arith.constant 0 : i32
    %c0_i32_1 = arith.constant 0 : i32
    %c0_i32_2 = arith.constant 0 : i32
    return %c0_i32, %c0_i32_0, %c0_i32_1 : i32, i32, i32
  }
  func.func @transform_9(%arg0: i32) -> (i32, i32, i32) {
    %c0_i32 = arith.constant 0 : i32
    %c0_i32_0 = arith.constant 0 : i32
    %c0_i32_1 = arith.constant 0 : i32
    %c0_i32_2 = arith.constant 0 : i32
    return %c0_i32, %c0_i32_0, %c0_i32_1 : i32, i32, i32
  }
  func.func @transform_10(%arg0: i32) -> (i32, i32, i32) {
    %c0_i32 = arith.constant 0 : i32
    %c0_i32_0 = arith.constant 0 : i32
    %c0_i32_1 = arith.constant 0 : i32
    %c0_i32_2 = arith.constant 0 : i32
    return %c0_i32, %c0_i32_0, %c0_i32_1 : i32, i32, i32
  }
  func.func @transform_11(%arg0: i32) -> (i32, i32, i32) {
    %c0_i32 = arith.constant 0 : i32
    %c0_i32_0 = arith.constant 0 : i32
    %c0_i32_1 = arith.constant 0 : i32
    %c0_i32_2 = arith.constant 0 : i32
    return %c0_i32, %c0_i32_0, %c0_i32_1 : i32, i32, i32
  }
  func.func @transform_12(%arg0: i32) -> (i32, i32, i32) {
    %c0_i32 = arith.constant 0 : i32
    %c0_i32_0 = arith.constant 0 : i32
    %c0_i32_1 = arith.constant 0 : i32
    %c0_i32_2 = arith.constant 0 : i32
    return %c0_i32, %c0_i32_0, %c0_i32_1 : i32, i32, i32
  }
  func.func @transform_13(%arg0: i32) -> (i32, i32, i32) {
    %c0_i32 = arith.constant 0 : i32
    %c0_i32_0 = arith.constant 0 : i32
    %c0_i32_1 = arith.constant 0 : i32
    %c0_i32_2 = arith.constant 0 : i32
    return %c0_i32, %c0_i32_0, %c0_i32_1 : i32, i32, i32
  }
  func.func @transform_14(%arg0: i32) -> (i32, i32, i32) {
    %c0_i32 = arith.constant 0 : i32
    %c0_i32_0 = arith.constant 0 : i32
    %c0_i32_1 = arith.constant 0 : i32
    %c0_i32_2 = arith.constant 0 : i32
    return %c0_i32, %c0_i32_0, %c0_i32_1 : i32, i32, i32
  }
  func.func @transform_15(%arg0: i32) -> (i32, i32, i32) {
    %c0_i32 = arith.constant 0 : i32
    %c0_i32_0 = arith.constant 0 : i32
    %c0_i32_1 = arith.constant 0 : i32
    %c0_i32_2 = arith.constant 0 : i32
    return %c0_i32, %c0_i32_0, %c0_i32_1 : i32, i32, i32
  }
  func.func @transform_16(%arg0: i32) -> (i32, i32, i32) {
    %c0_i32 = arith.constant 0 : i32
    %c0_i32_0 = arith.constant 0 : i32
    %c0_i32_1 = arith.constant 0 : i32
    %c0_i32_2 = arith.constant 0 : i32
    return %c0_i32, %c0_i32_0, %c0_i32_1 : i32, i32, i32
  }
  func.func @transform_17(%arg0: i32) -> (i32, i32, i32) {
    %c0_i32 = arith.constant 0 : i32
    %c0_i32_0 = arith.constant 0 : i32
    %c0_i32_1 = arith.constant 0 : i32
    %c0_i32_2 = arith.constant 0 : i32
    return %c0_i32, %c0_i32_0, %c0_i32_1 : i32, i32, i32
  }
  func.func @transform_18(%arg0: i32) -> (i32, i32, i32) {
    %c0_i32 = arith.constant 0 : i32
    %c0_i32_0 = arith.constant 0 : i32
    %c0_i32_1 = arith.constant 0 : i32
    %c0_i32_2 = arith.constant 0 : i32
    return %c0_i32, %c0_i32_0, %c0_i32_1 : i32, i32, i32
  }
  func.func @transform_19(%arg0: i32) -> (i32, i32, i32) {
    %c0_i32 = arith.constant 0 : i32
    %c0_i32_0 = arith.constant 0 : i32
    %c0_i32_1 = arith.constant 0 : i32
    %c0_i32_2 = arith.constant 0 : i32
    return %c0_i32, %c0_i32_0, %c0_i32_1 : i32, i32, i32
  }
  func.func @transform_20(%arg0: i32) -> (i32, i32, i32) {
    %c0_i32 = arith.constant 0 : i32
    %c0_i32_0 = arith.constant 0 : i32
    %c0_i32_1 = arith.constant 0 : i32
    %c0_i32_2 = arith.constant 0 : i32
    return %c0_i32, %c0_i32_0, %c0_i32_1 : i32, i32, i32
  }
  func.func @transform_21(%arg0: i32) -> (i32, i32, i32) {
    %c0_i32 = arith.constant 0 : i32
    %c0_i32_0 = arith.constant 0 : i32
    %c0_i32_1 = arith.constant 0 : i32
    return %arg0, %c0_i32, %c0_i32_0 : i32, i32, i32
  }
}

</mosaic_0001>

<bundles_post_ra>
// kernel: decoder_layer_stack.1
= control target key start
LH: loop header
LB: loop body
LE: loop exit
PB: predicated region body
PF: predicated region fallthrough
CT: control target
= control target key end

     0   :  { %s8729_s0 = inlined_call_operand.vmem [shape: f32[2,8,32], index: 0, kind: input, shape index: {}]   ;;  %s8730_s1 = inlined_call_operand.vmem [shape: f32[2,8,32], index: 1, kind: input, shape index: {}]   ;;  %s8731_s2 = inlined_call_operand.hbm [shape: f32[2,1,32], index: 2, kind: input, shape index: {}]   ;;  %s8732_s3 = inlined_call_operand.vmem [shape: f32[2,3,32], index: 3, kind: input, shape index: {}]   ;;  %s8733_s4 = inlined_call_operand.vmem [shape: f32[2,3,32], index: 4, kind: input, shape index: {}]   ;;  %s8734_s5 = inlined_call_operand.vmem [shape: f32[2,32,96], index: 5, kind: input, shape index: {}]   ;;  %s8735_s6 = inlined_call_operand.hbm [shape: f32[2,1,96], index: 6, kind: input, shape index: {}]   ;;  %s8736_s7 = inlined_call_operand.hbm [shape: f32[2,32,32], index: 7, kind: input, shape index: {}]   ;;  %s8737_s8 = inlined_call_operand.hbm [shape: f32[2,1,32], index: 8, kind: input, shape index: {}]   ;;  %s8738_s9 = inlined_call_operand.hbm [shape: f32[2,32,32], index: 9, kind: input, shape index: {}]   ;;  %s8739_s10 = inlined_call_operand.hbm [shape: f32[2,1,32], index: 10, kind: input, shape index: {}]   ;;  %s8740_s11 = inlined_call_operand.hbm [shape: f32[2,32,64], index: 11, kind: input, shape index: {}]   ;;  %s8741_s12 = inlined_call_operand.hbm [shape: f32[2,1,64], index: 12, kind: input, shape index: {}]   ;;  %s8742_s13 = inlined_call_operand.hbm [shape: f32[2,32,32], index: 13, kind: input, shape index: {}]   ;;  %s8743_s14 = inlined_call_operand.hbm [shape: f32[2,1,32], index: 14, kind: input, shape index: {}]   ;;  %s8744_s15 = inlined_call_operand.hbm [shape: f32[2,32,64], index: 15, kind: input, shape index: {}]   ;;  %s8745_s16 = inlined_call_operand.hbm [shape: f32[2,1,64], index: 16, kind: input, shape index: {}]   ;;  %s8746_s17 = inlined_call_operand.vmem [shape: f32[2,64,32], index: 17, kind: input, shape index: {}]   ;;  %s8747_s18 = inlined_call_operand.hbm [shape: f32[2,1,32], index: 18, kind: input, shape index: {}]   ;;  %s8748_s19 = inlined_call_operand.vmem [shape: f32[2,32,192], index: 19, kind: input, shape index: {}]   ;;  %s8749_s20 = inlined_call_operand.vmem [shape: f32[2,1,192], index: 20, kind: input, shape index: {}]   ;;  %s8750_s21 = inlined_call_operand.hbm [shape: f32[2,8,32], index: 21, kind: output, shape index: {}]  }
   0x1   :  { %8769 = sst [smem:[#allocation32_spill]] %s8729_s0 }
   0x2   :  { %8770 = sst [smem:[#allocation33_spill]] %s8730_s1 }
   0x3   :  { %8771 = sst [smem:[#allocation34_spill]] %s8731_s2 }
   0x4   :  { %8772 = sst [smem:[#allocation35_spill]] %s8732_s3 }
   0x5   :  { %8773 = sst [smem:[#allocation36_spill]] %s8733_s4 }
   0x6   :  { %8774 = sst [smem:[#allocation37_spill]] %s8734_s5 }
   0x7   :  { %8775 = sst [smem:[#allocation38_spill]] %s8735_s6 }
   0x8   :  { %8776 = sst [smem:[#allocation39_spill]] %s8736_s7 }
   0x9   :  { %8777 = sst [smem:[#allocation40_spill]] %s8737_s8 }
   0xa   :  { %8778 = sst [smem:[#allocation41_spill]] %s8738_s9 }
   0xb   :  { %8779 = sst [smem:[#allocation42_spill]] %s8739_s10 }
   0xc   :  { %8780 = sst [smem:[#allocation43_spill]] %s8740_s11 }
   0xd   :  { %8781 = sst [smem:[#allocation44_spill]] %s8741_s12 }
   0xe   :  { %8782 = sst [smem:[#allocation45_spill]] %s8742_s13 }
   0xf   :  { %8783 = sst [smem:[#allocation46_spill]] %s8743_s14 }
  0x10   :  { %8784 = sst [smem:[#allocation47_spill]] %s8746_s17 }
  0x11   :  { %8785 = sst [smem:[#allocation48_spill]] %s8750_s21 }
  0x12   :  { %26 = vsyncpa [#allocation3], 0 }
  0x13   :  { %28 = vsyncpa [#allocation3 + $0x1], 0 }
  0x14   :  { %29 = vsyncpa [#allocation6], 0 }
  0x15   :  { %30 = vsyncpa [#allocation9], 0 }
  0x16   :  { %31 = vsyncpa [#allocation12], 0 }
  0x17   :  { %32 = vsyncpa [#allocation15], 0 }
  0x18   :  { %33 = vsyncpa [#allocation18], 0 }
  0x19   :  { %34 = vsyncpa [#allocation21], 0 }
  0x1a   :  { %35 = vsyncpa [#allocation4], 0 }
  0x1b   :  { %37 = vsyncpa [#allocation4 + $0x1], 0  ;;  %s7808_s2 = smov 0   ;;  %s7810_s25 = smov 0  }
  0x1c   :  { %s7812_s26 = smov 0   ;;  %s7814_s27 = smov 0  }
  0x1d LB: > { %s7675_s3 = smov [#allocation5]   ;;  %s7829_s29 = sadd.s32 4294967295, %s7673_s27   ;;  %s7673_s27 = sphi %s7814_s27, %s8836_s27   ;;  %s7669_s26 = sphi %s7812_s26, %s8835_s26   ;;  %s7665_s25 = sphi %s7810_s25, %s8834_s25   ;;  %s7661_s2 = sphi %s7808_s2, %s8833_s2  }
  0x1e   : > { %s551_s28 = sshll.u32 %s7675_s3, 4  ;;  %p6374_p0 = scmp.ge.s32.totalorder %s7673_s27, 1  ;;  %s552_s28 = int_to_ptr.vmem [resolvable:$true] %s551_s28 }
  0x1f   : > { %p8759_p1 = scmp.eq.s32.totalorder %s7829_s29, 0  ;;  %p530_p2 = scmp.lt.s32.totalorder %s7673_s27, 3 }
  0x20   : > { %s7676_s4 = smov [#allocation8]   ;;  %s7677_s22 = smov [#allocation11]  }
  0x21   : > { %p7834_p3 = pnand %p6374_p0, %p530_p2  ;;  %s577_s30 = sshll.u32 %s7676_s4, 4  ;;  %s7847_s30 = int_to_ptr.vmem [resolvable:$true] %s577_s30 }
  0x22   : > { %s603_s23 = sshll.u32 %s7677_s22, 4  ;;  %s7256_s24 = scalar_lea.vmem %s552_s28, 32  ;;  %s7849_s23 = int_to_ptr.vmem [resolvable:$true] %s603_s23 }
  0x23   : > { %s8786_s0 = scalar_select %p7834_p3, 1, 0 }
  0x24   : > { %p7034_p5 = pneg %p7834_p3  ;;  %p7257_p8 = scmp.ne.s32.totalorder %s552_s28, %s7256_s24 }
  0x25   : > { %p7264_p11 = scmp.lt.s32.totalorder %s552_s28, %s552_s28  ;;  %p7265_p12 = scmp.lt.s32.totalorder %s7256_s24, %s7256_s24 }
  0x26   : > { %p7843_p6 = pnand %p7034_p5, %p8759_p1 }
  0x27   : > { %p7266_p13 = por %p7265_p12, %p7264_p11 }
  0x28   : > { %p7853_p7 = pneg %p7843_p6 }
  0x2a   : > { %p7259_p9 = pnand %p7257_p8, %p7853_p7 }
  0x2c   : > { %p7260_p10 = pneg %p7259_p9 }
  0x2e   : > { %p7267_p0 = pnand %p7266_p13, %p7260_p10 }
  0x30   : > { %7270 = shalt.err (!%p7267_p0)
}
  0x31   : > { %s8757_s3 = smov 16   ;;  %s8758_s4 = smov 1  }
  0x32   : > { %s8789_s6 = sld [smem:[#allocation38_spill]]  ;;  %s7282_s17 = scalar_lea.vmem %s7847_s30, 32 }
  0x33   : > { %p7283_p2 = scmp.ne.s32.totalorder %s7847_s30, %s7282_s17  ;;  %p7290_p9 = scmp.lt.s32.totalorder %s7847_s30, %s7847_s30 }
  0x34   : > { %p7291_p10 = scmp.lt.s32.totalorder %s7282_s17, %s7282_s17 }
  0x35   : > { %p7285_p5 = pnand %p7283_p2, %p7853_p7 }
  0x36   : > { %p7292_p11 = por %p7291_p10, %p7290_p9 }
  0x37   : > { %p7286_p8 = pneg %p7285_p5 }
  0x38   : > { %7037 = dma.hbm_to_vmem [thread:$0]  (!%p7843_p6), %s8789_s6, 32, %s552_s28, [#allocation6], %s8757_s3, %s8757_s3, %s8758_s4  }
  0x39   : > { %p7293_p12 = pnand %p7292_p11, %p7286_p8 }
  0x3b   : > { %7296 = shalt.err (!%p7293_p12)
}
  0x3c   : > { %s8790_s8 = sld [smem:[#allocation40_spill]]  ;;  %s7308_s28 = scalar_lea.vmem %s7849_s23, 32 }
  0x3d   : > { %p7309_p13 = scmp.ne.s32.totalorder %s7849_s23, %s7308_s28  ;;  %p7316_p5 = scmp.lt.s32.totalorder %s7849_s23, %s7849_s23 }
  0x3e   : > { %p7317_p8 = scmp.lt.s32.totalorder %s7308_s28, %s7308_s28 }
  0x3f   : > { %p7311_p0 = pnand %p7309_p13, %p7853_p7 }
  0x40   : > { %p7318_p9 = por %p7317_p8, %p7316_p5 }
  0x41   : > { %p7312_p2 = pneg %p7311_p0 }
  0x42   : > { %7043 = dma.hbm_to_vmem [thread:$0]  (!%p7843_p6), %s8790_s8, 32, %s7847_s30, [#allocation9], %s8757_s3, %s8757_s3, %s8758_s4  }
  0x43   : > { %p7319_p10 = pnand %p7318_p9, %p7312_p2 }
  0x45   : > { %7322 = shalt.err (!%p7319_p10)
}
  0x46   : > { %s8791_s10 = sld [smem:[#allocation42_spill]]  ;;  %s7680_s30 = smov [#allocation14]  }
  0x47   : > { %s629_s24 = sshll.u32 %s7680_s30, 4  ;;  %s7681_s21 = smov [#allocation17]   ;;  %s630_s24 = int_to_ptr.vmem [resolvable:$true] %s629_s24 }
  0x48   : > { %s655_s6 = sshll.u32 %s7681_s21, 4  ;;  %s7334_s28 = scalar_lea.vmem %s630_s24, 32  ;;  %s656_s6 = int_to_ptr.vmem [resolvable:$true] %s655_s6 }
  0x49   : > { %p7335_p11 = scmp.ne.s32.totalorder %s630_s24, %s7334_s28  ;;  %p7342_p0 = scmp.lt.s32.totalorder %s630_s24, %s630_s24 }
  0x4a   : > { %p7343_p2 = scmp.lt.s32.totalorder %s7334_s28, %s7334_s28 }
  0x4b   : > { %p7337_p12 = pnand %p7335_p11, %p7853_p7 }
  0x4c   : > { %7049 = dma.hbm_to_vmem [thread:$0]  (!%p7843_p6), %s8791_s10, 32, %s7849_s23, [#allocation12], %s8757_s3, %s8757_s3, %s8758_s4  }
  0x4d   : > { %p7338_p13 = pneg %p7337_p12  ;;  %p7344_p5 = por %p7343_p2, %p7342_p0 }
  0x4f   : > { %p7345_p8 = pnand %p7344_p5, %p7338_p13 }
  0x51   : > { %7348 = shalt.err (!%p7345_p8)
}
  0x52   : > { %s8792_s12 = sld [smem:[#allocation44_spill]]  ;;  %s7360_s22 = scalar_lea.vmem %s656_s6, 32 }
  0x53   : > { %p7361_p9 = scmp.ne.s32.totalorder %s656_s6, %s7360_s22  ;;  %p7368_p12 = scmp.lt.s32.totalorder %s656_s6, %s656_s6 }
  0x54   : > { %p7369_p0 = scmp.lt.s32.totalorder %s7360_s22, %s7360_s22 }
  0x55   : > { %p7363_p10 = pnand %p7361_p9, %p7853_p7 }
  0x56   : > { %p7370_p13 = por %p7369_p0, %p7368_p12 }
  0x57   : > { %p7364_p11 = pneg %p7363_p10 }
  0x58   : > { %7055 = dma.hbm_to_vmem [thread:$0]  (!%p7843_p6), %s8792_s12, 32, %s630_s24, [#allocation15], %s8757_s3, %s8757_s3, %s8758_s4  }
  0x59   : > { %p7371_p2 = pnand %p7370_p13, %p7364_p11 }
  0x5b   : > { %7374 = shalt.err (!%p7371_p2)
}
  0x5c   : > { %s8793_s14 = sld [smem:[#allocation46_spill]]  ;;  %s7682_s24 = smov [#allocation20]  }
  0x5d   : > { %s681_s28 = sshll.u32 %s7682_s24, 4  ;;  %s7683_s23 = smov [#allocation7]   ;;  %s682_s28 = int_to_ptr.vmem [resolvable:$true] %s681_s28 }
  0x5e   : > { %s564_s17 = sshll.u32 %s7683_s23, 4  ;;  %s7386_s8 = scalar_lea.vmem %s682_s28, 32  ;;  %s565_s17 = int_to_ptr.vmem [resolvable:$true] %s564_s17 }
  0x5f   : > { %p7387_p5 = scmp.ne.s32.totalorder %s682_s28, %s7386_s8  ;;  %p7394_p10 = scmp.lt.s32.totalorder %s682_s28, %s682_s28 }
  0x60   : > { %p7395_p11 = scmp.lt.s32.totalorder %s7386_s8, %s7386_s8 }
  0x61   : > { %p7389_p8 = pnand %p7387_p5, %p7853_p7 }
  0x62   : > { %7061 = dma.hbm_to_vmem [thread:$0]  (!%p7843_p6), %s8793_s14, 32, %s656_s6, [#allocation18], %s8757_s3, %s8757_s3, %s8758_s4  }
  0x63   : > { %p7390_p9 = pneg %p7389_p8  ;;  %p7396_p12 = por %p7395_p11, %p7394_p10 }
  0x65   : > { %p7397_p0 = pnand %p7396_p12, %p7390_p9 }
  0x67   : > { %7400 = shalt.err (!%p7397_p0)
}
  0x68   : > { %7067 = dma.hbm_to_vmem [thread:$0]  (!%p7843_p6), %s8745_s16, 32, %s682_s28, [#allocation21], %s8757_s3, %s8757_s3, %s8758_s4  }
  0x69   : > { %s7412_s30 = scalar_lea.vmem %s565_s17, 1024  ;;  %p7420_p8 = scmp.lt.s32.totalorder %s565_s17, %s565_s17 }
  0x6a   : > { %p7413_p13 = scmp.ne.s32.totalorder %s565_s17, %s7412_s30  ;;  %p7421_p10 = scmp.lt.s32.totalorder %s7412_s30, %s7412_s30 }
  0x6c   : > { %p7415_p2 = pnand %p7413_p13, %p7853_p7  ;;  %p7422_p9 = por %p7421_p10, %p7420_p8 }
  0x6e   : > { %p7416_p5 = pneg %p7415_p2 }
  0x70   : > { %p7423_p11 = pnand %p7422_p9, %p7416_p5 }
  0x72   : > { %7426 = shalt.err (!%p7423_p11)
}
  0x73   : > { %s7684_s8 = smov 128   ;;  %s7685_s21 = smov 8  }
  0x74   : > { %s8794_s7 = sld [smem:[#allocation39_spill]]  ;;  %s7686_s23 = smov [#allocation10]  }
  0x75   : > { %s590_s6 = sshll.u32 %s7686_s23, 4  ;;  %s7687_s22 = smov [#allocation13]   ;;  %s591_s6 = int_to_ptr.vmem [resolvable:$true] %s590_s6 }
  0x76   : > { %s616_s30 = sshll.u32 %s7687_s22, 4  ;;  %s7438_s3 = scalar_lea.vmem %s591_s6, 1024  ;;  %s617_s30 = int_to_ptr.vmem [resolvable:$true] %s616_s30 }
  0x77   : > { %p7439_p12 = scmp.ne.s32.totalorder %s591_s6, %s7438_s3  ;;  %p7446_p2 = scmp.lt.s32.totalorder %s591_s6, %s591_s6 }
  0x78   : > { %p7447_p5 = scmp.lt.s32.totalorder %s7438_s3, %s7438_s3 }
  0x79   : > { %p7441_p0 = pnand %p7439_p12, %p7853_p7 }
  0x7a   : > { %7040 = dma.hbm_to_vmem [thread:$0]  (!%p7843_p6), %s8794_s7, 1024, %s565_s17, [#allocation6], %s7684_s8, %s7684_s8, %s7685_s21  }
  0x7b   : > { %p7442_p13 = pneg %p7441_p0  ;;  %p7448_p8 = por %p7447_p5, %p7446_p2 }
  0x7d   : > { %p7449_p10 = pnand %p7448_p8, %p7442_p13 }
  0x7f   : > { %7452 = shalt.err (!%p7449_p10)
}
  0x80   : > { %s8795_s9 = sld [smem:[#allocation41_spill]]  ;;  %s7464_s28 = scalar_lea.vmem %s617_s30, 1024 }
  0x81   : > { %p7465_p9 = scmp.ne.s32.totalorder %s617_s30, %s7464_s28  ;;  %p7472_p0 = scmp.lt.s32.totalorder %s617_s30, %s617_s30 }
  0x82   : > { %p7473_p2 = scmp.lt.s32.totalorder %s7464_s28, %s7464_s28 }
  0x83   : > { %p7467_p11 = pnand %p7465_p9, %p7853_p7 }
  0x84   : > { %p7474_p13 = por %p7473_p2, %p7472_p0 }
  0x85   : > { %p7468_p12 = pneg %p7467_p11 }
  0x86   : > { %7046 = dma.hbm_to_vmem [thread:$0]  (!%p7843_p6), %s8795_s9, 1024, %s591_s6, [#allocation9], %s7684_s8, %s7684_s8, %s7685_s21  }
  0x87   : > { %p7475_p5 = pnand %p7474_p13, %p7468_p12 }
  0x89   : > { %7478 = shalt.err (!%p7475_p5)
}
  0x8a   : > { %s8796_s11 = sld [smem:[#allocation43_spill]]  ;;  %s7688_s6 = smov [#allocation16]  }
  0x8b   : > { %s642_s22 = sshll.u32 %s7688_s6, 4  ;;  %s7689_s17 = smov [#allocation19]   ;;  %s643_s22 = int_to_ptr.vmem [resolvable:$true] %s642_s22 }
  0x8c   : > { %s668_s24 = sshll.u32 %s7689_s17, 4  ;;  %s7490_s4 = scalar_lea.vmem %s643_s22, 1024  ;;  %s669_s24 = int_to_ptr.vmem [resolvable:$true] %s668_s24 }
  0x8d   : > { %p7491_p8 = scmp.ne.s32.totalorder %s643_s22, %s7490_s4  ;;  %p7498_p11 = scmp.lt.s32.totalorder %s643_s22, %s643_s22 }
  0x8e   : > { %p7499_p12 = scmp.lt.s32.totalorder %s7490_s4, %s7490_s4 }
  0x8f   : > { %p7493_p10 = pnand %p7491_p8, %p7853_p7 }
  0x90   : > { %7052 = dma.hbm_to_vmem [thread:$0]  (!%p7843_p6), %s8796_s11, 1024, %s617_s30, [#allocation12], %s7684_s8, %s7684_s8, %s7685_s21  }
  0x91   : > { %p7494_p9 = pneg %p7493_p10  ;;  %p7500_p0 = por %p7499_p12, %p7498_p11 }
  0x93   : > { %p7501_p2 = pnand %p7500_p0, %p7494_p9 }
  0x95   : > { %7504 = shalt.err (!%p7501_p2)
}
  0x96   : > { %s8797_s13 = sld [smem:[#allocation45_spill]]  ;;  %s7516_s3 = scalar_lea.vmem %s669_s24, 1024 }
  0x97   : > { %p7517_p13 = scmp.ne.s32.totalorder %s669_s24, %s7516_s3  ;;  %p7524_p10 = scmp.lt.s32.totalorder %s669_s24, %s669_s24 }
  0x98   : > { %p7525_p11 = scmp.lt.s32.totalorder %s7516_s3, %s7516_s3 }
  0x99   : > { %p7519_p5 = pnand %p7517_p13, %p7853_p7 }
  0x9a   : > { %p7526_p9 = por %p7525_p11, %p7524_p10 }
  0x9b   : > { %p7520_p8 = pneg %p7519_p5 }
  0x9c   : > { %7058 = dma.hbm_to_vmem [thread:$0]  (!%p7843_p6), %s8797_s13, 1024, %s643_s22, [#allocation15], %s7684_s8, %s7684_s8, %s7685_s21  }
  0x9d   : > { %p7527_p12 = pnand %p7526_p9, %p7520_p8 }
  0x9f   : > { %7530 = shalt.err (!%p7527_p12)
}
  0xa0   : > { %7064 = dma.hbm_to_vmem [thread:$0]  (!%p7843_p6), %s8744_s15, 1024, %s669_s24, [#allocation18], %s7684_s8, %s7684_s8, %s7685_s21  }
  0xa1   : > { %s7690_s6 = smov [#allocation22]  }
  0xa2   : > { %s697_s22 = sshll.u32 %s7690_s6, 4  ;;  %s698_s22 = int_to_ptr.vmem [resolvable:$true] %s697_s22 }
  0xa3   : > { %s7542_s17 = scalar_lea.vmem %s698_s22, 32  ;;  %p7550_p5 = scmp.lt.s32.totalorder %s698_s22, %s698_s22 }
  0xa4   : > { %p7543_p0 = scmp.ne.s32.totalorder %s698_s22, %s7542_s17  ;;  %p7551_p8 = scmp.lt.s32.totalorder %s7542_s17, %s7542_s17 }
  0xa6   : > { %p7545_p2 = pnand %p7543_p0, %p7853_p7  ;;  %p7552_p10 = por %p7551_p8, %p7550_p5 }
  0xa8   : > { %p7546_p13 = pneg %p7545_p2 }
  0xaa   : > { %p7553_p11 = pnand %p7552_p10, %p7546_p13 }
  0xac   : > { %7556 = shalt.err (!%p7553_p11)
}
  0xad   : > { %s8798_s30 = smov 1   ;;  %s8799_s28 = smov 16  }
  0xae   : > { %7070 = dma.hbm_to_vmem [thread:$0]  (!%p7843_p6), %s8747_s18, 32, %s698_s22, [#allocation21], %s8799_s28, %s8799_s28, %s8798_s30  }
  0xaf   : > { %s6373_s5 = sadd.s32 4294967294, %s7673_s27   ;;  %s7989_s1 = sadd.s32 1, %s7673_s27  }
  0xb0   : > { %s99_s21 = ssub.s32 %s7673_s27, %s7989_s1  ;;  %s102_s24 = sadd.s32 1, %s7669_s26 }
  0xb1   : > { %p100_p7 = scmp.eq.s32.totalorder %s99_s21, 0  ;;  %p109_p9 = scmp.ne.s32.totalorder %s7669_s26, %s7665_s25 }
  0xb2   : > { %p110_p12 = scmp.eq.s32.totalorder %s7673_s27, 0  ;;  %p115_p0 = scmp.ne.s32.totalorder %s7665_s25, %s7661_s2 }
  0xb3   : > { %s8000_s4 = scalar_select %p100_p7, %s7669_s26, %s102_s24  }
  0xb4   : > { %p8002_p2 = por %p110_p12, %p109_p9  ;;  %p8008_p6 = por %p8759_p1, %p115_p0 }
  0xb5   : > { %p517_p13 = scmp.eq.s32.totalorder %s7829_s29, 1  ;;  %p523_p5 = scmp.eq.s32.totalorder %s6373_s5, 1 }
  0xb6   : > { %s8801_s6 = scalar_select %p8008_p6, 1, 0 }
  0xb7   : > { %p7091_p8 = scmp.lt.s32.totalorder %s7673_s27, 2  ;;  %s731_s22 = sand.u32 1, %s7669_s26  }
  0xb8   : > { %p8015_p10 = por %p517_p13, %p109_p9  ;;  %p8019_p11 = por %p523_p5, %p115_p0 }
  0xb9   : > { %s6388_s28 = sshll.u32 %s7673_s27, 4  ;;  %s734_s3 = scalar_lea.vmem [#allocation2], %s731_s22 }
  0xba   : > { %s8802_s17 = scalar_select %p8015_p10, 1, 0 }
  0xbb   : > { %s8803_s30 = scalar_select %p8019_p11, 1, 0 }
  0xbc   : > { %s741_s8 = sshll.u32 %s734_s3, 4  ;;  %s8804_s7 = sld [smem:[#allocation34_spill]]  ;;  %s742_s8 = int_to_ptr.vmem [resolvable:$true] %s741_s8 }
  0xbd   : > { %p8031_p7 = pnand %p7091_p8, %p8002_p2  ;;  %s732_s10 = scalar_lea.sflag [#allocation3], %s731_s22 }
  0xbf   : > { %p7559_p12 = pneg %p8031_p7 }
  0xc2   : > { %s8027_s9 = scalar_lea.hbm %s8804_s7, %s6388_s28  ;;  %s7562_s21 = scalar_lea.hbm %s8804_s7, 32 }
  0xc3   : > { %s7557_s11 = scalar_lea.hbm %s8027_s9, 16  ;;  %p7563_p5 = scmp.lt.s32.totalorder %s8027_s9, %s8804_s7 }
  0xc4   : > { %p7558_p9 = scmp.ne.s32.totalorder %s8027_s9, %s7557_s11  ;;  %p7564_p2 = scmp.lt.s32.totalorder %s7562_s21, %s7557_s11 }
  0xc6   : > { %p7560_p0 = pnand %p7559_p12, %p7558_p9  ;;  %p7565_p8 = por %p7564_p2, %p7563_p5 }
  0xc8   : > { %p7561_p13 = pneg %p7560_p0 }
  0xca   : > { %p7566_p4 = pnand %p7565_p8, %p7561_p13 }
  0xcc   : > { %7569 = shalt.err (!%p7566_p4)
}
  0xcd   : > { %s7570_s23 = scalar_lea.vmem %s742_s8, 16  ;;  %s7691_s22 = smov [#allocation2]  }
  0xce   : > { %p7571_p1 = scmp.ne.s32.totalorder %s742_s8, %s7570_s23  ;;  %s7575_s13 = sshll.u32 %s7691_s22, 4  ;;  %s7576_s13 = int_to_ptr.vmem [resolvable:$false] %s7575_s13 }
  0xcf   : > { %s7577_s14 = scalar_lea.vmem %s7576_s13, 32  ;;  %p7578_p9 = scmp.lt.s32.totalorder %s742_s8, %s7576_s13 }
  0xd0   : > { %p7573_p11 = pnand %p7571_p1, %p7559_p12  ;;  %p7579_p0 = scmp.lt.s32.totalorder %s7577_s14, %s7570_s23 }
  0xd2   : > { %p7574_p10 = pneg %p7573_p11  ;;  %p7580_p6 = por %p7579_p0, %p7578_p9 }
  0xd4   : > { %p7581_p3 = pnand %p7580_p6, %p7574_p10 }
  0xd6   : > { %7584 = shalt.err (!%p7581_p3)
}
  0xd7   : > { %7074 = dma.hbm_to_vmem [thread:$0]  (!%p8031_p7), %s8027_s9, 16, %s742_s8, %s732_s10  }
  0xd8   : > { %p8806_p13 = scmp.ne.s32.totalorder %s8786_s0, 0 }
  0xd9   : > { %s8052_s11 = sand.u32 (!%p8806_p13), 1, %s7665_s25   ;;  %p8807_p1 = scmp.ne.s32.totalorder (!%p8806_p13), %s8801_s6, 0 }
  0xda   : > { %750 = sbr.rel (%p8806_p13) target bundleno = 9453 (0x24ed), region = 104  ;;  %s753_s12 = scalar_lea.sflag (!%p8806_p13), [#allocation3], %s8052_s11 }
  0xdb   : > { %s755_s3 = scalar_lea.vmem (!%p8806_p13), [#allocation2], %s8052_s11 }
  0xdf   : > { %7628 = dma.done.wait (%p8807_p1), %s753_s12, 16  }
  0xe0   : > { %7630 = vsyncadd (%p8807_p1), %s753_s12, 4294967280  ;;  %p8808_p3 = scmp.eq.s32.totalorder %s7829_s29, 0 }
  0xe2   : > { %7632 = dma.done.wait (%p8808_p3), [#allocation6], 1056   ;;  %p8809_p4 = pmov %p8808_p3 }
  0xe3   : > { %p8810_p6 = pmov %p8808_p3 }
  0xe4   : > { %7634 = vsyncadd (%p8809_p4), [#allocation6], 4294966240 }
  0xe5   : > { %7636 = dma.done.wait (%p8810_p6), [#allocation9], 1056   ;;  %p8811_p10 = pmov %p8808_p3 }
  0xe6   : > { %p8812_p11 = pmov %p8808_p3 }
  0xe7   : > { %7638 = vsyncadd (%p8811_p10), [#allocation9], 4294966240 }
  0xe8   : > { %7640 = dma.done.wait (%p8812_p11), [#allocation12], 1056   ;;  %p8813_p7 = pmov %p8808_p3 }
  0xe9   : > { %p8814_p12 = pmov %p8808_p3 }
  0xea   : > { %7642 = vsyncadd (%p8813_p7), [#allocation12], 4294966240 }
  0xeb   : > { %7644 = dma.done.wait (%p8814_p12), [#allocation15], 1056   ;;  %p8815_p5 = pmov %p8808_p3 }
  0xec   : > { %p8816_p2 = pmov %p8808_p3 }
  0xed   : > { %7646 = vsyncadd (%p8815_p5), [#allocation15], 4294966240 }
  0xee   : > { %7648 = dma.done.wait (%p8816_p2), [#allocation18], 1056   ;;  %p8817_p8 = pmov %p8816_p2 }
  0xef   : > { %p8818_p9 = pmov %p8816_p2 }
  0xf0   : > { %7650 = vsyncadd (%p8817_p8), [#allocation18], 4294966240 }
  0xf1   : > { %7652 = dma.done.wait (%p8818_p9), [#allocation21], 64   ;;  %p8819_p0 = pmov %p8816_p2 }
  0xf2   : > { %p869_p13 = scmp.lt.s32.totalorder %s7829_s29, 1  ;;  %s8820_s0 = sld [smem:[#allocation32_spill]]  ;;  %vm913_vm0 = vcmask 261120   ;;  %v879_v2 = vld [vmem:[%s755_s3] sm:$0x1]  ;;  %v900_v17 = vld [vmem:[%s8748_s19 + $0x38] sm:$0xff]  ;;  %v903_v35 = vlaneseq }
  0xf3   : > { %7654 = vsyncadd (%p8819_p0), [#allocation21], 4294967232  ;;  %v881_v3 = vand.u32 2147483647, %v879_v2  ;;  %v880_v14 = vmax.f32 %v879_v2, 0.0  ;;  %v899_v18 = vld [vmem:[%s8748_s19 + $0x30] sm:$0xff]  ;;  %941 = vmatprep.subr.mxu1 %v900_v17 }
  0xf4   : > { %s8086_s9 = scalar_select %p869_p13, %s7829_s29, 1  ;;  %v898_v19 = vld [vmem:[%s8748_s19 + $0x28] sm:$0xff]  ;;  %v897_v20 = vld [vmem:[%s8748_s19 + $0x20] sm:$0xff]  ;;  %v7692_v21 = vmov 0.0   ;;  %942 = vmatpush1.msra.mxu1 %v899_v18  ;;  %v896_v22 = vld [vmem:[%s8748_s19 + $0x18] sm:$0xff]  ;;  %vm7693_vm1 = vmmov 0  }
  0xf5   : > { %v882_v4 = vsub.f32 0.0, %v881_v3  ;;  %981 = vmatprep.mubr.f32.mxu1 %v7692_v21  ;;  %6663 = vmatprep.subr.mxu0 %v7692_v21  ;;  %v895_v23 = vld [vmem:[%s8748_s19 + $0x10] sm:$0xff]  ;;  %v894_v24 = vld [vmem:[%s8748_s19 + $0x8] sm:$0xff]  ;;  %v893_v25 = vld [vmem:[%s8748_s19] sm:$0xff]  ;;  %s8821_s23 = sld [smem:[#allocation37_spill]]  ;;  %v8151_v36 = vshrl.u32 %v903_v35, 7 }
  0xf6   : > { %s6403_s10 = sshll.u32 %s8086_s9, 3  ;;  %943 = vmatprep.subr.mxu1 %v898_v19  ;;  %6665 = vmatprep.mubr.msk.f32.mxu0 %vm7693_vm1, %v7692_v21  ;;  %s8822_s5 = sld [smem:[#allocation35_spill]]  ;;  %v6406_v48 = vld [vmem:[#allocation5] ss:$0 sm:$0xff]  ;;  %vm1327_vm2 = vcmask 64512   ;;  %vm3428_vm3 = vcmask 523264  }
  0xf7   : > { %v883_v5 = vmul.f32 1.442695, %v882_v4  ;;  %944 = vmatpush1.msra.mxu1 %v897_v20  ;;  %v8154_v37 = vsub.s32 0, %v8151_v36  ;;  %s8823_s24 = sld [smem:[#allocation36_spill]]  ;;  %s8766_s22 = smov 96  }
  0xf8   : > { %s872_s6 = scalar_lea.vmem %s8820_s0, %s6403_s10  ;;  %945 = vmatprep.subr.mxu1 %v896_v22  ;;  %s8764_s12 = smov 64  }
  0xf9   : > { %v8094_v0 = vld [vmem:[%s872_s6] sm:$0xff]  ;;  %7158 = vpow2.f32 %v883_v5  ;;  %946 = vmatpush1.msra.mxu1 %v895_v23  ;;  %s8824_s6 = sld [smem:[#allocation33_spill]]  ;;  %s8763_s9 = smov 32  }
  0xfa   : > { %v988_v1 = vsel %vm913_vm0, %v8094_v0, 0.0  ;;  %947 = vmatprep.subr.mxu1 %v894_v24  ;;  %s8825_s21 = sld [smem:[#allocation47_spill]]  ;;  %s6155_s14 = scalar_lea.sflag [#allocation4], %s8052_s11 }
  0xfb   : > { %989 = vadd.xlane.f32.xlu0 %v988_v1  ;;  %948 = vmatpush1.msra.mxu1 %v893_v25  ;;  %v1015_v28 = vld [vmem:[%s8821_s23 + $0x18] sm:$0xff]  ;;  %v1014_v29 = vld [vmem:[%s8821_s23 + $0x10] sm:$0xff]  ;;  %v1013_v30 = vld [vmem:[%s8821_s23 + $0x8] sm:$0xff]  ;;  %s8829_s3 = sld [smem:[#allocation48_spill]]  ;;  %p8830_p3 = scmp.ne.s32.totalorder %s8802_s17, 0 }
  0xfc   : > { %6652 = vmatprep.subr.mxu1 %v7692_v21  ;;  %v1012_v31 = vld [vmem:[%s8821_s23] sm:$0xff] }
  0xfd   : > { %v8159_v38 = vld [vmem:[%s8822_s5] sm:$0x7] }
  0xfe   : > { %v8164_v39 = vld [vmem:[%s8823_s24] sm:$0x7]  ;;  %v1005_v40 = vrot.slane %v8159_v38, %v8154_v37 }
  0xff   : > { %v1010_v43 = vrot.slane %v8164_v39, %v8154_v37  ;;  %s8263_s8 = scalar_lea.vmem %s8824_s6, %s6403_s10  ;;  %s8826_s6 = smov 96  }
 0x100   : > { %s8827_s10 = smov 64  }
 0x106   : > { %v7159_v6 = vpop.eup %7158 }
 0x107   : > { %v885_v7 = vadd.f32 1.0, %v7159_v6 }
 0x109   : > { %7160 = vlog2.f32 %v885_v7 }
 0x116   : > { %v7161_v13 = vpop.eup %7160 }
 0x117   : > { %v887_v15 = vmul.f32 0.6931472, %v7161_v13 }
 0x119   : > { %v888_v16 = vadd.f32 %v887_v15, %v880_v14 }
 0x11b   : > { %7162 = vtanh.f32 %v888_v16 }
 0x128   : > { %v7163_v26 = vpop.eup %7162 }
 0x129   : > { %v8128_v27 = vmul.f32 %v7163_v26, %v879_v2 }
 0x12b   : > { %6405 = vmatmul.mubr.msk.f32.vlgmr.msra.gmra.mxu1 %vm913_vm0, %v8128_v27 }
 0x12c   : > { %6653 = vmatpush3.msra.mxu1 %v1015_v28  ;;  %6660 = vmatprep.mubr.msk.f32.mxu1 %vm7693_vm1, %v7692_v21 }
 0x12d   : > { %6654 = vmatprep.subr.mxu1 %v7692_v21 }
 0x12e   : > { %6655 = vmatpush3.msra.mxu1 %v1014_v29 }
 0x12f   : > { %6656 = vmatprep.subr.mxu1 %v7692_v21 }
 0x130   : > { %6657 = vmatpush3.msra.mxu1 %v1013_v30 }
 0x131   : > { %6658 = vmatprep.subr.mxu1 %v7692_v21 }
 0x132   : > { %6659 = vmatpush3.msra.mxu1 %v1012_v31 }
 0x133   : > { %6668 = vmatprep.subr.mxu1 %v7692_v21 }
 0x184   : > { %v990_v8 = vpop.xlane.xlu0 %989 }
 0x185   : > { %v992_v9 = vmul.f32 0.03125, %v990_v8 }
 0x187   : > { %v993_v10 = vsub.f32 %v8094_v0, %v992_v9 }
 0x189   : > { %v994_v11 = vmul.f32 %v993_v10, %v993_v10 }
 0x18b   : > { %v995_v12 = vsel %vm913_vm0, %v994_v11, 0.0 }
 0x18c   : > { %996 = vadd.xlane.f32.xlu0 %v995_v12 }
 0x1eb   : > { %v8173_v46 = vpop.f32.mrf.mxu1 }
 0x1ed   : > { %v8175_v47 = vpop.f32.mrf.mxu1 }
 0x215   : > { %v997_v32 = vpop.xlane.xlu0 %996 }
 0x216   : > { %v998_v33 = vmul.f32 0.03125, %v997_v32 }
 0x218   : > { %v999_v34 = vadd.f32 1e-05, %v998_v33 }
 0x21a   : > { %7164 = vrsqrt.f32 %v999_v34 }
 0x227   : > { %v7165_v41 = vpop.eup %7164 }
 0x228   : > { %v1001_v42 = vmul.f32 %v7165_v41, %v993_v10 }
 0x22a   : > { %v1006_v44 = vmul.f32 %v1005_v40, %v1001_v42 }
 0x22c   : > { %v1011_v45 = vadd.f32 %v1010_v43, %v1006_v44 }
 0x22e   : > { %6661 = vmatmul.mubr.msk.f32.vlgmr.msra.gmra.mxu1 %vm913_vm0, %v1011_v45 }
 0x22f   : > { %6670 = vmatprep.mubr.msk.f32.mxu1 %vm7693_vm1, %v7692_v21 }
 0x2ee   : > { %v1092_v49 = vpop.f32.mrf.mxu1 }
 0x2ef   : > { %v1093_v50 = vadd.f32 %v6406_v48, %v1092_v49 }
 0x2f0   : > { %v6662_v51 = vpop.f32.mrf.mxu1 }
 0x2f1   : > { %1257 = vrot.lane.b32.xlu1 %v1093_v50, %s8766_s22 }
 0x31a   : > { %1096 = vxpose.xlu1.b32.start.end [1/1] (short) (narrow) %v1093_v50, 32 }
 0x363   : > { %v1258_v52 = vpop.permute.xlu1 %1257 }
 0x364   : > { %1260 = vxpose.xlu0.b32.start.end [1/1] (short) (narrow) %v1258_v52, 32 }
 0x396   : > { %v1112_v53 = vpop.trf.xlu1 }
 0x397   : > { %1128 = vxpose.xlu1.b32.start.end [1/1] (short) (narrow) %v1112_v53, 8 }
 0x39a   : > { %v1113_v54 = vpop.trf.xlu1 }
 0x39b   : > { %1160 = vxpose.xlu0.b32.start.end [1/1] (short) (narrow) %v1113_v54, 8 }
 0x39e   : > { %v1114_v55 = vpop.trf.xlu1 }
 0x39f   : > { %1192 = vxpose.xlu1.b32.start.end [1/1] (short) (narrow) %v1114_v55, 8 }
 0x3a2   : > { %v1115_v56 = vpop.trf.xlu1 }
 0x3a3   : > { %1224 = vxpose.xlu1.b32.start.end [1/1] (short) (narrow) %v1115_v56, 8 }
 0x3e0   : > { %v1276_v57 = vpop.trf.xlu0 }
 0x3e1   : > { %6664 = vmatpush3.msra.mxu0 %v1276_v57 }
 0x3e2   : > { %6673 = vmatprep.subr.mxu0 %v7692_v21 }
 0x3e4   : > { %v1277_v58 = vpop.trf.xlu0 }
 0x3e5   : > { %6669 = vmatpush3.msra.mxu1 %v1277_v58 }
 0x3e6   : > { %6678 = vmatprep.subr.mxu1 %v7692_v21 }
 0x3e8   : > { %v1278_v59 = vpop.trf.xlu0 }
 0x3ec   : > { %v1279_v60 = vpop.trf.xlu0 }
 0x413   : > { %v1144_v61 = vpop.trf.xlu1 }
 0x414   : > { %6666 = vmatmul.mubr.msk.f32.vlgmr.msra.gmra.mxu0 %vm1327_vm2, %v1144_v61 }
 0x415   : > { %6674 = vmatpush3.msra.mxu0 %v1278_v59  ;;  %6675 = vmatprep.mubr.msk.f32.mxu0 %vm7693_vm1, %v7692_v21 }
 0x416   : > { %6683 = vmatprep.subr.mxu0 %v7692_v21 }
 0x417   : > { %v1176_v62 = vpop.trf.xlu0 }
 0x418   : > { %6671 = vmatmul.mubr.msk.f32.vlgmr.msra.gmra.mxu1 %vm1327_vm2, %v1176_v62 }
 0x419   : > { %6679 = vmatpush3.msra.mxu1 %v1279_v60  ;;  %6680 = vmatprep.mubr.msk.f32.mxu1 %vm7693_vm1, %v7692_v21 }
 0x41a   : > { %6688 = vmatprep.subr.mxu1 %v7692_v21 }
 0x41b   : > { %v1208_v63 = vpop.trf.xlu1 }
 0x41c   : > { %6676 = vmatmul.mubr.msk.f32.vlgmr.msra.gmra.mxu0 %vm1327_vm2, %v1208_v63  ;;  %v2007_v63 = vld [vmem:[#allocation7 + $0x18] sm:$0xff] }
 0x41d   : > { %6685 = vmatprep.mubr.msk.f32.mxu0 %vm7693_vm1, %v7692_v21 }
 0x41f   : > { %v1240_v1 = vpop.trf.xlu1 }
 0x420   : > { %6681 = vmatmul.mubr.msk.f32.vlgmr.msra.gmra.mxu1 %vm1327_vm2, %v1240_v1  ;;  %v2006_v1 = vld [vmem:[#allocation7 + $0x10] sm:$0xff] }
 0x421   : > { %6690 = vmatprep.mubr.msk.f32.mxu1 %vm7693_vm1, %v7692_v21 }
 0x4d4   : > { %v1397_v2 = vpop.f32.mrf.mxu0 }
 0x4d5   : > { %v1620_v3 = vmul.f32 0.35355338, %v1397_v2  ;;  %v2005_v2 = vld [vmem:[#allocation7 + $0x8] sm:$0xff] }
 0x4d6   : > { %v6667_v4 = vpop.f32.mrf.mxu0 }
 0x4d7   : > { %v1624_v5 = vsel %vm1327_vm2, %v1620_v3, -inf }
 0x4d8   : > { %1625 = vmax.xlane.f32.xlu0 %v1624_v5  ;;  %v1470_v6 = vpop.f32.mrf.mxu1 }
 0x4d9   : > { %v1621_v7 = vmul.f32 0.35355338, %v1470_v6 }
 0x4da   : > { %v6672_v8 = vpop.f32.mrf.mxu1 }
 0x4db   : > { %v1627_v9 = vsel %vm1327_vm2, %v1621_v7, -inf }
 0x4dc   : > { %v1543_v10 = vpop.f32.mrf.mxu0  ;;  %1628 = vmax.xlane.f32.xlu1 %v1627_v9 }
 0x4dd   : > { %v1622_v11 = vmul.f32 0.35355338, %v1543_v10 }
 0x4de   : > { %v6677_v12 = vpop.f32.mrf.mxu0 }
 0x4df   : > { %v1630_v13 = vsel %vm1327_vm2, %v1622_v11, -inf  ;;  %v8230_v12 = vld [vmem:[%s8749_s20] sm:$0x3] }
 0x4e0   : > { %1631 = vmax.xlane.f32.xlu1 %v1630_v13  ;;  %v1616_v14 = vpop.f32.mrf.mxu1  ;;  %v906_v13 = vrot.slane %v8230_v12, %v8154_v37 }
 0x4e1   : > { %v1623_v15 = vmul.f32 0.35355338, %v1616_v14 }
 0x4e2   : > { %v6682_v16 = vpop.f32.mrf.mxu1  ;;  %v984_v14 = vadd.f32 %v8173_v46, %v906_v13 }
 0x4e3   : > { %v1633_v17 = vsel %vm1327_vm2, %v1623_v15, -inf }
 0x4e4   : > { %1634 = vmax.xlane.f32.xlu1 %v1633_v17  ;;  %v2088_v17 = vadd.f32 1.0, %v984_v14 }
 0x4ee   : > { %1292 = vrot.lane.b32.xlu0 %v1093_v50, %s8764_s12 }
 0x561   : > { %v1626_v18 = vpop.xlane.xlu0 %1625 }
 0x562   : > { %v1636_v19 = vsub.f32 %v1620_v3, %v1626_v18  ;;  %v2004_v3 = vld [vmem:[#allocation7] sm:$0xff] }
 0x563   : > { %v6420_v18 = vld [vmem:[#allocation8] ss:$0 sm:$0xff] }
 0x564   : > { %v1640_v20 = vmul.f32 1.442695, %v1636_v19 }
 0x565   : > { %v1629_v22 = vpop.xlane.xlu1 %1628  ;;  %v1293_v44 = vpop.permute.xlu0 %1292 }
 0x566   : > { %7166 = vpow2.f32 %v1640_v20  ;;  %v1637_v23 = vsub.f32 %v1621_v7, %v1629_v22  ;;  %v8244_v22 = vrot.slane %v2088_v17, %v8154_v37 }
 0x568   : > { %v1642_v24 = vmul.f32 1.442695, %v1637_v23 }
 0x569   : > { %v1632_v25 = vpop.xlane.xlu1 %1631 }
 0x56a   : > { %7168 = vpow2.f32 %v1642_v24  ;;  %v1638_v26 = vsub.f32 %v1622_v11, %v1632_v25 }
 0x56c   : > { %v1644_v28 = vmul.f32 1.442695, %v1638_v26 }
 0x56d   : > { %v1635_v29 = vpop.xlane.xlu1 %1634 }
 0x56e   : > { %7170 = vpow2.f32 %v1644_v28  ;;  %v1639_v30 = vsub.f32 %v1623_v15, %v1635_v29  ;;  %v8236_v15 = vrot.slane %v984_v14, %v8154_v37 }
 0x570   : > { %v1646_v31 = vmul.f32 1.442695, %v1639_v30 }
 0x572   : > { %7172 = vpow2.f32 %v1646_v31 }
 0x573   : > { %v7167_v32 = vpop.eup %7166 }
 0x574   : > { %v1648_v33 = vsel %vm1327_vm2, %v7167_v32, 0.0 }
 0x575   : > { %1649 = vadd.xlane.f32.xlu1 %v1648_v33 }
 0x577   : > { %v7169_v34 = vpop.eup %7168 }
 0x578   : > { %v1651_v35 = vsel %vm1327_vm2, %v7169_v34, 0.0 }
 0x579   : > { %1652 = vadd.xlane.f32.xlu1 %v1651_v35  ;;  %v2129_v35 = vld [vmem:[#allocation10 + $0x10] sm:$0xff] }
 0x57b   : > { %v7171_v40 = vpop.eup %7170 }
 0x57c   : > { %v1654_v41 = vsel %vm1327_vm2, %v7171_v40, 0.0 }
 0x57d   : > { %1655 = vadd.xlane.f32.xlu1 %v1654_v41  ;;  %v2214_v41 = vld [vmem:[#allocation13 + $0x18] sm:$0xff] }
 0x57f   : > { %v7173_v42 = vpop.eup %7172 }
 0x580   : > { %v1657_v43 = vsel %vm1327_vm2, %v7173_v42, 0.0 }
 0x581   : > { %1658 = vadd.xlane.f32.xlu1 %v1657_v43  ;;  %v2212_v43 = vld [vmem:[#allocation13 + $0x8] sm:$0xff] }
 0x5b4   : > { %1295 = vxpose.xlu1.b32.start.end [1/1] (short) (narrow) %v1293_v44, 32  ;;  %v2211_v44 = vld [vmem:[#allocation13] sm:$0xff] }
 0x5fe   : > { %v1650_v45 = vpop.xlane.xlu1 %1649 }
 0x5ff   : > { %7174 = vrcp.f32 %v1650_v45  ;;  %v878_v45 = vld [vmem:[%s8263_s8] sm:$0xff] }
 0x602   : > { %v1653_v48 = vpop.xlane.xlu1 %1652 }
 0x603   : > { %7176 = vrcp.f32 %v1653_v48 }
 0x606   : > { %v1656_v53 = vpop.xlane.xlu1 %1655 }
 0x607   : > { %7178 = vrcp.f32 %v1656_v53 }
 0x60a   : > { %v1659_v54 = vpop.xlane.xlu1 %1658 }
 0x60b   : > { %7180 = vrcp.f32 %v1659_v54 }
 0x60c   : > { %v7175_v49 = vpop.eup %7174 }
 0x60d   : > { %v1664_v50 = vmul.f32 %v7175_v49, %v7167_v32 }
 0x60f   : > { %6684 = vmatpush3.xpose.msk.msra.mxu0 %vm1327_vm2, %v1664_v50 }
 0x610   : > { %v7177_v51 = vpop.eup %7176  ;;  %6693 = vmatprep.subr.mxu0 %v7692_v21 }
 0x611   : > { %v1665_v52 = vmul.f32 %v7177_v51, %v7169_v34  ;;  %v2130_v34 = vld [vmem:[#allocation10 + $0x18] sm:$0xff]  ;;  %v8274_v51 = vsub.s32 1, %v8151_v36 }
 0x613   : > { %6689 = vmatpush3.xpose.msk.msra.mxu1 %vm1327_vm2, %v1665_v52  ;;  %v2120_v52 = vrot.slane %v8159_v38, %v8274_v51 }
 0x614   : > { %6698 = vmatprep.subr.mxu1 %v7692_v21  ;;  %v7179_v55 = vpop.eup %7178 }
 0x615   : > { %v1666_v57 = vmul.f32 %v7179_v55, %v7171_v40  ;;  %v2127_v40 = vld [vmem:[#allocation10] sm:$0xff]  ;;  %v2125_v55 = vrot.slane %v8164_v39, %v8274_v51 }
 0x618   : > { %v7181_v58 = vpop.eup %7180 }
 0x619   : > { %v1667_v60 = vmul.f32 %v7181_v58, %v7173_v42  ;;  %v2213_v42 = vld [vmem:[#allocation13 + $0x10] sm:$0xff]  ;;  %v6424_v58 = vld [vmem:[#allocation14] ss:$0 sm:$0xff] }
 0x630   : > { %v1311_v56 = vpop.trf.xlu1 }
 0x631   : > { %6686 = vmatmul.mubr.msk.f32.vlgmr.msra.gmra.mxu0 %vm1327_vm2, %v1311_v56 }
 0x632   : > { %6694 = vmatpush3.xpose.msk.msra.mxu0 %vm1327_vm2, %v1666_v57  ;;  %6695 = vmatprep.mubr.msk.f32.mxu0 %vm7693_vm1, %v7692_v21 }
 0x633   : > { %6703 = vmatprep.subr.mxu0 %v7692_v21 }
 0x634   : > { %v1312_v59 = vpop.trf.xlu1 }
 0x635   : > { %6691 = vmatmul.mubr.msk.f32.vlgmr.msra.gmra.mxu1 %vm1327_vm2, %v1312_v59 }
 0x636   : > { %6699 = vmatpush3.xpose.msk.msra.mxu1 %vm1327_vm2, %v1667_v60  ;;  %6700 = vmatprep.mubr.msk.f32.mxu1 %vm7693_vm1, %v7692_v21 }
 0x637   : > { %6714 = vmatprep.subr.mxu1 %v7692_v21 }
 0x638   : > { %v1313_v61 = vpop.trf.xlu1 }
 0x639   : > { %6696 = vmatmul.mubr.msk.f32.vlgmr.msra.gmra.mxu0 %vm1327_vm2, %v1313_v61 }
 0x63a   : > { %6711 = vmatprep.mubr.msk.f32.mxu0 %vm7693_vm1, %v7692_v21  ;;  %6704 = vmatpush3.msra.mxu0 %v2007_v63 }
 0x63b   : > { %6705 = vmatprep.subr.mxu0 %v7692_v21 }
 0x63c   : > { %v1314_v62 = vpop.trf.xlu1  ;;  %6706 = vmatpush3.msra.mxu0 %v2006_v1 }
 0x63d   : > { %6701 = vmatmul.mubr.msk.f32.vlgmr.msra.gmra.mxu1 %vm1327_vm2, %v1314_v62  ;;  %6707 = vmatprep.subr.mxu0 %v7692_v21  ;;  %v6422_v62 = vld [vmem:[#allocation11] ss:$0 sm:$0xff] }
 0x63e   : > { %6722 = vmatprep.mubr.msk.f32.mxu1 %vm7693_vm1, %v7692_v21  ;;  %6708 = vmatpush3.msra.mxu0 %v2005_v2 }
 0x63f   : > { %6709 = vmatprep.subr.mxu0 %v7692_v21  ;;  %6715 = vmatpush3.msra.mxu1 %v2130_v34 }
 0x640   : > { %6710 = vmatpush3.msra.mxu0 %v2004_v3  ;;  %6716 = vmatprep.subr.mxu1 %v7692_v21 }
 0x641   : > { %6725 = vmatprep.subr.mxu0 %v7692_v21  ;;  %6717 = vmatpush3.msra.mxu1 %v2129_v35 }
 0x642   : > { %6718 = vmatprep.subr.mxu1 %v7692_v21 }
 0x6f1   : > { %v1740_v4 = vpop.f32.mrf.mxu0 }
 0x6f2   : > { %1972 = vxpose.xlu0.b32.start [1/4] (short) (narrow) %v1740_v4, 8 }
 0x6f3   : > { %v6687_v5 = vpop.f32.mrf.mxu0 }
 0x6f5   : > { %v1816_v6 = vpop.f32.mrf.mxu1 }
 0x6f6   : > { %1973 = vxpose.xlu0.b32.cont [2/4] (short) (narrow) %v1816_v6, 8 }
 0x6f7   : > { %v6692_v7 = vpop.f32.mrf.mxu1 }
 0x6f9   : > { %v1892_v8 = vpop.f32.mrf.mxu0 }
 0x6fa   : > { %1974 = vxpose.xlu0.b32.cont [3/4] (short) (narrow) %v1892_v8, 8 }
 0x6fb   : > { %v6697_v9 = vpop.f32.mrf.mxu0 }
 0x6fd   : > { %v1968_v10 = vpop.f32.mrf.mxu1 }
 0x6fe   : > { %1975 = vxpose.xlu0.b32.end [4/4] (short) (narrow) %v1968_v10, 8 }
 0x6ff   : > { %v6702_v11 = vpop.f32.mrf.mxu1 }
 0x727   : > { %2100 = vrot.lane.b32.xlu0 %v8236_v15, %s8766_s22 }
 0x76e   : > { %v1988_v16 = vpop.trf.xlu0 }
 0x76f   : > { %6712 = vmatmul.mubr.msk.f32.vlgmr.msra.gmra.mxu0 %vm913_vm0, %v1988_v16 }
 0x770   : > { %6733 = vmatprep.mubr.msk.f32.mxu0 %vm7693_vm1, %v7692_v21  ;;  %6726 = vmatpush3.msra.mxu0 %v2214_v41 }
 0x771   : > { %6727 = vmatprep.subr.mxu0 %v7692_v21 }
 0x772   : > { %6728 = vmatpush3.msra.mxu0 %v2213_v42 }
 0x773   : > { %6729 = vmatprep.subr.mxu0 %v7692_v21 }
 0x774   : > { %6730 = vmatpush3.msra.mxu0 %v2212_v43 }
 0x775   : > { %6731 = vmatprep.subr.mxu0 %v7692_v21 }
 0x776   : > { %6732 = vmatpush3.msra.mxu0 %v2211_v44 }
 0x777   : > { %6734 = vmatmul.mubr.msk.f32.vlgmr.msra.gmra.mxu0 %vm913_vm0, %v878_v45  ;;  %6746 = vmatprep.subr.mxu0 %v7692_v21 }
 0x778   : > { %6748 = vmatprep.mubr.msk.f32.mxu0 %vm7693_vm1, %v7692_v21 }
 0x799   : > { %v2101_v25 = vpop.permute.xlu0 %2100 }
 0x82f   : > { %v2084_v19 = vpop.f32.mrf.mxu0 }
 0x830   : > { %v2085_v20 = vadd.f32 %v6420_v18, %v2084_v19 }
 0x831   : > { %v6713_v46 = vpop.f32.mrf.mxu0 }
 0x832   : > { %v2093_v23 = vmul.f32 %v8244_v22, %v2085_v20 }
 0x834   : > { %v2094_v24 = vadd.f32 %v2093_v23, %v8094_v0  ;;  %v2128_v0 = vld [vmem:[#allocation10 + $0x8] sm:$0xff] }
 0x835   : > { %6719 = vmatpush3.msra.mxu1 %v2128_v0 }
 0x836   : > { %v8248_v26 = vadd.f32 %v2101_v25, %v2094_v24  ;;  %6720 = vmatprep.subr.mxu1 %v7692_v21 }
 0x837   : > { %6721 = vmatpush3.msra.mxu1 %v2127_v40  ;;  %v2291_v59 = vpop.f32.mrf.mxu0 }
 0x838   : > { %v2104_v28 = vsel %vm913_vm0, %v8248_v26, 0.0  ;;  %6736 = vmatprep.subr.mxu1 %v7692_v21  ;;  %v2292_v60 = vadd.f32 %v6424_v58, %v2291_v59 }
 0x839   : > { %2105 = vadd.xlane.f32.xlu1 %v2104_v28  ;;  %v6735_v61 = vpop.f32.mrf.mxu0 }
 0x8c2   : > { %v2106_v29 = vpop.xlane.xlu1 %2105 }
 0x8c3   : > { %v2107_v30 = vmul.f32 0.03125, %v2106_v29 }
 0x8c5   : > { %v2108_v31 = vsub.f32 %v8248_v26, %v2107_v30 }
 0x8c7   : > { %v2109_v32 = vmul.f32 %v2108_v31, %v2108_v31 }
 0x8c9   : > { %v2110_v33 = vsel %vm913_vm0, %v2109_v32, 0.0 }
 0x8ca   : > { %2111 = vadd.xlane.f32.xlu0 %v2110_v33 }
 0x8f7   : > { %2455 = vxpose.xlu0.b32.start.end [1/1] (short) (narrow) %v2292_v60, 32 }
 0x953   : > { %v2112_v48 = vpop.xlane.xlu0 %2111 }
 0x954   : > { %v2113_v49 = vmul.f32 0.03125, %v2112_v48 }
 0x956   : > { %v2114_v50 = vadd.f32 1e-05, %v2113_v49 }
 0x958   : > { %7182 = vrsqrt.f32 %v2114_v50 }
 0x965   : > { %v7183_v53 = vpop.eup %7182 }
 0x966   : > { %v2116_v54 = vmul.f32 %v7183_v53, %v2108_v31 }
 0x968   : > { %v2121_v56 = vmul.f32 %v2120_v52, %v2116_v54 }
 0x96a   : > { %v2126_v57 = vadd.f32 %v2125_v55, %v2121_v56 }
 0x96c   : > { %6723 = vmatmul.mubr.msk.f32.vlgmr.msra.gmra.mxu1 %vm913_vm0, %v2126_v57 }
 0x96d   : > { %6738 = vmatprep.mubr.msk.f32.mxu1 %vm7693_vm1, %v7692_v21 }
 0x973   : > { %v2471_v3 = vpop.trf.xlu0 }
 0x974   : > { %6737 = vmatpush3.msra.mxu1 %v2471_v3 }
 0x975   : > { %6741 = vmatprep.subr.mxu1 %v7692_v21 }
 0x977   : > { %v2472_v4 = vpop.trf.xlu0 }
 0x97b   : > { %v2473_v5 = vpop.trf.xlu0 }
 0x97c   : > { %6747 = vmatpush3.msra.mxu0 %v2473_v5 }
 0x97d   : > { %6756 = vmatprep.subr.mxu0 %v7692_v21 }
 0x97f   : > { %v2474_v10 = vpop.trf.xlu0 }
 0xa2c   : > { %v2207_v63 = vpop.f32.mrf.mxu1 }
 0xa2d   : > { %v2208_v1 = vadd.f32 %v6422_v62, %v2207_v63 }
 0xa2e   : > { %v6724_v2 = vpop.f32.mrf.mxu1 }
 0xa2f   : > { %2295 = vxpose.xlu1.b32.start.end [1/1] (short) (narrow) %v2208_v1, 32 }
 0xaab   : > { %v2311_v6 = vpop.trf.xlu1 }
 0xaac   : > { %2327 = vxpose.xlu1.b32.start.end [1/1] (short) (narrow) %v2311_v6, 8 }
 0xaaf   : > { %v2312_v7 = vpop.trf.xlu1 }
 0xab0   : > { %2359 = vxpose.xlu0.b32.start.end [1/1] (short) (narrow) %v2312_v7, 8 }
 0xab3   : > { %v2313_v8 = vpop.trf.xlu1 }
 0xab4   : > { %2391 = vxpose.xlu1.b32.start.end [1/1] (short) (narrow) %v2313_v8, 8 }
 0xab7   : > { %v2314_v9 = vpop.trf.xlu1 }
 0xab8   : > { %2423 = vxpose.xlu1.b32.start.end [1/1] (short) (narrow) %v2314_v9, 8 }
 0xb28   : > { %v2343_v11 = vpop.trf.xlu1 }
 0xb29   : > { %6739 = vmatmul.mubr.msk.f32.vlgmr.msra.gmra.mxu1 %vm1327_vm2, %v2343_v11 }
 0xb2a   : > { %6742 = vmatpush3.msra.mxu1 %v2472_v4  ;;  %6743 = vmatprep.mubr.msk.f32.mxu1 %vm7693_vm1, %v7692_v21 }
 0xb2b   : > { %6751 = vmatprep.subr.mxu1 %v7692_v21 }
 0xb2c   : > { %v2375_v13 = vpop.trf.xlu0 }
 0xb2d   : > { %6744 = vmatmul.mubr.msk.f32.vlgmr.msra.gmra.mxu1 %vm1327_vm2, %v2375_v13 }
 0xb2e   : > { %6752 = vmatpush3.msra.mxu1 %v2474_v10  ;;  %6753 = vmatprep.mubr.msk.f32.mxu1 %vm7693_vm1, %v7692_v21 }
 0xb2f   : > { %6761 = vmatprep.subr.mxu1 %v7692_v21 }
 0xb30   : > { %v2407_v14 = vpop.trf.xlu1 }
 0xb31   : > { %6749 = vmatmul.mubr.msk.f32.vlgmr.msra.gmra.mxu0 %vm1327_vm2, %v2407_v14 }
 0xb32   : > { %6758 = vmatprep.mubr.msk.f32.mxu0 %vm7693_vm1, %v7692_v21 }
 0xb34   : > { %v2439_v16 = vpop.trf.xlu1 }
 0xb35   : > { %6754 = vmatmul.mubr.msk.f32.vlgmr.msra.gmra.mxu1 %vm1327_vm2, %v2439_v16 }
 0xb36   : > { %6763 = vmatprep.mubr.msk.f32.mxu1 %vm7693_vm1, %v7692_v21 }
 0xbe9   : > { %v2592_v17 = vpop.f32.mrf.mxu1 }
 0xbea   : > { %v2815_v18 = vmul.f32 0.35355338, %v2592_v17 }
 0xbeb   : > { %v6740_v19 = vpop.f32.mrf.mxu1 }
 0xbec   : > { %v2819_v20 = vsel %vm1327_vm2, %v2815_v18, -inf  ;;  %v3201_v19 = vld [vmem:[#allocation16 + $0x10] sm:$0xff] }
 0xbed   : > { %2820 = vmax.xlane.f32.xlu1 %v2819_v20  ;;  %v2665_v46 = vpop.f32.mrf.mxu1  ;;  %v3200_v20 = vld [vmem:[#allocation16 + $0x8] sm:$0xff] }
 0xbee   : > { %v2816_v23 = vmul.f32 0.35355338, %v2665_v46  ;;  %v3199_v46 = vld [vmem:[#allocation16] sm:$0xff] }
 0xbef   : > { %v6745_v24 = vpop.f32.mrf.mxu1 }
 0xbf0   : > { %v2822_v25 = vsel %vm1327_vm2, %v2816_v23, -inf }
 0xbf1   : > { %v2738_v28 = vpop.f32.mrf.mxu0  ;;  %2823 = vmax.xlane.f32.xlu0 %v2822_v25 }
 0xbf2   : > { %v2817_v29 = vmul.f32 0.35355338, %v2738_v28 }
 0xbf3   : > { %v6750_v30 = vpop.f32.mrf.mxu0 }
 0xbf4   : > { %v2825_v31 = vsel %vm1327_vm2, %v2817_v29, -inf }
 0xbf5   : > { %2826 = vmax.xlane.f32.xlu1 %v2825_v31  ;;  %v2811_v32 = vpop.f32.mrf.mxu1 }
 0xbf6   : > { %v2818_v33 = vmul.f32 0.35355338, %v2811_v32 }
 0xbf7   : > { %v6755_v34 = vpop.f32.mrf.mxu1 }
 0xbf8   : > { %v2828_v35 = vsel %vm1327_vm2, %v2818_v33, -inf  ;;  %v6438_v34 = vld [vmem:[#allocation17] ss:$0 sm:$0xff] }
 0xbf9   : > { %2829 = vmax.xlane.f32.xlu1 %v2828_v35 }
 0xc07   : > { %2488 = vrot.lane.b32.xlu0 %v2292_v60, %s8766_s22 }
 0xc76   : > { %v2821_v0 = vpop.xlane.xlu1 %2820 }
 0xc77   : > { %v2831_v40 = vsub.f32 %v2815_v18, %v2821_v0  ;;  %v3202_v18 = vld [vmem:[#allocation16 + $0x18] sm:$0xff] }
 0xc79   : > { %v2835_v41 = vmul.f32 1.442695, %v2831_v40 }
 0xc7a   : > { %v2824_v42 = vpop.xlane.xlu0 %2823 }
 0xc7b   : > { %7184 = vpow2.f32 %v2835_v41  ;;  %v2832_v43 = vsub.f32 %v2816_v23, %v2824_v42 }
 0xc7d   : > { %v2837_v44 = vmul.f32 1.442695, %v2832_v43 }
 0xc7e   : > { %v2827_v45 = vpop.xlane.xlu1 %2826  ;;  %v2489_v62 = vpop.permute.xlu0 %2488 }
 0xc7f   : > { %7186 = vpow2.f32 %v2837_v44  ;;  %v2833_v48 = vsub.f32 %v2817_v29, %v2827_v45 }
 0xc81   : > { %v2839_v49 = vmul.f32 1.442695, %v2833_v48 }
 0xc82   : > { %v2830_v50 = vpop.xlane.xlu1 %2829 }
 0xc83   : > { %7188 = vpow2.f32 %v2839_v49  ;;  %v2834_v52 = vsub.f32 %v2818_v33, %v2830_v50  ;;  %v910_v50 = vrot.slane %v8230_v12, %v8274_v51  ;;  %v3320_v12 = vld [vmem:[#allocation19] sm:$0xff] }
 0xc85   : > { %v2841_v53 = vmul.f32 1.442695, %v2834_v52 }
 0xc87   : > { %7190 = vpow2.f32 %v2841_v53 }
 0xc88   : > { %v7185_v54 = vpop.eup %7184 }
 0xc89   : > { %v2843_v55 = vsel %vm1327_vm2, %v7185_v54, 0.0 }
 0xc8a   : > { %2844 = vadd.xlane.f32.xlu1 %v2843_v55 }
 0xc8c   : > { %v7187_v56 = vpop.eup %7186 }
 0xc8d   : > { %v2846_v57 = vsel %vm1327_vm2, %v7187_v56, 0.0 }
 0xc8e   : > { %2847 = vadd.xlane.f32.xlu1 %v2846_v57  ;;  %v3322_v57 = vld [vmem:[#allocation19 + $0x10] sm:$0xff] }
 0xc90   : > { %v7189_v58 = vpop.eup %7188 }
 0xc91   : > { %v2849_v59 = vsel %vm1327_vm2, %v7189_v58, 0.0 }
 0xc92   : > { %2850 = vadd.xlane.f32.xlu1 %v2849_v59 }
 0xc94   : > { %v7191_v60 = vpop.eup %7190 }
 0xc95   : > { %v2852_v61 = vsel %vm1327_vm2, %v7191_v60, 0.0 }
 0xc96   : > { %2853 = vadd.xlane.f32.xlu1 %v2852_v61  ;;  %v8359_v61 = vsub.s32 2, %v8151_v36  ;;  %v3419_v36 = vld [vmem:[%s8825_s21 + $0x30] sm:$0xff] }
 0xcc9   : > { %2491 = vxpose.xlu1.b32.start.end [1/1] (short) (narrow) %v2489_v62, 32  ;;  %v3313_v62 = vrot.slane %v8159_v38, %v8359_v61  ;;  %v3418_v38 = vld [vmem:[%s8825_s21 + $0x28] sm:$0xff] }
 0xd13   : > { %v2845_v63 = vpop.xlane.xlu1 %2844 }
 0xd14   : > { %7192 = vrcp.f32 %v2845_v63 }
 0xd17   : > { %v2848_v1 = vpop.xlane.xlu1 %2847 }
 0xd18   : > { %7194 = vrcp.f32 %v2848_v1 }
 0xd1b   : > { %v2851_v6 = vpop.xlane.xlu1 %2850 }
 0xd1c   : > { %7196 = vrcp.f32 %v2851_v6  ;;  %v3416_v6 = vld [vmem:[%s8825_s21 + $0x18] sm:$0xff] }
 0xd1f   : > { %v2854_v7 = vpop.xlane.xlu1 %2853 }
 0xd20   : > { %7198 = vrcp.f32 %v2854_v7  ;;  %v3415_v7 = vld [vmem:[%s8825_s21 + $0x10] sm:$0xff] }
 0xd21   : > { %v7193_v2 = vpop.eup %7192 }
 0xd22   : > { %v2859_v3 = vmul.f32 %v7193_v2, %v7185_v54  ;;  %v3318_v2 = vrot.slane %v8164_v39, %v8359_v61  ;;  %v3417_v39 = vld [vmem:[%s8825_s21 + $0x20] sm:$0xff] }
 0xd24   : > { %6757 = vmatpush3.xpose.msk.msra.mxu0 %vm1327_vm2, %v2859_v3 }
 0xd25   : > { %v7195_v4 = vpop.eup %7194  ;;  %6766 = vmatprep.subr.mxu0 %v7692_v21 }
 0xd26   : > { %v2860_v5 = vmul.f32 %v7195_v4, %v7187_v56  ;;  %v3323_v56 = vld [vmem:[#allocation19 + $0x18] sm:$0xff] }
 0xd28   : > { %6762 = vmatpush3.xpose.msk.msra.mxu1 %vm1327_vm2, %v2860_v5  ;;  %v3420_v5 = vld [vmem:[%s8825_s21 + $0x38] sm:$0xff] }
 0xd29   : > { %6771 = vmatprep.subr.mxu1 %v7692_v21  ;;  %v7197_v8 = vpop.eup %7196 }
 0xd2a   : > { %v2861_v10 = vmul.f32 %v7197_v8, %v7189_v58  ;;  %v3414_v8 = vld [vmem:[%s8825_s21 + $0x8] sm:$0xff] }
 0xd2d   : > { %v7199_v11 = vpop.eup %7198 }
 0xd2e   : > { %v2862_v14 = vmul.f32 %v7199_v11, %v7191_v60 }
 0xd45   : > { %v2507_v9 = vpop.trf.xlu1 }
 0xd46   : > { %6759 = vmatmul.mubr.msk.f32.vlgmr.msra.gmra.mxu0 %vm1327_vm2, %v2507_v9  ;;  %v3413_v9 = vld [vmem:[%s8825_s21] sm:$0xff] }
 0xd47   : > { %6767 = vmatpush3.xpose.msk.msra.mxu0 %vm1327_vm2, %v2861_v10  ;;  %6768 = vmatprep.mubr.msk.f32.mxu0 %vm7693_vm1, %v7692_v21  ;;  %v6440_v10 = vld [vmem:[#allocation20] ss:$0 sm:$0xff] }
 0xd48   : > { %6776 = vmatprep.subr.mxu0 %v7692_v21 }
 0xd49   : > { %v2508_v13 = vpop.trf.xlu1 }
 0xd4a   : > { %6764 = vmatmul.mubr.msk.f32.vlgmr.msra.gmra.mxu1 %vm1327_vm2, %v2508_v13 }
 0xd4b   : > { %6772 = vmatpush3.xpose.msk.msra.mxu1 %vm1327_vm2, %v2862_v14  ;;  %6773 = vmatprep.mubr.msk.f32.mxu1 %vm7693_vm1, %v7692_v21 }
 0xd4c   : > { %6787 = vmatprep.subr.mxu1 %v7692_v21 }
 0xd4d   : > { %v2509_v16 = vpop.trf.xlu1 }
 0xd4e   : > { %6769 = vmatmul.mubr.msk.f32.vlgmr.msra.gmra.mxu0 %vm1327_vm2, %v2509_v16 }
 0xd4f   : > { %6784 = vmatprep.mubr.msk.f32.mxu0 %vm7693_vm1, %v7692_v21  ;;  %6777 = vmatpush3.msra.mxu0 %v3202_v18 }
 0xd50   : > { %6778 = vmatprep.subr.mxu0 %v7692_v21 }
 0xd51   : > { %v2510_v17 = vpop.trf.xlu1  ;;  %6779 = vmatpush3.msra.mxu0 %v3201_v19 }
 0xd52   : > { %6774 = vmatmul.mubr.msk.f32.vlgmr.msra.gmra.mxu1 %vm1327_vm2, %v2510_v17  ;;  %6780 = vmatprep.subr.mxu0 %v7692_v21 }
 0xd53   : > { %6795 = vmatprep.mubr.msk.f32.mxu1 %vm7693_vm1, %v7692_v21  ;;  %6781 = vmatpush3.msra.mxu0 %v3200_v20 }
 0xd54   : > { %6782 = vmatprep.subr.mxu0 %v7692_v21  ;;  %6788 = vmatpush3.msra.mxu1 %v3323_v56  ;;  %v6458_v56 = vld [vmem:[%s8821_s23 + $0x30] sm:$0xff] }
 0xd55   : > { %6783 = vmatpush3.msra.mxu0 %v3199_v46  ;;  %6789 = vmatprep.subr.mxu1 %v7692_v21 }
 0xd56   : > { %6798 = vmatprep.subr.mxu0 %v7692_v21  ;;  %6790 = vmatpush3.msra.mxu1 %v3322_v57  ;;  %v6456_v57 = vld [vmem:[%s8821_s23 + $0x20] sm:$0xff] }
 0xd57   : > { %6791 = vmatprep.subr.mxu1 %v7692_v21 }
 0xe06   : > { %v2935_v23 = vpop.f32.mrf.mxu0 }
 0xe07   : > { %3167 = vxpose.xlu0.b32.start [1/4] (short) (narrow) %v2935_v23, 8 }
 0xe08   : > { %v6760_v24 = vpop.f32.mrf.mxu0 }
 0xe0a   : > { %v3011_v25 = vpop.f32.mrf.mxu1 }
 0xe0b   : > { %3168 = vxpose.xlu0.b32.cont [2/4] (short) (narrow) %v3011_v25, 8 }
 0xe0c   : > { %v6765_v28 = vpop.f32.mrf.mxu1 }
 0xe0e   : > { %v3087_v29 = vpop.f32.mrf.mxu0 }
 0xe0f   : > { %3169 = vxpose.xlu0.b32.cont [3/4] (short) (narrow) %v3087_v29, 8  ;;  %v6442_v29 = vld [vmem:[#allocation22] ss:$0 sm:$0xff] }
 0xe10   : > { %v6770_v30 = vpop.f32.mrf.mxu0 }
 0xe12   : > { %v3163_v31 = vpop.f32.mrf.mxu1 }
 0xe13   : > { %3170 = vxpose.xlu0.b32.end [4/4] (short) (narrow) %v3163_v31, 8 }
 0xe14   : > { %v6775_v32 = vpop.f32.mrf.mxu1 }
 0xe83   : > { %v3183_v33 = vpop.trf.xlu0 }
 0xe84   : > { %6785 = vmatmul.mubr.msk.f32.vlgmr.msra.gmra.mxu0 %vm913_vm0, %v3183_v33 }
 0xe85   : > { %6814 = vmatprep.mubr.msk.f32.mxu0 %vm7693_vm1, %v7692_v21  ;;  %6799 = vmatpush3.msra.mxu0 %v3420_v5 }
 0xe86   : > { %6800 = vmatprep.subr.mxu0 %v7692_v21 }
 0xe87   : > { %6801 = vmatpush3.msra.mxu0 %v3419_v36 }
 0xe88   : > { %6802 = vmatprep.subr.mxu0 %v7692_v21 }
 0xe89   : > { %6803 = vmatpush3.msra.mxu0 %v3418_v38  ;;  %v6460_v38 = vld [vmem:[#allocation5 + $0x1] ss:$0 sm:$0xff] }
 0xe8a   : > { %6804 = vmatprep.subr.mxu0 %v7692_v21 }
 0xe8b   : > { %6805 = vmatpush3.msra.mxu0 %v3417_v39 }
 0xe8c   : > { %6806 = vmatprep.subr.mxu0 %v7692_v21 }
 0xe8d   : > { %6807 = vmatpush3.msra.mxu0 %v3416_v6 }
 0xe8e   : > { %6808 = vmatprep.subr.mxu0 %v7692_v21 }
 0xe8f   : > { %6809 = vmatpush3.msra.mxu0 %v3415_v7 }
 0xe90   : > { %6810 = vmatprep.subr.mxu0 %v7692_v21 }
 0xe91   : > { %6811 = vmatpush3.msra.mxu0 %v3414_v8 }
 0xe92   : > { %6812 = vmatprep.subr.mxu0 %v7692_v21 }
 0xe93   : > { %6813 = vmatpush3.msra.mxu0 %v3413_v9 }
 0xe94   : > { %6828 = vmatprep.subr.mxu0 %v7692_v21 }
 0xf44   : > { %v3279_v35 = vpop.f32.mrf.mxu0 }
 0xf45   : > { %v3280_v0 = vadd.f32 %v6438_v34, %v3279_v35 }
 0xf46   : > { %v6786_v40 = vpop.f32.mrf.mxu0 }
 0xf47   : > { %3284 = vrot.lane.b32.xlu0 %v3280_v0, %s8764_s12 }
 0xf4b   : > { %3293 = vrot.lane.b32.xlu0 %v8236_v15, %s8763_s9  ;;  %v8348_v15 = vadd.f32 %v8175_v47, %v910_v50  ;;  %v3321_v47 = vld [vmem:[#allocation19 + $0x8] sm:$0xff] }
 0xf4c   : > { %6792 = vmatpush3.msra.mxu1 %v3321_v47  ;;  %v6453_v50 = vld [vmem:[%s8748_s19 + $0x78] sm:$0xff] }
 0xf4d   : > { %6793 = vmatprep.subr.mxu1 %v7692_v21  ;;  %v3502_v28 = vadd.f32 1.0, %v8348_v15 }
 0xf4e   : > { %6794 = vmatpush3.msra.mxu1 %v3320_v12 }
 0xf4f   : > { %v3506_v32 = vrot.slane %v3502_v28, %v8154_v37  ;;  %3568 = vmatprep.subr.mxu1 %v6453_v50 }
 0xfb9   : > { %v3285_v41 = vpop.permute.xlu0 %3284 }
 0xfba   : > { %v3287_v42 = vmul.f32 %v3285_v41, %v8244_v22  ;;  %v3512_v22 = vrot.slane %v8348_v15, %v8154_v37  ;;  %v6451_v15 = vld [vmem:[%s8748_s19 + $0x68] sm:$0xff] }
 0xfbc   : > { %3289 = vrot.lane.b32.xlu1 %v3287_v42, %s8764_s12  ;;  %s6402_s12 = sshll.u32 %s8052_s11, 3 }
 0xfbd   : > { %v3294_v45 = vpop.permute.xlu0 %3293 }
0x102e   : > { %v3290_v43 = vpop.permute.xlu1 %3289 }
0x102f   : > { %v3292_v44 = vadd.f32 %v3290_v43, %v8248_v26 }
0x1031   : > { %v8341_v48 = vadd.f32 %v3294_v45, %v3292_v44 }
0x1033   : > { %v3297_v49 = vsel %vm913_vm0, %v8341_v48, 0.0 }
0x1034   : > { %3298 = vadd.xlane.f32.xlu0 %v3297_v49 }
0x104a   : > { %3514 = vrot.lane.b32.xlu0 %v3512_v22, %s8766_s22  ;;  %v6450_v22 = vld [vmem:[%s8748_s19 + $0x60] sm:$0xff] }
0x10bd   : > { %v3299_v52 = vpop.xlane.xlu0 %3298 }
0x10be   : > { %v3300_v26 = vmul.f32 0.03125, %v3299_v52  ;;  %v6449_v52 = vld [vmem:[%s8748_s19 + $0x58] sm:$0xff] }
0x10c0   : > { %v3301_v53 = vsub.f32 %v8341_v48, %v3300_v26  ;;  %v6448_v26 = vld [vmem:[%s8748_s19 + $0x50] sm:$0xff] }
0x10c1   : > { %v3515_v0 = vpop.permute.xlu0 %3514 }
0x10c2   : > { %v3302_v54 = vmul.f32 %v3301_v53, %v3301_v53 }
0x10c4   : > { %v3303_v55 = vsel %vm913_vm0, %v3302_v54, 0.0  ;;  %v6446_v54 = vld [vmem:[%s8748_s19 + $0x40] sm:$0xff] }
0x10c5   : > { %3304 = vadd.xlane.f32.xlu1 %v3303_v55  ;;  %v6459_v55 = vld [vmem:[%s8821_s23 + $0x38] sm:$0xff] }
0x114e   : > { %v3305_v58 = vpop.xlane.xlu1 %3304 }
0x114f   : > { %v3306_v59 = vmul.f32 0.03125, %v3305_v58 }
0x1151   : > { %v3307_v60 = vadd.f32 1e-05, %v3306_v59  ;;  %v8459_v59 = vld [vmem:[%s8822_s5 + $0x4] sm:$0x7] }
0x1153   : > { %7200 = vrsqrt.f32 %v3307_v60  ;;  %v8464_v60 = vld [vmem:[%s8823_s24 + $0x4] sm:$0x7] }
0x1160   : > { %v7201_v63 = vpop.eup %7200 }
0x1161   : > { %v3309_v1 = vmul.f32 %v7201_v63, %v3301_v53  ;;  %v6447_v53 = vld [vmem:[%s8748_s19 + $0x48] sm:$0xff] }
0x1163   : > { %v3314_v3 = vmul.f32 %v3313_v62, %v3309_v1  ;;  %v3631_v62 = vrot.slane %v8459_v59, %v8154_v37 }
0x1165   : > { %v3319_v4 = vadd.f32 %v3318_v2, %v3314_v3  ;;  %v3636_v2 = vrot.slane %v8464_v60, %v8154_v37 }
0x1167   : > { %6796 = vmatmul.mubr.msk.f32.vlgmr.msra.gmra.mxu1 %vm913_vm0, %v3319_v4 }
0x1168   : > { %3608 = vmatprep.mubr.f32.mxu1 %v7692_v21 }
0x1227   : > { %v3400_v11 = vpop.f32.mrf.mxu1 }
0x1228   : > { %v3401_v13 = vadd.f32 %v6440_v10, %v3400_v11 }
0x1229   : > { %v6797_v14 = vpop.f32.mrf.mxu1 }
0x122a   : > { %v3404_v16 = vmul.f32 %v3401_v13, %v3401_v13 }
0x122c   : > { %v3405_v17 = vmul.f32 %v3404_v16, %v3401_v13 }
0x122e   : > { %v3406_v18 = vmul.f32 0.044715, %v3405_v17 }
0x1230   : > { %v3407_v19 = vadd.f32 %v3406_v18, %v3401_v13 }
0x1232   : > { %v3408_v20 = vmul.f32 0.7978846, %v3407_v19 }
0x1234   : > { %7202 = vtanh.f32 %v3408_v20 }
0x1241   : > { %v7203_v46 = vpop.eup %7202 }
0x1242   : > { %v3410_v23 = vadd.f32 1.0, %v7203_v46 }
0x1244   : > { %v3411_v24 = vmul.f32 0.5, %v3410_v23 }
0x1246   : > { %v3412_v25 = vmul.f32 %v3411_v24, %v3401_v13 }
0x1248   : > { %6815 = vmatmul.mubr.msk.f32.vlgmr.msra.gmra.mxu0 %vm3428_vm3, %v3412_v25 }
0x1249   : > { %6830 = vmatprep.mubr.msk.f32.mxu0 %vm7693_vm1, %v7692_v21 }
0x1308   : > { %v3498_v30 = vpop.f32.mrf.mxu0 }
0x1309   : > { %v3499_v31 = vadd.f32 %v6442_v29, %v3498_v30 }
0x130a   : > { %v6816_v33 = vpop.f32.mrf.mxu0 }
0x130b   : > { %v3507_v34 = vmul.f32 %v3506_v32, %v3499_v31 }
0x130d   : > { %v3508_v35 = vadd.f32 %v3507_v34, %v8341_v48  ;;  %v6452_v48 = vld [vmem:[%s8748_s19 + $0x70] sm:$0xff] }
0x130e   : > { %3569 = vmatpush1.msra.mxu1 %v6452_v48 }
0x130f   : > { %v8405_v40 = vadd.f32 %v3515_v0, %v3508_v35  ;;  %3570 = vmatprep.subr.mxu1 %v6451_v15 }
0x1310   : > { %3571 = vmatpush1.msra.mxu1 %v6450_v22 }
0x1311   : > { %v3615_v41 = vsel %vm913_vm0, %v8405_v40, 0.0  ;;  %3572 = vmatprep.subr.mxu1 %v6449_v52 }
0x1312   : > { %3616 = vadd.xlane.f32.xlu1 %v3615_v41  ;;  %3573 = vmatpush1.msra.mxu1 %v6448_v26 }
0x1313   : > { %3574 = vmatprep.subr.mxu1 %v6447_v53 }
0x1314   : > { %3575 = vmatpush1.msra.mxu1 %v6446_v54 }
0x1315   : > { %6455 = vmatmul.mubr.msk.f32.vlgmr.msra.gmra.mxu1 %vm913_vm0, %v8128_v27  ;;  %6817 = vmatprep.subr.mxu1 %v7692_v21  ;;  %v6457_v27 = vld [vmem:[%s8821_s23 + $0x28] sm:$0xff] }
0x1316   : > { %6825 = vmatprep.mubr.msk.f32.mxu1 %vm7693_vm1, %v7692_v21  ;;  %6818 = vmatpush3.msra.mxu1 %v6459_v55 }
0x1317   : > { %6819 = vmatprep.subr.mxu1 %v7692_v21 }
0x1318   : > { %6820 = vmatpush3.msra.mxu1 %v6458_v56 }
0x1319   : > { %6821 = vmatprep.subr.mxu1 %v7692_v21 }
0x131a   : > { %6822 = vmatpush3.msra.mxu1 %v6457_v27 }
0x131b   : > { %6823 = vmatprep.subr.mxu1 %v7692_v21 }
0x131c   : > { %6824 = vmatpush3.msra.mxu1 %v6456_v57 }
0x131d   : > { %6833 = vmatprep.subr.mxu1 %v7692_v21 }
0x139b   : > { %v3617_v42 = vpop.xlane.xlu1 %3616 }
0x139c   : > { %v3618_v43 = vmul.f32 0.03125, %v3617_v42 }
0x139e   : > { %v3619_v44 = vsub.f32 %v8405_v40, %v3618_v43 }
0x13a0   : > { %v3620_v45 = vmul.f32 %v3619_v44, %v3619_v44 }
0x13a2   : > { %v3621_v49 = vsel %vm913_vm0, %v3620_v45, 0.0 }
0x13a3   : > { %3622 = vadd.xlane.f32.xlu1 %v3621_v49 }
0x13d5   : > { %v8473_v5 = vpop.f32.mrf.mxu1 }
0x13d7   : > { %v8475_v36 = vpop.f32.mrf.mxu1 }
0x142c   : > { %v3623_v47 = vpop.xlane.xlu1 %3622 }
0x142d   : > { %v3624_v12 = vmul.f32 0.03125, %v3623_v47 }
0x142f   : > { %v3625_v58 = vadd.f32 1e-05, %v3624_v12 }
0x1431   : > { %7204 = vrsqrt.f32 %v3625_v58 }
0x143e   : > { %v7205_v63 = vpop.eup %7204 }
0x143f   : > { %v3627_v1 = vmul.f32 %v7205_v63, %v3619_v44 }
0x1441   : > { %v3632_v3 = vmul.f32 %v3631_v62, %v3627_v1 }
0x1443   : > { %v3637_v4 = vadd.f32 %v3636_v2, %v3632_v3 }
0x1445   : > { %6826 = vmatmul.mubr.msk.f32.vlgmr.msra.gmra.mxu1 %vm913_vm0, %v3637_v4  ;;  %v8506_v4 = vld [vmem:[%s8749_s20 + $0x2] sm:$0x3] }
0x1446   : > { %6835 = vmatprep.mubr.msk.f32.mxu1 %vm7693_vm1, %v7692_v21 }
0x1505   : > { %v3720_v39 = vpop.f32.mrf.mxu1 }
0x1506   : > { %v3721_v6 = vadd.f32 %v6460_v38, %v3720_v39  ;;  %v3537_v38 = vrot.slane %v8506_v4, %v8154_v37 }
0x1507   : > { %v6827_v7 = vpop.f32.mrf.mxu1 }
0x1508   : > { %3724 = vxpose.xlu0.b32.start.end [1/1] (short) (narrow) %v3721_v6, 32  ;;  %3885 = vrot.lane.b32.xlu1 %v3721_v6, %s8826_s6  ;;  %v8511_v39 = vadd.f32 %v8473_v5, %v3537_v38  ;;  %v7244_v38 = vld [vmem:[%s8263_s8] sm:$0xff]  ;;  %s8828_s8 = smov 32  }
0x157a   : > { %v3886_v8 = vpop.permute.xlu1 %3885 }
0x157b   : > { %3888 = vxpose.xlu1.b32.start.end [1/1] (short) (narrow) %v3886_v8, 32 }
0x1584   : > { %v3740_v9 = vpop.trf.xlu0 }
0x1585   : > { %3756 = vxpose.xlu0.b32.start.end [1/1] (short) (narrow) %v3740_v9, 8 }
0x1588   : > { %v3741_v10 = vpop.trf.xlu0 }
0x1589   : > { %3788 = vxpose.xlu0.b32.start.end [1/1] (short) (narrow) %v3741_v10, 8 }
0x158c   : > { %v3742_v11 = vpop.trf.xlu0 }
0x158d   : > { %3820 = vxpose.xlu0.b32.start.end [1/1] (short) (narrow) %v3742_v11, 8 }
0x1590   : > { %v3743_v13 = vpop.trf.xlu0 }
0x1591   : > { %3852 = vxpose.xlu1.b32.start.end [1/1] (short) (narrow) %v3743_v13, 8 }
0x15f7   : > { %v3904_v14 = vpop.trf.xlu1 }
0x15f8   : > { %6829 = vmatpush3.msra.mxu0 %v3904_v14 }
0x15f9   : > { %6838 = vmatprep.subr.mxu0 %v7692_v21 }
0x15fb   : > { %v3905_v16 = vpop.trf.xlu1 }
0x15fc   : > { %6834 = vmatpush3.msra.mxu1 %v3905_v16 }
0x15fd   : > { %6843 = vmatprep.subr.mxu1 %v7692_v21 }
0x15ff   : > { %v3906_v17 = vpop.trf.xlu1 }
0x1601   : > { %v3772_v18 = vpop.trf.xlu0 }
0x1602   : > { %6831 = vmatmul.mubr.msk.f32.vlgmr.msra.gmra.mxu0 %vm1327_vm2, %v3772_v18 }
0x1603   : > { %6839 = vmatpush3.msra.mxu0 %v3906_v17  ;;  %6840 = vmatprep.mubr.msk.f32.mxu0 %vm7693_vm1, %v7692_v21  ;;  %v3907_v19 = vpop.trf.xlu1 }
0x1604   : > { %6848 = vmatprep.subr.mxu0 %v7692_v21 }
0x1605   : > { %v3804_v20 = vpop.trf.xlu0 }
0x1606   : > { %6836 = vmatmul.mubr.msk.f32.vlgmr.msra.gmra.mxu1 %vm1327_vm2, %v3804_v20 }
0x1607   : > { %6844 = vmatpush3.msra.mxu1 %v3907_v19  ;;  %6845 = vmatprep.mubr.msk.f32.mxu1 %vm7693_vm1, %v7692_v21 }
0x1608   : > { %6853 = vmatprep.subr.mxu1 %v7692_v21 }
0x1609   : > { %v3836_v46 = vpop.trf.xlu0 }
0x160a   : > { %6841 = vmatmul.mubr.msk.f32.vlgmr.msra.gmra.mxu0 %vm1327_vm2, %v3836_v46 }
0x160b   : > { %6850 = vmatprep.mubr.msk.f32.mxu0 %vm7693_vm1, %v7692_v21 }
0x160d   : > { %v3868_v23 = vpop.trf.xlu1 }
0x160e   : > { %6846 = vmatmul.mubr.msk.f32.vlgmr.msra.gmra.mxu1 %vm1327_vm2, %v3868_v23 }
0x160f   : > { %6855 = vmatprep.mubr.msk.f32.mxu1 %vm7693_vm1, %v7692_v21 }
0x16c2   : > { %v4024_v24 = vpop.f32.mrf.mxu0 }
0x16c3   : > { %v4247_v25 = vmul.f32 0.35355338, %v4024_v24 }
0x16c4   : > { %v6832_v28 = vpop.f32.mrf.mxu0 }
0x16c5   : > { %v4251_v29 = vsel %vm1327_vm2, %v4247_v25, -inf  ;;  %v4634_v28 = vld [vmem:[#allocation7 + $0x30] sm:$0xff] }
0x16c6   : > { %4252 = vmax.xlane.f32.xlu0 %v4251_v29  ;;  %v4097_v30 = vpop.f32.mrf.mxu1  ;;  %v4633_v29 = vld [vmem:[#allocation7 + $0x28] sm:$0xff] }
0x16c7   : > { %v4248_v31 = vmul.f32 0.35355338, %v4097_v30  ;;  %v4632_v30 = vld [vmem:[#allocation7 + $0x20] sm:$0xff] }
0x16c8   : > { %v6837_v32 = vpop.f32.mrf.mxu1 }
0x16c9   : > { %v4254_v33 = vsel %vm1327_vm2, %v4248_v31, -inf }
0x16ca   : > { %v4170_v34 = vpop.f32.mrf.mxu0  ;;  %4255 = vmax.xlane.f32.xlu1 %v4254_v33 }
0x16cb   : > { %v4249_v35 = vmul.f32 0.35355338, %v4170_v34 }
0x16cc   : > { %v6842_v0 = vpop.f32.mrf.mxu0 }
0x16cd   : > { %v4257_v41 = vsel %vm1327_vm2, %v4249_v35, -inf }
0x16ce   : > { %4258 = vmax.xlane.f32.xlu0 %v4257_v41  ;;  %v4243_v42 = vpop.f32.mrf.mxu1 }
0x16cf   : > { %v4250_v43 = vmul.f32 0.35355338, %v4243_v42 }
0x16d0   : > { %v6847_v44 = vpop.f32.mrf.mxu1 }
0x16d1   : > { %v4260_v45 = vsel %vm1327_vm2, %v4250_v43, -inf  ;;  %v4717_v44 = vadd.f32 1.0, %v8511_v39 }
0x16d2   : > { %4261 = vmax.xlane.f32.xlu0 %v4260_v45  ;;  %v6474_v45 = vld [vmem:[#allocation8 + $0x1] ss:$0 sm:$0xff] }
0x16db   : > { %3920 = vrot.lane.b32.xlu1 %v3721_v6, %s8827_s10  ;;  %v8515_v6 = vrot.slane %v8511_v39, %v8154_v37 }
0x174f   : > { %v4253_v49 = vpop.xlane.xlu0 %4252 }
0x1750   : > { %v4263_v50 = vsub.f32 %v4247_v25, %v4253_v49  ;;  %v4635_v25 = vld [vmem:[#allocation7 + $0x38] sm:$0xff] }
0x1752   : > { %v4267_v48 = vmul.f32 1.442695, %v4263_v50 }
0x1753   : > { %v4256_v15 = vpop.xlane.xlu1 %4255 }
0x1754   : > { %7206 = vpow2.f32 %v4267_v48  ;;  %v4264_v22 = vsub.f32 %v4248_v31, %v4256_v15  ;;  %v8548_v48 = vrot.slane %v4717_v44, %v8154_v37 }
0x1756   : > { %v4269_v52 = vmul.f32 1.442695, %v4264_v22 }
0x1757   : > { %v4259_v26 = vpop.xlane.xlu0 %4258  ;;  %v3921_v53 = vpop.permute.xlu1 %3920 }
0x1758   : > { %7208 = vpow2.f32 %v4269_v52  ;;  %v4265_v54 = vsub.f32 %v4249_v35, %v4259_v26  ;;  %3923 = vxpose.xlu1.b32.start.end [1/1] (short) (narrow) %v3921_v53, 32 }
0x175a   : > { %v4271_v55 = vmul.f32 1.442695, %v4265_v54 }
0x175b   : > { %v4262_v56 = vpop.xlane.xlu0 %4261 }
0x175c   : > { %7210 = vpow2.f32 %v4271_v55  ;;  %v4266_v27 = vsub.f32 %v4250_v43, %v4262_v56 }
0x175e   : > { %v4273_v57 = vmul.f32 1.442695, %v4266_v27 }
0x1760   : > { %7212 = vpow2.f32 %v4273_v57 }
0x1761   : > { %v7207_v47 = vpop.eup %7206 }
0x1762   : > { %v4275_v12 = vsel %vm1327_vm2, %v7207_v47, 0.0 }
0x1763   : > { %4276 = vadd.xlane.f32.xlu0 %v4275_v12  ;;  %v4760_v12 = vld [vmem:[#allocation10 + $0x38] sm:$0xff] }
0x1765   : > { %v7209_v58 = vpop.eup %7208 }
0x1766   : > { %v4278_v62 = vsel %vm1327_vm2, %v7209_v58, 0.0 }
0x1767   : > { %4279 = vadd.xlane.f32.xlu0 %v4278_v62  ;;  %v4757_v62 = vld [vmem:[#allocation10 + $0x20] sm:$0xff] }
0x1769   : > { %v7211_v63 = vpop.eup %7210 }
0x176a   : > { %v4281_v1 = vsel %vm1327_vm2, %v7211_v63, 0.0 }
0x176b   : > { %4282 = vadd.xlane.f32.xlu0 %v4281_v1  ;;  %v4845_v1 = vld [vmem:[#allocation13 + $0x30] sm:$0xff] }
0x176d   : > { %v7213_v2 = vpop.eup %7212 }
0x176e   : > { %v4284_v3 = vsel %vm1327_vm2, %v7213_v2, 0.0 }
0x176f   : > { %4285 = vadd.xlane.f32.xlu0 %v4284_v3  ;;  %v4843_v3 = vld [vmem:[#allocation13 + $0x20] sm:$0xff] }
0x1782   : > { %4729 = vrot.lane.b32.xlu1 %v8515_v6, %s8826_s6 }
0x17d4   : > { %v3939_v11 = vpop.trf.xlu1 }
0x17d8   : > { %v3940_v16 = vpop.trf.xlu1 }
0x17dc   : > { %v3941_v20 = vpop.trf.xlu1 }
0x17e0   : > { %v3942_v24 = vpop.trf.xlu1 }
0x17ec   : > { %v4277_v7 = vpop.xlane.xlu0 %4276 }
0x17ed   : > { %7214 = vrcp.f32 %v4277_v7 }
0x17f0   : > { %v4280_v8 = vpop.xlane.xlu0 %4279 }
0x17f1   : > { %7216 = vrcp.f32 %v4280_v8 }
0x17f4   : > { %v4283_v9 = vpop.xlane.xlu0 %4282  ;;  %v4730_v26 = vpop.permute.xlu1 %4729 }
0x17f5   : > { %7218 = vrcp.f32 %v4283_v9  ;;  %v4749_v9 = vrot.slane %v8459_v59, %v8274_v51 }
0x17f8   : > { %v4286_v10 = vpop.xlane.xlu0 %4285 }
0x17f9   : > { %7220 = vrcp.f32 %v4286_v10 }
0x17fa   : > { %v7215_v13 = vpop.eup %7214 }
0x17fb   : > { %v4291_v14 = vmul.f32 %v7215_v13, %v7207_v47  ;;  %v4754_v13 = vrot.slane %v8464_v60, %v8274_v51 }
0x17fd   : > { %6849 = vmatpush3.xpose.msk.msra.mxu0 %vm1327_vm2, %v4291_v14 }
0x17fe   : > { %v7217_v5 = vpop.eup %7216  ;;  %6858 = vmatprep.subr.mxu0 %v7692_v21 }
0x17ff   : > { %v4292_v17 = vmul.f32 %v7217_v5, %v7209_v58  ;;  %v4759_v58 = vld [vmem:[#allocation10 + $0x30] sm:$0xff] }
0x1800   : > { %6851 = vmatmul.mubr.msk.f32.vlgmr.msra.gmra.mxu0 %vm1327_vm2, %v3939_v11 }
0x1801   : > { %6854 = vmatpush3.xpose.msk.msra.mxu1 %vm1327_vm2, %v4292_v17  ;;  %6860 = vmatprep.mubr.msk.f32.mxu0 %vm7693_vm1, %v7692_v21 }
0x1802   : > { %v7219_v18 = vpop.eup %7218  ;;  %6863 = vmatprep.subr.mxu1 %v7692_v21 }
0x1803   : > { %v4293_v19 = vmul.f32 %v7219_v18, %v7211_v63  ;;  %v4846_v63 = vld [vmem:[#allocation13 + $0x38] sm:$0xff] }
0x1804   : > { %6856 = vmatmul.mubr.msk.f32.vlgmr.msra.gmra.mxu1 %vm1327_vm2, %v3940_v16  ;;  %v6478_v16 = vld [vmem:[#allocation14 + $0x1] ss:$0 sm:$0xff] }
0x1805   : > { %6859 = vmatpush3.xpose.msk.msra.mxu0 %vm1327_vm2, %v4293_v19  ;;  %6865 = vmatprep.mubr.msk.f32.mxu1 %vm7693_vm1, %v7692_v21 }
0x1806   : > { %v7221_v46 = vpop.eup %7220  ;;  %6868 = vmatprep.subr.mxu0 %v7692_v21 }
0x1807   : > { %v4294_v23 = vmul.f32 %v7221_v46, %v7213_v2  ;;  %v4844_v2 = vld [vmem:[#allocation13 + $0x28] sm:$0xff] }
0x1808   : > { %6861 = vmatmul.mubr.msk.f32.vlgmr.msra.gmra.mxu0 %vm1327_vm2, %v3941_v20  ;;  %v6476_v20 = vld [vmem:[#allocation11 + $0x1] ss:$0 sm:$0xff] }
0x1809   : > { %6864 = vmatpush3.xpose.msk.msra.mxu1 %vm1327_vm2, %v4294_v23  ;;  %6876 = vmatprep.mubr.msk.f32.mxu0 %vm7693_vm1, %v7692_v21 }
0x180a   : > { %6879 = vmatprep.subr.mxu1 %v7692_v21  ;;  %6869 = vmatpush3.msra.mxu0 %v4635_v25 }
0x180b   : > { %6870 = vmatprep.subr.mxu0 %v7692_v21 }
0x180c   : > { %6866 = vmatmul.mubr.msk.f32.vlgmr.msra.gmra.mxu1 %vm1327_vm2, %v3942_v24  ;;  %6871 = vmatpush3.msra.mxu0 %v4634_v28 }
0x180d   : > { %6887 = vmatprep.mubr.msk.f32.mxu1 %vm7693_vm1, %v7692_v21  ;;  %6872 = vmatprep.subr.mxu0 %v7692_v21 }
0x180e   : > { %6873 = vmatpush3.msra.mxu0 %v4633_v29  ;;  %6880 = vmatpush3.msra.mxu1 %v4760_v12 }
0x180f   : > { %6874 = vmatprep.subr.mxu0 %v7692_v21  ;;  %6881 = vmatprep.subr.mxu1 %v7692_v21 }
0x1810   : > { %6875 = vmatpush3.msra.mxu0 %v4632_v30  ;;  %6882 = vmatpush3.msra.mxu1 %v4759_v58 }
0x1811   : > { %6890 = vmatprep.subr.mxu0 %v7692_v21  ;;  %6883 = vmatprep.subr.mxu1 %v7692_v21 }
0x18c0   : > { %v4367_v31 = vpop.f32.mrf.mxu0 }
0x18c1   : > { %4599 = vxpose.xlu0.b32.start [1/4] (short) (narrow) %v4367_v31, 8 }
0x18c2   : > { %v6852_v32 = vpop.f32.mrf.mxu0 }
0x18c4   : > { %v4443_v33 = vpop.f32.mrf.mxu1 }
0x18c5   : > { %4600 = vxpose.xlu0.b32.cont [2/4] (short) (narrow) %v4443_v33, 8 }
0x18c6   : > { %v6857_v34 = vpop.f32.mrf.mxu1 }
0x18c8   : > { %v4519_v35 = vpop.f32.mrf.mxu0 }
0x18c9   : > { %4601 = vxpose.xlu0.b32.cont [3/4] (short) (narrow) %v4519_v35, 8 }
0x18ca   : > { %v6862_v0 = vpop.f32.mrf.mxu0 }
0x18cc   : > { %v4595_v41 = vpop.f32.mrf.mxu1 }
0x18cd   : > { %4602 = vxpose.xlu0.b32.end [4/4] (short) (narrow) %v4595_v41, 8 }
0x18ce   : > { %v6867_v42 = vpop.f32.mrf.mxu1 }
0x193d   : > { %v4615_v43 = vpop.trf.xlu0 }
0x193e   : > { %6877 = vmatmul.mubr.msk.f32.vlgmr.msra.gmra.mxu0 %vm913_vm0, %v4615_v43 }
0x193f   : > { %6898 = vmatprep.mubr.msk.f32.mxu0 %vm7693_vm1, %v7692_v21  ;;  %6891 = vmatpush3.msra.mxu0 %v4846_v63 }
0x1940   : > { %6892 = vmatprep.subr.mxu0 %v7692_v21 }
0x1941   : > { %6893 = vmatpush3.msra.mxu0 %v4845_v1 }
0x1942   : > { %6894 = vmatprep.subr.mxu0 %v7692_v21 }
0x1943   : > { %6895 = vmatpush3.msra.mxu0 %v4844_v2 }
0x1944   : > { %6896 = vmatprep.subr.mxu0 %v7692_v21 }
0x1945   : > { %6897 = vmatpush3.msra.mxu0 %v4843_v3 }
0x1946   : > { %6899 = vmatmul.mubr.msk.f32.vlgmr.msra.gmra.mxu0 %vm913_vm0, %v7244_v38  ;;  %6911 = vmatprep.subr.mxu0 %v7692_v21 }
0x1947   : > { %6913 = vmatprep.mubr.msk.f32.mxu0 %vm7693_vm1, %v7692_v21 }
0x19fe   : > { %v4713_v49 = vpop.f32.mrf.mxu0 }
0x19ff   : > { %v4714_v50 = vadd.f32 %v6474_v45, %v4713_v49 }
0x1a00   : > { %v6878_v15 = vpop.f32.mrf.mxu0 }
0x1a01   : > { %v4722_v22 = vmul.f32 %v8548_v48, %v4714_v50 }
0x1a03   : > { %v4723_v52 = vadd.f32 %v4722_v22, %v8405_v40  ;;  %v4758_v40 = vld [vmem:[#allocation10 + $0x28] sm:$0xff] }
0x1a04   : > { %6884 = vmatpush3.msra.mxu1 %v4758_v40 }
0x1a05   : > { %v8552_v53 = vadd.f32 %v4730_v26, %v4723_v52  ;;  %6885 = vmatprep.subr.mxu1 %v7692_v21 }
0x1a06   : > { %6886 = vmatpush3.msra.mxu1 %v4757_v62  ;;  %v4921_v17 = vpop.f32.mrf.mxu0 }
0x1a07   : > { %v4733_v54 = vsel %vm913_vm0, %v8552_v53, 0.0  ;;  %6901 = vmatprep.subr.mxu1 %v7692_v21  ;;  %v4922_v18 = vadd.f32 %v6478_v16, %v4921_v17 }
0x1a08   : > { %4734 = vadd.xlane.f32.xlu0 %v4733_v54  ;;  %v6900_v19 = vpop.f32.mrf.mxu0 }
0x1a91   : > { %v4735_v55 = vpop.xlane.xlu0 %4734 }
0x1a92   : > { %v4736_v56 = vmul.f32 0.03125, %v4735_v55 }
0x1a94   : > { %v4737_v27 = vsub.f32 %v8552_v53, %v4736_v56 }
0x1a96   : > { %v4738_v57 = vmul.f32 %v4737_v27, %v4737_v27 }
0x1a98   : > { %v4739_v47 = vsel %vm913_vm0, %v4738_v57, 0.0 }
0x1a99   : > { %4740 = vadd.xlane.f32.xlu1 %v4739_v47 }
0x1acc   : > { %5085 = vxpose.xlu1.b32.start.end [1/1] (short) (narrow) %v4922_v18, 32 }
0x1b22   : > { %v4741_v39 = vpop.xlane.xlu1 %4740 }
0x1b23   : > { %v4742_v7 = vmul.f32 0.03125, %v4741_v39 }
0x1b25   : > { %v4743_v8 = vadd.f32 1e-05, %v4742_v7 }
0x1b27   : > { %7222 = vrsqrt.f32 %v4743_v8 }
0x1b34   : > { %v7223_v10 = vpop.eup %7222 }
0x1b35   : > { %v4745_v11 = vmul.f32 %v7223_v10, %v4737_v27 }
0x1b37   : > { %v4750_v14 = vmul.f32 %v4749_v9, %v4745_v11 }
0x1b39   : > { %v4755_v5 = vadd.f32 %v4754_v13, %v4750_v14 }
0x1b3b   : > { %6888 = vmatmul.mubr.msk.f32.vlgmr.msra.gmra.mxu1 %vm913_vm0, %v4755_v5 }
0x1b3c   : > { %6903 = vmatprep.mubr.msk.f32.mxu1 %vm7693_vm1, %v7692_v21 }
0x1b48   : > { %v5101_v25 = vpop.trf.xlu1 }
0x1b49   : > { %6902 = vmatpush3.msra.mxu1 %v5101_v25 }
0x1b4a   : > { %6906 = vmatprep.subr.mxu1 %v7692_v21 }
0x1b4c   : > { %v5102_v28 = vpop.trf.xlu1 }
0x1b50   : > { %v5103_v30 = vpop.trf.xlu1 }
0x1b51   : > { %6912 = vmatpush3.msra.mxu0 %v5103_v30 }
0x1b52   : > { %6921 = vmatprep.subr.mxu0 %v7692_v21 }
0x1b54   : > { %v5104_v35 = vpop.trf.xlu1 }
0x1bfb   : > { %v4838_v46 = vpop.f32.mrf.mxu1 }
0x1bfc   : > { %v4839_v23 = vadd.f32 %v6476_v20, %v4838_v46 }
0x1bfd   : > { %v6889_v24 = vpop.f32.mrf.mxu1 }
0x1bfe   : > { %4925 = vxpose.xlu0.b32.start.end [1/1] (short) (narrow) %v4839_v23, 32 }
0x1c7a   : > { %v4941_v29 = vpop.trf.xlu0 }
0x1c7b   : > { %4957 = vxpose.xlu0.b32.start.end [1/1] (short) (narrow) %v4941_v29, 8 }
0x1c7e   : > { %v4942_v31 = vpop.trf.xlu0 }
0x1c7f   : > { %4989 = vxpose.xlu0.b32.start.end [1/1] (short) (narrow) %v4942_v31, 8 }
0x1c82   : > { %v4943_v32 = vpop.trf.xlu0 }
0x1c83   : > { %5021 = vxpose.xlu0.b32.start.end [1/1] (short) (narrow) %v4943_v32, 8 }
0x1c86   : > { %v4944_v33 = vpop.trf.xlu0 }
0x1c87   : > { %5053 = vxpose.xlu0.b32.start.end [1/1] (short) (narrow) %v4944_v33, 8 }
0x1cf7   : > { %v4973_v34 = vpop.trf.xlu0 }
0x1cf8   : > { %6904 = vmatmul.mubr.msk.f32.vlgmr.msra.gmra.mxu1 %vm1327_vm2, %v4973_v34 }
0x1cf9   : > { %6907 = vmatpush3.msra.mxu1 %v5102_v28  ;;  %6908 = vmatprep.mubr.msk.f32.mxu1 %vm7693_vm1, %v7692_v21 }
0x1cfa   : > { %6916 = vmatprep.subr.mxu1 %v7692_v21 }
0x1cfb   : > { %v5005_v0 = vpop.trf.xlu0 }
0x1cfc   : > { %6909 = vmatmul.mubr.msk.f32.vlgmr.msra.gmra.mxu1 %vm1327_vm2, %v5005_v0 }
0x1cfd   : > { %6917 = vmatpush3.msra.mxu1 %v5104_v35  ;;  %6918 = vmatprep.mubr.msk.f32.mxu1 %vm7693_vm1, %v7692_v21 }
0x1cfe   : > { %6926 = vmatprep.subr.mxu1 %v7692_v21 }
0x1cff   : > { %v5037_v41 = vpop.trf.xlu0 }
0x1d00   : > { %6914 = vmatmul.mubr.msk.f32.vlgmr.msra.gmra.mxu0 %vm1327_vm2, %v5037_v41 }
0x1d01   : > { %6923 = vmatprep.mubr.msk.f32.mxu0 %vm7693_vm1, %v7692_v21 }
0x1d03   : > { %v5069_v42 = vpop.trf.xlu0 }
0x1d04   : > { %6919 = vmatmul.mubr.msk.f32.vlgmr.msra.gmra.mxu1 %vm1327_vm2, %v5069_v42 }
0x1d05   : > { %6928 = vmatprep.mubr.msk.f32.mxu1 %vm7693_vm1, %v7692_v21 }
0x1db8   : > { %v5222_v43 = vpop.f32.mrf.mxu1 }
0x1db9   : > { %v5445_v44 = vmul.f32 0.35355338, %v5222_v43  ;;  %v5833_v43 = vld [vmem:[#allocation16 + $0x38] sm:$0xff] }
0x1dba   : > { %v6905_v45 = vpop.f32.mrf.mxu1 }
0x1dbb   : > { %v5449_v49 = vsel %vm1327_vm2, %v5445_v44, -inf  ;;  %v5831_v45 = vld [vmem:[#allocation16 + $0x28] sm:$0xff] }
0x1dbc   : > { %5450 = vmax.xlane.f32.xlu1 %v5449_v49  ;;  %v5295_v50 = vpop.f32.mrf.mxu1  ;;  %v5830_v49 = vld [vmem:[#allocation16 + $0x20] sm:$0xff] }
0x1dbd   : > { %v5446_v15 = vmul.f32 0.35355338, %v5295_v50 }
0x1dbe   : > { %v6910_v22 = vpop.f32.mrf.mxu1 }
0x1dbf   : > { %v5452_v52 = vsel %vm1327_vm2, %v5446_v15, -inf }
0x1dc0   : > { %5453 = vmax.xlane.f32.xlu0 %v5452_v52  ;;  %v5368_v26 = vpop.f32.mrf.mxu0 }
0x1dc1   : > { %v5447_v54 = vmul.f32 0.35355338, %v5368_v26 }
0x1dc2   : > { %v6915_v55 = vpop.f32.mrf.mxu0 }
0x1dc3   : > { %v5455_v56 = vsel %vm1327_vm2, %v5447_v54, -inf }
0x1dc4   : > { %5456 = vmax.xlane.f32.xlu0 %v5455_v56  ;;  %v5441_v27 = vpop.f32.mrf.mxu1 }
0x1dc5   : > { %v5448_v57 = vmul.f32 0.35355338, %v5441_v27 }
0x1dc6   : > { %v6920_v47 = vpop.f32.mrf.mxu1 }
0x1dc7   : > { %v5458_v12 = vsel %vm1327_vm2, %v5448_v57, -inf }
0x1dc8   : > { %5459 = vmax.xlane.f32.xlu1 %v5458_v12 }
0x1dda   : > { %5118 = vrot.lane.b32.xlu0 %v4922_v18, %s8826_s6 }
0x1e45   : > { %v5451_v58 = vpop.xlane.xlu1 %5450 }
0x1e46   : > { %v5461_v40 = vsub.f32 %v5445_v44, %v5451_v58  ;;  %v5832_v44 = vld [vmem:[#allocation16 + $0x30] sm:$0xff] }
0x1e48   : > { %v5465_v62 = vmul.f32 1.442695, %v5461_v40 }
0x1e49   : > { %v5454_v63 = vpop.xlane.xlu0 %5453 }
0x1e4a   : > { %7224 = vpow2.f32 %v5465_v62  ;;  %v5462_v1 = vsub.f32 %v5446_v15, %v5454_v63 }
0x1e4c   : > { %v5467_v2 = vmul.f32 1.442695, %v5462_v1 }
0x1e4d   : > { %v5457_v3 = vpop.xlane.xlu0 %5456 }
0x1e4e   : > { %7226 = vpow2.f32 %v5467_v2  ;;  %v5463_v38 = vsub.f32 %v5447_v54, %v5457_v3 }
0x1e50   : > { %v5469_v39 = vmul.f32 1.442695, %v5463_v38 }
0x1e51   : > { %v5460_v7 = vpop.xlane.xlu1 %5459  ;;  %v5119_v19 = vpop.permute.xlu0 %5118 }
0x1e52   : > { %7228 = vpow2.f32 %v5469_v39  ;;  %v5464_v8 = vsub.f32 %v5448_v57, %v5460_v7  ;;  %v6492_v57 = vld [vmem:[#allocation17 + $0x1] ss:$0 sm:$0xff]  ;;  %v3541_v39 = vrot.slane %v8506_v4, %v8274_v51  ;;  %v5954_v51 = vld [vmem:[#allocation19 + $0x28] sm:$0xff] }
0x1e54   : > { %v5471_v9 = vmul.f32 1.442695, %v5464_v8 }
0x1e56   : > { %7230 = vpow2.f32 %v5471_v9 }
0x1e57   : > { %v7225_v10 = vpop.eup %7224 }
0x1e58   : > { %v5473_v11 = vsel %vm1327_vm2, %v7225_v10, 0.0 }
0x1e59   : > { %5474 = vadd.xlane.f32.xlu1 %v5473_v11  ;;  %v5956_v11 = vld [vmem:[#allocation19 + $0x38] sm:$0xff] }
0x1e5b   : > { %v7227_v13 = vpop.eup %7226 }
0x1e5c   : > { %v5476_v14 = vsel %vm1327_vm2, %v7227_v13, 0.0 }
0x1e5d   : > { %5477 = vadd.xlane.f32.xlu1 %v5476_v14 }
0x1e5f   : > { %v7229_v5 = vpop.eup %7228 }
0x1e60   : > { %v5479_v16 = vsel %vm1327_vm2, %v7229_v5, 0.0 }
0x1e61   : > { %5480 = vadd.xlane.f32.xlu1 %v5479_v16  ;;  %v5945_v16 = vrot.slane %v8459_v59, %v8359_v61  ;;  %v6502_v59 = vld [vmem:[%s8825_s21 + $0x70] sm:$0xff] }
0x1e63   : > { %v7231_v17 = vpop.eup %7230 }
0x1e64   : > { %v5482_v18 = vsel %vm1327_vm2, %v7231_v17, 0.0 }
0x1e65   : > { %5483 = vadd.xlane.f32.xlu1 %v5482_v18 }
0x1e98   : > { %5121 = vxpose.xlu1.b32.start.end [1/1] (short) (narrow) %v5119_v19, 32  ;;  %v5950_v19 = vrot.slane %v8464_v60, %v8359_v61  ;;  %v6501_v61 = vld [vmem:[%s8825_s21 + $0x68] sm:$0xff]  ;;  %v6500_v60 = vld [vmem:[%s8825_s21 + $0x60] sm:$0xff] }
0x1ee2   : > { %v5475_v20 = vpop.xlane.xlu1 %5474 }
0x1ee3   : > { %7232 = vrcp.f32 %v5475_v20 }
0x1ee6   : > { %v5478_v46 = vpop.xlane.xlu1 %5477 }
0x1ee7   : > { %7234 = vrcp.f32 %v5478_v46 }
0x1eea   : > { %v5481_v29 = vpop.xlane.xlu1 %5480 }
0x1eeb   : > { %7236 = vrcp.f32 %v5481_v29  ;;  %v6496_v29 = vld [vmem:[%s8825_s21 + $0x40] sm:$0xff] }
0x1eee   : > { %v5484_v30 = vpop.xlane.xlu1 %5483 }
0x1eef   : > { %7238 = vrcp.f32 %v5484_v30  ;;  %v6494_v30 = vld [vmem:[#allocation20 + $0x1] ss:$0 sm:$0xff] }
0x1ef0   : > { %v7233_v23 = vpop.eup %7232 }
0x1ef1   : > { %v5489_v24 = vmul.f32 %v7233_v23, %v7225_v10  ;;  %v6503_v23 = vld [vmem:[%s8825_s21 + $0x78] sm:$0xff] }
0x1ef3   : > { %6922 = vmatpush3.xpose.msk.msra.mxu0 %vm1327_vm2, %v5489_v24  ;;  %v6499_v24 = vld [vmem:[%s8825_s21 + $0x58] sm:$0xff] }
0x1ef4   : > { %v7235_v25 = vpop.eup %7234  ;;  %6931 = vmatprep.subr.mxu0 %v7692_v21 }
0x1ef5   : > { %v5490_v28 = vmul.f32 %v7235_v25, %v7227_v13  ;;  %v5955_v13 = vld [vmem:[#allocation19 + $0x30] sm:$0xff]  ;;  %v6498_v25 = vld [vmem:[%s8825_s21 + $0x50] sm:$0xff] }
0x1ef7   : > { %6927 = vmatpush3.xpose.msk.msra.mxu1 %vm1327_vm2, %v5490_v28  ;;  %v6497_v28 = vld [vmem:[%s8825_s21 + $0x48] sm:$0xff] }
0x1ef8   : > { %6936 = vmatprep.subr.mxu1 %v7692_v21  ;;  %v7237_v31 = vpop.eup %7236 }
0x1ef9   : > { %v5491_v33 = vmul.f32 %v7237_v31, %v7229_v5 }
0x1efc   : > { %v7239_v34 = vpop.eup %7238 }
0x1efd   : > { %v5492_v0 = vmul.f32 %v7239_v34, %v7231_v17 }
0x1f14   : > { %v5137_v32 = vpop.trf.xlu1 }
0x1f15   : > { %6924 = vmatmul.mubr.msk.f32.vlgmr.msra.gmra.mxu0 %vm1327_vm2, %v5137_v32 }
0x1f16   : > { %6932 = vmatpush3.xpose.msk.msra.mxu0 %vm1327_vm2, %v5491_v33  ;;  %6933 = vmatprep.mubr.msk.f32.mxu0 %vm7693_vm1, %v7692_v21 }
0x1f17   : > { %6941 = vmatprep.subr.mxu0 %v7692_v21 }
0x1f18   : > { %v5138_v35 = vpop.trf.xlu1 }
0x1f19   : > { %6929 = vmatmul.mubr.msk.f32.vlgmr.msra.gmra.mxu1 %vm1327_vm2, %v5138_v35 }
0x1f1a   : > { %6937 = vmatpush3.xpose.msk.msra.mxu1 %vm1327_vm2, %v5492_v0  ;;  %6938 = vmatprep.mubr.msk.f32.mxu1 %vm7693_vm1, %v7692_v21 }
0x1f1b   : > { %6952 = vmatprep.subr.mxu1 %v7692_v21 }
0x1f1c   : > { %v5139_v41 = vpop.trf.xlu1 }
0x1f1d   : > { %6934 = vmatmul.mubr.msk.f32.vlgmr.msra.gmra.mxu0 %vm1327_vm2, %v5139_v41 }
0x1f1e   : > { %6949 = vmatprep.mubr.msk.f32.mxu0 %vm7693_vm1, %v7692_v21  ;;  %6942 = vmatpush3.msra.mxu0 %v5833_v43 }
0x1f1f   : > { %6943 = vmatprep.subr.mxu0 %v7692_v21 }
0x1f20   : > { %v5140_v42 = vpop.trf.xlu1  ;;  %6944 = vmatpush3.msra.mxu0 %v5832_v44 }
0x1f21   : > { %6939 = vmatmul.mubr.msk.f32.vlgmr.msra.gmra.mxu1 %vm1327_vm2, %v5140_v42  ;;  %6945 = vmatprep.subr.mxu0 %v7692_v21 }
0x1f22   : > { %6960 = vmatprep.mubr.msk.f32.mxu1 %vm7693_vm1, %v7692_v21  ;;  %6946 = vmatpush3.msra.mxu0 %v5831_v45 }
0x1f23   : > { %6947 = vmatprep.subr.mxu0 %v7692_v21  ;;  %6953 = vmatpush3.msra.mxu1 %v5956_v11 }
0x1f24   : > { %6948 = vmatpush3.msra.mxu0 %v5830_v49  ;;  %6954 = vmatprep.subr.mxu1 %v7692_v21 }
0x1f25   : > { %6963 = vmatprep.subr.mxu0 %v7692_v21  ;;  %6955 = vmatpush3.msra.mxu1 %v5955_v13 }
0x1f26   : > { %6956 = vmatprep.subr.mxu1 %v7692_v21 }
0x1f27   : > { %6957 = vmatpush3.msra.mxu1 %v5954_v51 }
0x1f28   : > { %6958 = vmatprep.subr.mxu1 %v7692_v21 }
0x1fd5   : > { %v5565_v50 = vpop.f32.mrf.mxu0 }
0x1fd6   : > { %5797 = vxpose.xlu0.b32.start [1/4] (short) (narrow) %v5565_v50, 8  ;;  %v6504_v50 = vld [vmem:[#allocation22 + $0x1] ss:$0 sm:$0xff] }
0x1fd7   : > { %v6925_v15 = vpop.f32.mrf.mxu0 }
0x1fd9   : > { %v5641_v22 = vpop.f32.mrf.mxu1 }
0x1fda   : > { %5798 = vxpose.xlu0.b32.cont [2/4] (short) (narrow) %v5641_v22, 8 }
0x1fdb   : > { %v6930_v52 = vpop.f32.mrf.mxu1 }
0x1fdd   : > { %v5717_v26 = vpop.f32.mrf.mxu0 }
0x1fde   : > { %5799 = vxpose.xlu0.b32.cont [3/4] (short) (narrow) %v5717_v26, 8 }
0x1fdf   : > { %v6935_v54 = vpop.f32.mrf.mxu0 }
0x1fe1   : > { %v5793_v55 = vpop.f32.mrf.mxu1 }
0x1fe2   : > { %5800 = vxpose.xlu0.b32.end [4/4] (short) (narrow) %v5793_v55, 8 }
0x1fe3   : > { %v6940_v56 = vpop.f32.mrf.mxu1 }
0x2052   : > { %v5813_v27 = vpop.trf.xlu0 }
0x2053   : > { %6950 = vmatmul.mubr.msk.f32.vlgmr.msra.gmra.mxu0 %vm913_vm0, %v5813_v27 }
0x2054   : > { %6979 = vmatprep.mubr.msk.f32.mxu0 %vm7693_vm1, %v7692_v21  ;;  %6964 = vmatpush3.msra.mxu0 %v6503_v23 }
0x2055   : > { %6965 = vmatprep.subr.mxu0 %v7692_v21 }
0x2056   : > { %6966 = vmatpush3.msra.mxu0 %v6502_v59 }
0x2057   : > { %6967 = vmatprep.subr.mxu0 %v7692_v21 }
0x2058   : > { %6968 = vmatpush3.msra.mxu0 %v6501_v61 }
0x2059   : > { %6969 = vmatprep.subr.mxu0 %v7692_v21 }
0x205a   : > { %6970 = vmatpush3.msra.mxu0 %v6500_v60 }
0x205b   : > { %6971 = vmatprep.subr.mxu0 %v7692_v21 }
0x205c   : > { %6972 = vmatpush3.msra.mxu0 %v6499_v24 }
0x205d   : > { %6973 = vmatprep.subr.mxu0 %v7692_v21 }
0x205e   : > { %6974 = vmatpush3.msra.mxu0 %v6498_v25 }
0x205f   : > { %6975 = vmatprep.subr.mxu0 %v7692_v21 }
0x2060   : > { %6976 = vmatpush3.msra.mxu0 %v6497_v28 }
0x2061   : > { %6977 = vmatprep.subr.mxu0 %v7692_v21 }
0x2062   : > { %6978 = vmatpush3.msra.mxu0 %v6496_v29 }
0x2113   : > { %v5911_v47 = vpop.f32.mrf.mxu0 }
0x2114   : > { %v5912_v12 = vadd.f32 %v6492_v57, %v5911_v47 }
0x2115   : > { %v6951_v58 = vpop.f32.mrf.mxu0 }
0x2116   : > { %5916 = vrot.lane.b32.xlu0 %v5912_v12, %s8827_s10 }
0x211a   : > { %5925 = vrot.lane.b32.xlu0 %v8515_v6, %s8828_s8  ;;  %v8642_v6 = vadd.f32 %v8475_v36, %v3541_v39  ;;  %v5953_v36 = vld [vmem:[#allocation19 + $0x20] sm:$0xff] }
0x211b   : > { %6959 = vmatpush3.msra.mxu1 %v5953_v36 }
0x211c   : > { %v6137_v21 = vadd.f32 1.0, %v8642_v6 }
0x211e   : > { %v6141_v52 = vrot.slane %v6137_v21, %v8154_v37 }
0x2188   : > { %v5917_v40 = vpop.permute.xlu0 %5916 }
0x2189   : > { %v5919_v62 = vmul.f32 %v5917_v40, %v8548_v48  ;;  %v6147_v48 = vrot.slane %v8642_v6, %v8154_v37 }
0x218b   : > { %5921 = vrot.lane.b32.xlu1 %v5919_v62, %s8827_s10  ;;  %s868_s10 = scalar_lea.vmem [#allocation23], %s6402_s12 }
0x218c   : > { %v5926_v2 = vpop.permute.xlu0 %5925  ;;  %s6168_s9 = sshll.u32 %s868_s10, 4  ;;  %s6169_s9 = int_to_ptr.vmem [resolvable:$true] %s6168_s9 }
0x218d   : > { %s7585_s0 = scalar_lea.vmem %s6169_s9, 128 }
0x218e   : > { %p7586_p1 = scmp.ne.s32.totalorder %s6169_s9, %s7585_s0 }
0x2190   : > { %p7587_p4 = pnand %p7586_p1, %p8830_p3 }
0x2192   : > { %p7588_p6 = pneg %p7587_p4 }
0x21fd   : > { %v5922_v63 = vpop.permute.xlu1 %5921 }
0x21fe   : > { %v5924_v1 = vadd.f32 %v5922_v63, %v8552_v53 }
0x2200   : > { %v8635_v3 = vadd.f32 %v5926_v2, %v5924_v1 }
0x2202   : > { %v5929_v38 = vsel %vm913_vm0, %v8635_v3, 0.0 }
0x2203   : > { %5930 = vadd.xlane.f32.xlu0 %v5929_v38 }
0x2219   : > { %6149 = vrot.lane.b32.xlu0 %v6147_v48, %s8826_s6  ;;  %s6507_s6 = sshll.u32 %s7829_s29, 7  ;;  %s7697_s29 = smov [#allocation23]  }
0x221a   : > { %s6166_s13 = scalar_lea.hbm %s8829_s3, %s6507_s6  ;;  %s7589_s22 = sshll.u32 %s7697_s29, 4  ;;  %s7590_s22 = int_to_ptr.vmem [resolvable:$false] %s7589_s22 }
0x221b   : > { %s7591_s12 = scalar_lea.vmem %s7590_s22, 256  ;;  %p7592_p10 = scmp.lt.s32.totalorder %s6169_s9, %s7590_s22 }
0x221c   : > { %p7593_p11 = scmp.lt.s32.totalorder %s7591_s12, %s7585_s0 }
0x221e   : > { %p7594_p7 = por %p7593_p11, %p7592_p10 }
0x2220   : > { %p7595_p12 = pnand %p7594_p7, %p7588_p6 }
0x228c   : > { %v5931_v7 = vpop.xlane.xlu0 %5930 }
0x228d   : > { %v5932_v53 = vmul.f32 0.03125, %v5931_v7 }
0x228f   : > { %v5933_v8 = vsub.f32 %v8635_v3, %v5932_v53 }
0x2290   : > { %v6150_v56 = vpop.permute.xlu0 %6149 }
0x2291   : > { %v5934_v9 = vmul.f32 %v5933_v8, %v5933_v8 }
0x2293   : > { %v5935_v10 = vsel %vm913_vm0, %v5934_v9, 0.0 }
0x2294   : > { %5936 = vadd.xlane.f32.xlu1 %v5935_v10 }
0x231d   : > { %v5937_v4 = vpop.xlane.xlu1 %5936 }
0x231e   : > { %v5938_v14 = vmul.f32 0.03125, %v5937_v4 }
0x2320   : > { %v5939_v5 = vadd.f32 1e-05, %v5938_v14 }
0x2322   : > { %7240 = vrsqrt.f32 %v5939_v5 }
0x232f   : > { %v7241_v17 = vpop.eup %7240 }
0x2330   : > { %v5941_v18 = vmul.f32 %v7241_v17, %v5933_v8 }
0x2332   : > { %v5946_v20 = vmul.f32 %v5945_v16, %v5941_v18 }
0x2334   : > { %v5951_v46 = vadd.f32 %v5950_v19, %v5946_v20 }
0x2336   : > { %6961 = vmatmul.mubr.msk.f32.vlgmr.msra.gmra.mxu1 %vm913_vm0, %v5951_v46 }
0x23f6   : > { %v6034_v31 = vpop.f32.mrf.mxu1 }
0x23f7   : > { %v6035_v32 = vadd.f32 %v6494_v30, %v6034_v31 }
0x23f8   : > { %v6962_v33 = vpop.f32.mrf.mxu1 }
0x23f9   : > { %v6038_v34 = vmul.f32 %v6035_v32, %v6035_v32 }
0x23fb   : > { %v6039_v35 = vmul.f32 %v6038_v34, %v6035_v32 }
0x23fd   : > { %v6040_v0 = vmul.f32 0.044715, %v6039_v35 }
0x23ff   : > { %v6041_v41 = vadd.f32 %v6040_v0, %v6035_v32 }
0x2401   : > { %v6042_v42 = vmul.f32 0.7978846, %v6041_v41 }
0x2403   : > { %7242 = vtanh.f32 %v6042_v42 }
0x2410   : > { %v7243_v43 = vpop.eup %7242 }
0x2411   : > { %v6044_v44 = vadd.f32 1.0, %v7243_v43 }
0x2413   : > { %v6045_v45 = vmul.f32 0.5, %v6044_v44 }
0x2415   : > { %v6046_v49 = vmul.f32 %v6045_v45, %v6035_v32 }
0x2417   : > { %6980 = vmatmul.mubr.msk.f32.vlgmr.msra.gmra.mxu0 %vm3428_vm3, %v6046_v49 }
0x24d7   : > { %v6133_v15 = vpop.f32.mrf.mxu0 }
0x24d8   : > { %v6134_v22 = vadd.f32 %v6504_v50, %v6133_v15 }
0x24d9   : > { %v6981_v26 = vpop.f32.mrf.mxu0 }
0x24da   : > { %v6142_v54 = vmul.f32 %v6141_v52, %v6134_v22 }
0x24dc   : > { %v6143_v55 = vadd.f32 %v6142_v54, %v8635_v3 }
0x24de   : > { %v6152_v27 = vadd.f32 %v6150_v56, %v6143_v55 }
0x24e0   : > { %6153 = vst.msk [vmem:[%s868_s10] sm:$0xff] %vm913_vm0, %v6152_v27 }
0x24e1   : > { %7598 = shalt.err (!%p7595_p12)
}
0x24e2   : > { %s7599_s28 = scalar_lea.hbm %s6166_s13, 128  ;;  %s7603_s10 = scalar_lea.hbm %s8829_s3, 256 }
0x24e3   : > { %p7600_p5 = scmp.ne.s32.totalorder %s6166_s13, %s7599_s28  ;;  %p7604_p9 = scmp.lt.s32.totalorder %s6166_s13, %s8829_s3 }
0x24e4   : > { %p7605_p0 = scmp.lt.s32.totalorder %s7603_s10, %s7599_s28 }
0x24e5   : > { %p7601_p2 = pnand %p7600_p5, %p8830_p3 }
0x24e6   : > { %p7606_p13 = por %p7605_p0, %p7604_p9 }
0x24e7   : > { %p7602_p8 = pneg %p7601_p2 }
0x24e9   : > { %p7607_p1 = pnand %p7606_p13, %p7602_p8 }
0x24eb   : > { %7610 = shalt.err (!%p7607_p1)
}
0x24ec   : > { %7032 = dma.vmem_to_hbm [thread:$0]  (%p8830_p3), %s6169_s9, 128, %s6166_s13, %s6155_s14  }
0x24ed PF: > { %s6180_s0 = sand.u32 1, %s7661_s2   ;;  %p8831_p4 = scmp.ne.s32.totalorder %s8803_s30, 0 }
0x24ee   : > { %p8832_p6 = scmp.ge.s32.totalorder %s7673_s27, 2  ;;  %s6181_s29 = scalar_lea.sflag [#allocation4], %s6180_s0 }
0x24f0   : > { %p7076_p10 = pnand %p8832_p6, %p8831_p4 }
0x24f2   : > { %p7077_p11 = pneg %p7076_p10 }
0x24f4   : > { %7656 = dma.done.wait (%p7077_p11), %s6181_s29, 128  }
0x24f5   : > { %7658 = vsyncadd (%p7077_p11), %s6181_s29, 4294967168  ;;  %p40_p7 = scmp.ge.s32.totalorder %s7989_s1, 4   ;;  %s8833_s2 = smov %s7665_s25 }
0x24f6   : > { %s8834_s25 = smov %s7669_s26  ;;  %s8835_s26 = smov %s8000_s4 }
0x24f7   : > { %s8836_s27 = smov %s7989_s1  ;;  %42 = sbr.rel (!%p40_p7) target bundleno = 29 (0x1d), region = 221 }
0x24fc   :  { %6186 = vsyncpa [#allocation3], 1 }
0x24fd   :  { %6188 = vsyncpa [#allocation3 + $0x1], 1 }
0x24fe   :  { %6189 = vsyncpa [#allocation6], 1 }
0x24ff   :  { %6190 = vsyncpa [#allocation9], 1 }
0x2500   :  { %6191 = vsyncpa [#allocation12], 1 }
0x2501   :  { %6192 = vsyncpa [#allocation15], 1 }
0x2502   :  { %6193 = vsyncpa [#allocation18], 1 }
0x2503   :  { %6194 = vsyncpa [#allocation21], 1 }
0x2504   :  { %6195 = vsyncpa [#allocation4], 1 }
0x2505   :  { %6197 = vsyncpa [#allocation4 + $0x1], 1 }

</bundles_post_ra>
